<compile_context>
chip_gen: v7x
topology: tpu7x:2x2x1
jax: 0.10.0
libtpu: 0.0.40
codegen_flags: <defaults>
</compile_context>

<pallas_src>
import functools

import numpy as np

import jax
import jax.numpy as jnp
from jax.experimental import pallas as pl
from jax.experimental.pallas import tpu as pltpu

LANE = 128


def _round_up(x, m):
    return ((x + m - 1) // m) * m


# ----------------------------------------------------------------------------
# Static geometry of the zero-padded flattened layout for one (H, W).
# ----------------------------------------------------------------------------
class _Geom:
    def __init__(self, H, W, cp):
        self.H, self.W = H, W
        self.Wp = W + 2                          # row stride of the padded image
        self.rows = H * self.Wp                  # compact output rows with data
        mq = _round_up(self.rows, 8)
        # M-chunk size: keep the (bm x tn) f32 accumulator in the vreg file.
        self.bm = mq if mq <= 128 else (32 if cp > 256 else 64)
        self.nm = -(-mq // self.bm)
        self.mq_pad = self.nm * self.bm
        # Extra front rows so the padded-flat output write offset is 8-aligned.
        self.f_out = (-(self.Wp + 1)) % 8
        self.out_off = self.f_out + self.Wp + 1  # multiple of 8
        span = 2 * self.Wp + 2 + self.mq_pad     # max rows a conv reads past its base
        self.L0 = _round_up(max((H + 2) * self.Wp, span), 8)  # conv0 input length
        self.L1 = _round_up(self.f_out + span, 8)             # conv0 out / conv1 in


# ----------------------------------------------------------------------------
# Pallas kernel: fused multi-tap (im2col-free) 3x3 conv-as-matmul.
#
#   out[n, p, :] = relu( sum_t x[n, p + taps[t], :] @ w[t] + b  (+ x_center) )
#   (+ optional fused 1x1 latent head on the result)
#
# x is a bf16 activation flattened over a zero-padded spatial grid (row stride
# W + 2) whose padded image starts at a static row `base`; the 3x3 taps are 9
# constant row offsets.  Accumulation is f32 in registers per M-chunk; the
# grid only tiles Cout.
# ----------------------------------------------------------------------------
def _tap_conv_kernel(*refs, n_batch, taps, bm, nm, relu, res, flat, out_off,
                     has_head):
    it = iter(refs)
    x_ref = next(it)
    w_ref = next(it)
    b_ref = next(it)
    m_ref = next(it) if flat else None
    hw_ref = next(it) if has_head else None
    hb_ref = next(it) if has_head else None
    o_ref = next(it)
    ho_ref = next(it) if has_head else None

    tn = o_ref.shape[-1]
    bias = b_ref[...].astype(jnp.float32)                      # read once
    hbias = hb_ref[...].astype(jnp.float32) if has_head else None

    def chunk(n, r0):
        # r0: first compact output row of this chunk (static or traced int).
        acc = jnp.broadcast_to(bias, (bm, tn))                 # bias-initialized
        center = None
        for t, off in enumerate(taps):
            a = x_ref[n, pl.ds(r0 + off, bm), :]               # (bm, Kp) bf16
            if t == 4:
                center = a                                     # residual == center tap
            acc = acc + jnp.dot(a, w_ref[t],
                                preferred_element_type=jnp.float32)
        if res:
            acc = acc + center.astype(jnp.float32)
        if relu:
            acc = jnp.maximum(acc, 0.0)
        if flat:
            # zero junk columns / junk rows so the flat output is a valid
            # zero-padded image for the next conv.
            m = m_ref[pl.ds(r0, bm), :]                        # (bm, 1) f32 0/1
            o_ref[n, pl.ds(r0 + out_off, bm), :] = (acc * m).astype(o_ref.dtype)
        else:
            o_ref[n, pl.ds(r0, bm), :] = acc.astype(o_ref.dtype)
        if has_head:
            h = jnp.dot(acc.astype(jnp.bfloat16), hw_ref[...],
                        preferred_element_type=jnp.float32) + hbias
            ho_ref[n, pl.ds(r0, bm), :] = h.astype(ho_ref.dtype)

    for n in range(n_batch):
        if flat:
            # zero the top / bottom border rows of the padded-flat output.
            o_ref[n, 0:out_off, :] = jnp.zeros((out_off, tn), o_ref.dtype)
            tail0 = out_off + nm * bm
            tail = o_ref.shape[1] - tail0
            if tail > 0:
                o_ref[n, tail0:tail0 + tail, :] = jnp.zeros((tail, tn),
                                                            o_ref.dtype)
        if nm <= 8:
            for c in range(nm):                                # fully static
                chunk(n, c * bm)
        else:
            # large spatial extents: rolled loop keeps the trace bounded
            def body(c, carry):
                chunk(n, pl.multiple_of(c * bm, bm))
                return carry
            jax.lax.fori_loop(0, nm, body, 0)


def _tap_conv(x, w, b, *, g, base, relu, res, flat, tn,
              head_w=None, head_b=None):
    """One fused 3x3 conv (+bias, +residual, +ReLU, +optional 1x1 head).

    x : (N, Lq, Kp) bf16 activations in flattened zero-padded layout whose
        padded image starts at row `base`.
    w : (9, Kp, Cp) bf16 ; b : (1, Cp) f32.
    Returns the output either compact (N, mq_pad, Cp) bf16 or in padded-flat
    layout (N, L1, Cp) bf16 ready to feed the next conv directly.
    """
    N, Lq, Kp = x.shape
    T, Kp2, Cp = w.shape
    assert T == 9 and Kp2 == Kp and Cp % tn == 0
    nj = Cp // tn
    has_head = head_w is not None
    if res:
        assert nj == 1 and Kp == tn, "residual reuse requires cin == cout tile"
    if has_head:
        assert nj == 1, "fused latent head requires a single Cout tile"

    taps = tuple(base + dy * g.Wp + dx for dy in range(3) for dx in range(3))
    assert taps[-1] + g.mq_pad <= Lq

    kernel = functools.partial(
        _tap_conv_kernel, n_batch=N, taps=taps, bm=g.bm, nm=g.nm, relu=relu,
        res=res, flat=flat, out_off=g.out_off, has_head=has_head)

    in_specs = [
        pl.BlockSpec((N, Lq, Kp), lambda j: (0, 0, 0)),   # resident bf16 activations
        pl.BlockSpec((T, Kp, tn), lambda j: (0, 0, j)),   # bf16 weight slab
        pl.BlockSpec((1, tn), lambda j: (0, j)),          # bias
    ]
    args = [x, w, b]
    if flat:
        p_idx = np.arange(g.mq_pad)
        keep = ((p_idx % g.Wp) < g.W) & (p_idx < g.rows)
        mask = jnp.asarray(keep.astype(np.float32).reshape(g.mq_pad, 1))
        in_specs.append(pl.BlockSpec((g.mq_pad, 1), lambda j: (0, 0)))
        args.append(mask)
    out_rows = g.L1 if flat else g.mq_pad
    out_shape = [jax.ShapeDtypeStruct((N, out_rows, Cp), jnp.bfloat16)]
    out_specs = [pl.BlockSpec((N, out_rows, tn), lambda j: (0, 0, j))]
    if has_head:
        Lp = head_w.shape[1]
        in_specs += [pl.BlockSpec((Cp, Lp), lambda j: (0, 0)),
                     pl.BlockSpec((1, Lp), lambda j: (0, 0))]
        args += [head_w, head_b]
        out_shape.append(jax.ShapeDtypeStruct((N, g.mq_pad, Lp), jnp.float32))
        out_specs.append(pl.BlockSpec((N, g.mq_pad, Lp), lambda j: (0, 0, 0)))

    return pl.pallas_call(
        kernel,
        out_shape=tuple(out_shape) if len(out_shape) > 1 else out_shape[0],
        grid_spec=pltpu.PrefetchScalarGridSpec(
            num_scalar_prefetch=0,
            grid=(nj,),
            in_specs=in_specs,
            out_specs=tuple(out_specs) if len(out_specs) > 1 else out_specs[0]),
        compiler_params=pltpu.CompilerParams(
            dimension_semantics=("parallel",)),
    )(*args)


# ----------------------------------------------------------------------------
# Flattened-layout helpers (only at block boundaries; conv0 -> conv1 needs none).
# ----------------------------------------------------------------------------
def nhwc_to_flat(x, kp, length):
    """(N,H,W,C) -> (N,length,kp) bf16: spatial zero-pad by 1, pad channels,
    flatten with row stride W+2 (padded image starts at row 0)."""
    N, H, W, C = x.shape
    xp = jnp.pad(x, ((0, 0), (1, 1), (1, 1), (0, kp - C)))
    xf = xp.reshape(N, (H + 2) * (W + 2), kp)
    xf = jnp.pad(xf, ((0, 0), (0, length - (H + 2) * (W + 2)), (0, 0)))
    return xf.astype(jnp.bfloat16)


def flat_to_nhwc(o, H, W, C):
    """Compact kernel-output layout (N,mq_pad,Cp) -> (N,H,W,C)."""
    N = o.shape[0]
    Wp = W + 2
    return o[:, :H * Wp, :C].reshape(N, H, Wp, C)[:, :, :W, :]


# ----------------------------------------------------------------------------
# Conv block (2 ResLayers + optional fused latent head).
# ----------------------------------------------------------------------------
def conv_block(p, x, latent_dim=None):
    """h = relu(conv0(x)); out = relu(conv1(h) + h); optional 1x1 head."""
    N, H, W, _ = x.shape
    kp0, cp = p["w0"].shape[1], p["w0"].shape[2]
    g = _Geom(H, W, cp)

    xf = nhwc_to_flat(x, kp0, g.L0)
    # conv0 writes straight into the zero-bordered padded-flat layout so conv1
    # consumes it without any XLA re-pad round trip.
    hflat = _tap_conv(xf, p["w0"], p["b0"], g=g, base=0, relu=True,
                      res=False, flat=True, tn=min(256, cp))
    if latent_dim is None:
        out = _tap_conv(hflat, p["w1"], p["b1"], g=g, base=g.f_out, relu=True,
                        res=True, flat=False, tn=cp)
        return flat_to_nhwc(out, H, W, cp)
    # conv1 with the 1x1 latent head fused into its epilogue.
    out, head = _tap_conv(hflat, p["w1"], p["b1"], g=g, base=g.f_out,
                          relu=True, res=True, flat=False, tn=cp,
                          head_w=p["wl"], head_b=p["bl"])
    out_nhwc = flat_to_nhwc(out, H, W, cp)
    ml = flat_to_nhwc(head, H, W, 2 * latent_dim)
    mu, log_sigma = ml[..., :latent_dim], ml[..., latent_dim:]
    return out_nhwc, (mu, jnp.exp(log_sigma))


# ----------------------------------------------------------------------------
# Plain-JAX glue ops (pool / upsample / dropout2d / rsample).
# ----------------------------------------------------------------------------
def avgpool2(x):
    N, H, W, C = x.shape
    return x.reshape(N, H // 2, 2, W // 2, 2, C).mean(axis=(2, 4))


def upsample_nearest(x, size):
    th, tw = size
    N, H, W, _ = x.shape
    return jnp.repeat(jnp.repeat(x, th // H, axis=1), tw // W, axis=2)


def dropout2d(key, x, p):
    """Channel-wise dropout (matches F.dropout2d, training=True)."""
    N, _, _, C = x.shape
    keep = jax.random.bernoulli(key, 1.0 - p, (N, 1, 1, C)).astype(x.dtype)
    return x * keep / (1.0 - p)


def rsample(key, mu, sigma):
    return mu + sigma * jax.random.normal(key, mu.shape, dtype=mu.dtype)


def down_block(p, x, latent_dim=None):
    return conv_block(p, avgpool2(x), latent_dim)


def up_block(p, x, latent_dim=None):
    N, H, W, _ = x.shape
    return conv_block(p, upsample_nearest(x, (2 * H, 2 * W)), latent_dim)


# ----------------------------------------------------------------------------
# Parameters (stored pre-padded / bf16; no per-call padding around kernels).
# ----------------------------------------------------------------------------
def _pack_w3x3(w, kp, cp):
    kh, kw, ci, co = w.shape
    w = w.reshape(kh * kw, ci, co)
    return jnp.pad(w, ((0, 0), (0, kp - ci), (0, cp - co))).astype(jnp.bfloat16)


def _pack_w1x1(w, kp, cp):
    ci, co = w.shape
    return jnp.pad(w, ((0, kp - ci), (0, cp - co))).astype(jnp.bfloat16)


def _pack_bias(b, cp):
    return jnp.pad(b, (0, cp - b.shape[0])).reshape(1, cp).astype(jnp.float32)


def make_raw_block_params(key, cin, cout, latent_dim=None, scale=0.05):
    ks = jax.random.split(key, 3)
    raw = {
        "w0": scale * jax.random.normal(ks[0], (3, 3, cin, cout), jnp.float32),
        "b0": jnp.zeros((cout,), jnp.float32),
        "w1": scale * jax.random.normal(ks[1], (3, 3, cout, cout), jnp.float32),
        "b1": jnp.zeros((cout,), jnp.float32),
    }
    if latent_dim is not None:
        raw["wl"] = scale * jax.random.normal(ks[2], (cout, 2 * latent_dim),
                                              jnp.float32)
        raw["bl"] = jnp.zeros((2 * latent_dim,), jnp.float32)
    return raw


def pack_block_params(raw, latent_dim=None):
    cin, cout = raw["w0"].shape[2], raw["w0"].shape[3]
    kp, cp = _round_up(cin, LANE), _round_up(cout, LANE)
    p = {"w0": _pack_w3x3(raw["w0"], kp, cp), "b0": _pack_bias(raw["b0"], cp),
         "w1": _pack_w3x3(raw["w1"], cp, cp), "b1": _pack_bias(raw["b1"], cp)}
    if latent_dim is not None:
        lp = _round_up(2 * latent_dim, LANE)
        p["wl"] = _pack_w1x1(raw["wl"], cp, lp)
        p["bl"] = _pack_bias(raw["bl"], lp)
    return p


def init_posterior_params(key, num_classes, latent=6):
    ks = jax.random.split(key, 7)
    cin0 = 3 + num_classes + 1
    cfg = [("down1", cin0, 128, None), ("down2", 128, 256, None),
           ("down3", 256, 512, None), ("down4", 512, 256, latent),
           ("up1", 256, 512, None), ("up2", 512 * 2 + latent, 256, latent),
           ("up3", 256 * 2 + latent, 128, latent)]
    return {name: pack_block_params(make_raw_block_params(k, ci, co, ld), ld)
            for (name, ci, co, ld), k in zip(cfg, ks)}


# ----------------------------------------------------------------------------
# Full forward pass (mirrors posterior.forward; dropout in training mode).
# ----------------------------------------------------------------------------
def posterior_forward(params, x_nchw, key, latent=6):
    """Returns dict of distribution params dist{1,2,3} -> (mu, sigma), NCHW."""
    kd1, kd2, kd3, kd4, ks1, ks2 = jax.random.split(key, 6)
    x = jnp.transpose(x_nchw, (0, 2, 3, 1))                        # NCHW -> NHWC

    out1 = down_block(params["down1"], x)                           # 128 @ H/2
    out2 = dropout2d(kd1, down_block(params["down2"], out1), 0.5)   # 256 @ H/4
    out3 = dropout2d(kd2, down_block(params["down3"], out2), 0.3)   # 512 @ H/8
    out4, dist1 = down_block(params["down4"], out3, latent)         # 256 @ H/16

    out = up_block(params["up1"], out4)                             # 512 @ H/8
    lat1 = upsample_nearest(rsample(ks1, *dist1), out3.shape[1:3])
    # TODO(synk): the channel concats are materialized in XLA; feeding the
    # pieces as separate K slabs to the conv kernel would avoid the extra copies.
    out = jnp.concatenate((out3, out, lat1.astype(out.dtype)), axis=-1)
    out = dropout2d(kd3, out, 0.5)
    out, dist2 = up_block(params["up2"], out, latent)               # 256 @ H/4

    lat2 = upsample_nearest(rsample(ks2, *dist2), out2.shape[1:3])
    out = jnp.concatenate((out2, out, lat2.astype(out.dtype)), axis=-1)
    out = dropout2d(kd4, out, 0.5)
    _, dist3 = up_block(params["up3"], out, latent)                 # dist @ H/2

    to_nchw = lambda t: jnp.transpose(t, (0, 3, 1, 2))
    return {"dist1": tuple(map(to_nchw, dist1)),
            "dist2": tuple(map(to_nchw, dist2)),
            "dist3": tuple(map(to_nchw, dist3))}


if __name__ == "__main__":
    num_classes = 4
    latent = 6
    key = jax.random.PRNGKey(0)
    kx, kp_, kf, kchk, kxi = jax.random.split(key, 5)

    # ---- correctness self-check: one full conv block (flat-layout conv0 +
    # residual conv1 + fused 1x1 latent head) vs an f32 lax.conv reference ----
    cin, cout = 8, 128
    raw = make_raw_block_params(kchk, cin, cout, latent)
    blk = pack_block_params(raw, latent)
    xs = jax.random.normal(kxi, (2, 8, 8, cin), jnp.float32)

    out, (mu, sigma) = jax.jit(
        functools.partial(conv_block, latent_dim=latent))(blk, xs)
    jax.block_until_ready((out, mu, sigma))

    conv = lambda a, w: jax.lax.conv_general_dilated(
        a, w, (1, 1), "SAME", dimension_numbers=("NHWC", "HWIO", "NHWC"))
    h_ref = jax.nn.relu(conv(xs, raw["w0"]) + raw["b0"])
    o_ref = jax.nn.relu(conv(h_ref, raw["w1"]) + raw["b1"] + h_ref)
    ml_ref = jnp.einsum("nhwc,cl->nhwl", o_ref, raw["wl"]) + raw["bl"]
    assert float(jnp.max(jnp.abs(out.astype(jnp.float32) - o_ref))) < 5e-2
    assert float(jnp.max(jnp.abs(mu - ml_ref[..., :latent]))) < 5e-2
    assert float(jnp.max(jnp.abs(sigma - jnp.exp(ml_ref[..., latent:])))) < 5e-2

    # ---- full posterior forward ---------------------------------------------
    # NCHW input, batch=2, channels = 3 + num_classes + 1 = 8, spatial 16x16.
    x = jax.random.normal(kx, (2, 3 + num_classes + 1, 16, 16), jnp.float32)
    params = init_posterior_params(kp_, num_classes, latent)

    fwd = jax.jit(functools.partial(posterior_forward, latent=latent))
    dists = fwd(params, x, kf)
    jax.block_until_ready(dists)

    assert dists["dist1"][0].shape == (2, latent, 1, 1)
    assert dists["dist2"][0].shape == (2, latent, 4, 4)
    assert dists["dist3"][0].shape == (2, latent, 8, 8)
    print("KERNEL_OK")
</pallas_src>

<mosaic_0001>
module attributes {stable_mosaic.version = 11 : i64} {
  func.func @_tap_conv_kernel(%arg0: i32, %arg1: memref<2x104x128xbf16, #tpu.memory_space<vmem>>, %arg2: memref<9x128x128xbf16, #tpu.memory_space<vmem>>, %arg3: memref<1x128xf32, #tpu.memory_space<vmem>>, %arg4: memref<80x1xf32, #tpu.memory_space<vmem>>, %arg5: memref<2x112x128xbf16, #tpu.memory_space<vmem>>) attributes {dimension_semantics = [#tpu.dimension_semantics<parallel>], iteration_bounds = array<i64: 1>, scalar_prefetch = 0 : i64, scratch_operands = 0 : i64, tpu.core_type = #tpu.core_type<tc>, window_params = [{pipeline_mode = #tpu.pipeline_mode<synchronous>, transform_indices = @transform_0, window_bounds = array<i64: 2, 104, 128>}, {transform_indices = @transform_1, window_bounds = array<i64: 9, 128, 128>}, {transform_indices = @transform_2, window_bounds = array<i64: 1, 128>}, {pipeline_mode = #tpu.pipeline_mode<synchronous>, transform_indices = @transform_3, window_bounds = array<i64: 80, 1>}, {transform_indices = @transform_4, window_bounds = array<i64: 2, 112, 128>}]} {
    %c0 = arith.constant 0 : index
    %c0_0 = arith.constant 0 : index
    %0 = vector.load %arg3[%c0, %c0_0] : memref<1x128xf32, #tpu.memory_space<vmem>>, vector<1x128xf32>
    %cst = arith.constant 0.000000e+00 : bf16
    %1 = vector.broadcast %cst : bf16 to vector<16x128xbf16>
    %c0_1 = arith.constant 0 : index
    %c0_2 = arith.constant 0 : index
    %c0_3 = arith.constant 0 : index
    %2 = vector.load %arg5[%c0_1, %c0_2, %c0_3] : memref<2x112x128xbf16, #tpu.memory_space<vmem>>, vector<1x16x128xbf16>
    %3 = vector.shape_cast %2 : vector<1x16x128xbf16> to vector<16x128xbf16>
    %4 = vector.shape_cast %1 : vector<16x128xbf16> to vector<1x16x128xbf16>
    tpu.vector_store %arg5[%c0_1, %c0_2, %c0_3], %4 {strides = array<i32>} : memref<2x112x128xbf16, #tpu.memory_space<vmem>>, vector<1x16x128xbf16>,
    %cst_4 = arith.constant 0.000000e+00 : bf16
    %5 = vector.broadcast %cst_4 : bf16 to vector<16x128xbf16>
    %c0_5 = arith.constant 0 : index
    %c96 = arith.constant 96 : index
    %c0_6 = arith.constant 0 : index
    %6 = vector.load %arg5[%c0_5, %c96, %c0_6] : memref<2x112x128xbf16, #tpu.memory_space<vmem>>, vector<1x16x128xbf16>
    %7 = vector.shape_cast %6 : vector<1x16x128xbf16> to vector<16x128xbf16>
    %8 = vector.shape_cast %5 : vector<16x128xbf16> to vector<1x16x128xbf16>
    tpu.vector_store %arg5[%c0_5, %c96, %c0_6], %8 {strides = array<i32>} : memref<2x112x128xbf16, #tpu.memory_space<vmem>>, vector<1x16x128xbf16>,
    %9 = vector.shape_cast %0 : vector<1x128xf32> to vector<1x128xf32>
    %10 = vector.broadcast %9 : vector<1x128xf32> to vector<80x128xf32>
    %c0_7 = arith.constant 0 : index
    %c0_8 = arith.constant 0 : index
    %c0_9 = arith.constant 0 : index
    %11 = vector.load %arg1[%c0_7, %c0_8, %c0_9] : memref<2x104x128xbf16, #tpu.memory_space<vmem>>, vector<1x80x128xbf16>
    %12 = vector.shape_cast %11 : vector<1x80x128xbf16> to vector<80x128xbf16>
    %c0_10 = arith.constant 0 : index
    %c0_11 = arith.constant 0 : index
    %c0_12 = arith.constant 0 : index
    %13 = vector.load %arg2[%c0_10, %c0_11, %c0_12] : memref<9x128x128xbf16, #tpu.memory_space<vmem>>, vector<1x128x128xbf16>
    %14 = vector.shape_cast %13 : vector<1x128x128xbf16> to vector<128x128xbf16>
    %cst_13 = arith.constant dense<0.000000e+00> : vector<80x128xf32>
    %15 = tpu.matmul %12, %14, %cst_13 {dimension_numbers = #tpu.dot_dimension_numbers<[1], [0], [0], [1], [0, 0, 1, 1], [], []>} : vector<80x128xbf16>, vector<128x128xbf16>, vector<80x128xf32> -> vector<80x128xf32>
    %16 = arith.addf %10, %15 : vector<80x128xf32>
    %c0_14 = arith.constant 0 : index
    %c1 = arith.constant 1 : index
    %c0_15 = arith.constant 0 : index
    %17 = vector.load %arg1[%c0_14, %c1, %c0_15] : memref<2x104x128xbf16, #tpu.memory_space<vmem>>, vector<1x80x128xbf16>
    %18 = vector.shape_cast %17 : vector<1x80x128xbf16> to vector<80x128xbf16>
    %c1_16 = arith.constant 1 : index
    %c0_17 = arith.constant 0 : index
    %c0_18 = arith.constant 0 : index
    %19 = vector.load %arg2[%c1_16, %c0_17, %c0_18] : memref<9x128x128xbf16, #tpu.memory_space<vmem>>, vector<1x128x128xbf16>
    %20 = vector.shape_cast %19 : vector<1x128x128xbf16> to vector<128x128xbf16>
    %cst_19 = arith.constant dense<0.000000e+00> : vector<80x128xf32>
    %21 = tpu.matmul %18, %20, %cst_19 {dimension_numbers = #tpu.dot_dimension_numbers<[1], [0], [0], [1], [0, 0, 1, 1], [], []>} : vector<80x128xbf16>, vector<128x128xbf16>, vector<80x128xf32> -> vector<80x128xf32>
    %22 = arith.addf %16, %21 : vector<80x128xf32>
    %c0_20 = arith.constant 0 : index
    %c2 = arith.constant 2 : index
    %c0_21 = arith.constant 0 : index
    %23 = vector.load %arg1[%c0_20, %c2, %c0_21] : memref<2x104x128xbf16, #tpu.memory_space<vmem>>, vector<1x80x128xbf16>
    %24 = vector.shape_cast %23 : vector<1x80x128xbf16> to vector<80x128xbf16>
    %c2_22 = arith.constant 2 : index
    %c0_23 = arith.constant 0 : index
    %c0_24 = arith.constant 0 : index
    %25 = vector.load %arg2[%c2_22, %c0_23, %c0_24] : memref<9x128x128xbf16, #tpu.memory_space<vmem>>, vector<1x128x128xbf16>
    %26 = vector.shape_cast %25 : vector<1x128x128xbf16> to vector<128x128xbf16>
    %cst_25 = arith.constant dense<0.000000e+00> : vector<80x128xf32>
    %27 = tpu.matmul %24, %26, %cst_25 {dimension_numbers = #tpu.dot_dimension_numbers<[1], [0], [0], [1], [0, 0, 1, 1], [], []>} : vector<80x128xbf16>, vector<128x128xbf16>, vector<80x128xf32> -> vector<80x128xf32>
    %28 = arith.addf %22, %27 : vector<80x128xf32>
    %c0_26 = arith.constant 0 : index
    %c10 = arith.constant 10 : index
    %c0_27 = arith.constant 0 : index
    %29 = vector.load %arg1[%c0_26, %c10, %c0_27] : memref<2x104x128xbf16, #tpu.memory_space<vmem>>, vector<1x80x128xbf16>
    %30 = vector.shape_cast %29 : vector<1x80x128xbf16> to vector<80x128xbf16>
    %c3 = arith.constant 3 : index
    %c0_28 = arith.constant 0 : index
    %c0_29 = arith.constant 0 : index
    %31 = vector.load %arg2[%c3, %c0_28, %c0_29] : memref<9x128x128xbf16, #tpu.memory_space<vmem>>, vector<1x128x128xbf16>
    %32 = vector.shape_cast %31 : vector<1x128x128xbf16> to vector<128x128xbf16>
    %cst_30 = arith.constant dense<0.000000e+00> : vector<80x128xf32>
    %33 = tpu.matmul %30, %32, %cst_30 {dimension_numbers = #tpu.dot_dimension_numbers<[1], [0], [0], [1], [0, 0, 1, 1], [], []>} : vector<80x128xbf16>, vector<128x128xbf16>, vector<80x128xf32> -> vector<80x128xf32>
    %34 = arith.addf %28, %33 : vector<80x128xf32>
    %c0_31 = arith.constant 0 : index
    %c11 = arith.constant 11 : index
    %c0_32 = arith.constant 0 : index
    %35 = vector.load %arg1[%c0_31, %c11, %c0_32] : memref<2x104x128xbf16, #tpu.memory_space<vmem>>, vector<1x80x128xbf16>
    %36 = vector.shape_cast %35 : vector<1x80x128xbf16> to vector<80x128xbf16>
    %c4 = arith.constant 4 : index
    %c0_33 = arith.constant 0 : index
    %c0_34 = arith.constant 0 : index
    %37 = vector.load %arg2[%c4, %c0_33, %c0_34] : memref<9x128x128xbf16, #tpu.memory_space<vmem>>, vector<1x128x128xbf16>
    %38 = vector.shape_cast %37 : vector<1x128x128xbf16> to vector<128x128xbf16>
    %cst_35 = arith.constant dense<0.000000e+00> : vector<80x128xf32>
    %39 = tpu.matmul %36, %38, %cst_35 {dimension_numbers = #tpu.dot_dimension_numbers<[1], [0], [0], [1], [0, 0, 1, 1], [], []>} : vector<80x128xbf16>, vector<128x128xbf16>, vector<80x128xf32> -> vector<80x128xf32>
    %40 = arith.addf %34, %39 : vector<80x128xf32>
    %c0_36 = arith.constant 0 : index
    %c12 = arith.constant 12 : index
    %c0_37 = arith.constant 0 : index
    %41 = vector.load %arg1[%c0_36, %c12, %c0_37] : memref<2x104x128xbf16, #tpu.memory_space<vmem>>, vector<1x80x128xbf16>
    %42 = vector.shape_cast %41 : vector<1x80x128xbf16> to vector<80x128xbf16>
    %c5 = arith.constant 5 : index
    %c0_38 = arith.constant 0 : index
    %c0_39 = arith.constant 0 : index
    %43 = vector.load %arg2[%c5, %c0_38, %c0_39] : memref<9x128x128xbf16, #tpu.memory_space<vmem>>, vector<1x128x128xbf16>
    %44 = vector.shape_cast %43 : vector<1x128x128xbf16> to vector<128x128xbf16>
    %cst_40 = arith.constant dense<0.000000e+00> : vector<80x128xf32>
    %45 = tpu.matmul %42, %44, %cst_40 {dimension_numbers = #tpu.dot_dimension_numbers<[1], [0], [0], [1], [0, 0, 1, 1], [], []>} : vector<80x128xbf16>, vector<128x128xbf16>, vector<80x128xf32> -> vector<80x128xf32>
    %46 = arith.addf %40, %45 : vector<80x128xf32>
    %c0_41 = arith.constant 0 : index
    %c20 = arith.constant 20 : index
    %c0_42 = arith.constant 0 : index
    %47 = vector.load %arg1[%c0_41, %c20, %c0_42] : memref<2x104x128xbf16, #tpu.memory_space<vmem>>, vector<1x80x128xbf16>
    %48 = vector.shape_cast %47 : vector<1x80x128xbf16> to vector<80x128xbf16>
    %c6 = arith.constant 6 : index
    %c0_43 = arith.constant 0 : index
    %c0_44 = arith.constant 0 : index
    %49 = vector.load %arg2[%c6, %c0_43, %c0_44] : memref<9x128x128xbf16, #tpu.memory_space<vmem>>, vector<1x128x128xbf16>
    %50 = vector.shape_cast %49 : vector<1x128x128xbf16> to vector<128x128xbf16>
    %cst_45 = arith.constant dense<0.000000e+00> : vector<80x128xf32>
    %51 = tpu.matmul %48, %50, %cst_45 {dimension_numbers = #tpu.dot_dimension_numbers<[1], [0], [0], [1], [0, 0, 1, 1], [], []>} : vector<80x128xbf16>, vector<128x128xbf16>, vector<80x128xf32> -> vector<80x128xf32>
    %52 = arith.addf %46, %51 : vector<80x128xf32>
    %c0_46 = arith.constant 0 : index
    %c21 = arith.constant 21 : index
    %c0_47 = arith.constant 0 : index
    %53 = vector.load %arg1[%c0_46, %c21, %c0_47] : memref<2x104x128xbf16, #tpu.memory_space<vmem>>, vector<1x80x128xbf16>
    %54 = vector.shape_cast %53 : vector<1x80x128xbf16> to vector<80x128xbf16>
    %c7 = arith.constant 7 : index
    %c0_48 = arith.constant 0 : index
    %c0_49 = arith.constant 0 : index
    %55 = vector.load %arg2[%c7, %c0_48, %c0_49] : memref<9x128x128xbf16, #tpu.memory_space<vmem>>, vector<1x128x128xbf16>
    %56 = vector.shape_cast %55 : vector<1x128x128xbf16> to vector<128x128xbf16>
    %cst_50 = arith.constant dense<0.000000e+00> : vector<80x128xf32>
    %57 = tpu.matmul %54, %56, %cst_50 {dimension_numbers = #tpu.dot_dimension_numbers<[1], [0], [0], [1], [0, 0, 1, 1], [], []>} : vector<80x128xbf16>, vector<128x128xbf16>, vector<80x128xf32> -> vector<80x128xf32>
    %58 = arith.addf %52, %57 : vector<80x128xf32>
    %c0_51 = arith.constant 0 : index
    %c22 = arith.constant 22 : index
    %c0_52 = arith.constant 0 : index
    %59 = vector.load %arg1[%c0_51, %c22, %c0_52] : memref<2x104x128xbf16, #tpu.memory_space<vmem>>, vector<1x80x128xbf16>
    %60 = vector.shape_cast %59 : vector<1x80x128xbf16> to vector<80x128xbf16>
    %c8 = arith.constant 8 : index
    %c0_53 = arith.constant 0 : index
    %c0_54 = arith.constant 0 : index
    %61 = vector.load %arg2[%c8, %c0_53, %c0_54] : memref<9x128x128xbf16, #tpu.memory_space<vmem>>, vector<1x128x128xbf16>
    %62 = vector.shape_cast %61 : vector<1x128x128xbf16> to vector<128x128xbf16>
    %cst_55 = arith.constant dense<0.000000e+00> : vector<80x128xf32>
    %63 = tpu.matmul %60, %62, %cst_55 {dimension_numbers = #tpu.dot_dimension_numbers<[1], [0], [0], [1], [0, 0, 1, 1], [], []>} : vector<80x128xbf16>, vector<128x128xbf16>, vector<80x128xf32> -> vector<80x128xf32>
    %64 = arith.addf %58, %63 : vector<80x128xf32>
    %cst_56 = arith.constant 0.000000e+00 : f32
    %65 = vector.broadcast %cst_56 : f32 to vector<80x128xf32>
    %66 = arith.maximumf %64, %65 : vector<80x128xf32>
    %c0_57 = arith.constant 0 : index
    %c0_58 = arith.constant 0 : index
    %67 = vector.load %arg4[%c0_57, %c0_58] : memref<80x1xf32, #tpu.memory_space<vmem>>, vector<80x1xf32>
    %68 = vector.broadcast %67 : vector<80x1xf32> to vector<80x128xf32>
    %69 = arith.mulf %66, %68 : vector<80x128xf32>
    %70 = arith.truncf %69 : vector<80x128xf32> to vector<80x128xbf16>
    %c0_59 = arith.constant 0 : index
    %c16 = arith.constant 16 : index
    %c0_60 = arith.constant 0 : index
    %71 = vector.load %arg5[%c0_59, %c16, %c0_60] : memref<2x112x128xbf16, #tpu.memory_space<vmem>>, vector<1x80x128xbf16>
    %72 = vector.shape_cast %71 : vector<1x80x128xbf16> to vector<80x128xbf16>
    %73 = vector.shape_cast %70 : vector<80x128xbf16> to vector<1x80x128xbf16>
    tpu.vector_store %arg5[%c0_59, %c16, %c0_60], %73 {strides = array<i32>} : memref<2x112x128xbf16, #tpu.memory_space<vmem>>, vector<1x80x128xbf16>,
    %cst_61 = arith.constant 0.000000e+00 : bf16
    %74 = vector.broadcast %cst_61 : bf16 to vector<16x128xbf16>
    %c1_62 = arith.constant 1 : index
    %c0_63 = arith.constant 0 : index
    %c0_64 = arith.constant 0 : index
    %75 = vector.load %arg5[%c1_62, %c0_63, %c0_64] : memref<2x112x128xbf16, #tpu.memory_space<vmem>>, vector<1x16x128xbf16>
    %76 = vector.shape_cast %75 : vector<1x16x128xbf16> to vector<16x128xbf16>
    %77 = vector.shape_cast %74 : vector<16x128xbf16> to vector<1x16x128xbf16>
    tpu.vector_store %arg5[%c1_62, %c0_63, %c0_64], %77 {strides = array<i32>} : memref<2x112x128xbf16, #tpu.memory_space<vmem>>, vector<1x16x128xbf16>,
    %cst_65 = arith.constant 0.000000e+00 : bf16
    %78 = vector.broadcast %cst_65 : bf16 to vector<16x128xbf16>
    %c1_66 = arith.constant 1 : index
    %c96_67 = arith.constant 96 : index
    %c0_68 = arith.constant 0 : index
    %79 = vector.load %arg5[%c1_66, %c96_67, %c0_68] : memref<2x112x128xbf16, #tpu.memory_space<vmem>>, vector<1x16x128xbf16>
    %80 = vector.shape_cast %79 : vector<1x16x128xbf16> to vector<16x128xbf16>
    %81 = vector.shape_cast %78 : vector<16x128xbf16> to vector<1x16x128xbf16>
    tpu.vector_store %arg5[%c1_66, %c96_67, %c0_68], %81 {strides = array<i32>} : memref<2x112x128xbf16, #tpu.memory_space<vmem>>, vector<1x16x128xbf16>,
    %82 = vector.shape_cast %0 : vector<1x128xf32> to vector<1x128xf32>
    %83 = vector.broadcast %82 : vector<1x128xf32> to vector<80x128xf32>
    %c1_69 = arith.constant 1 : index
    %c0_70 = arith.constant 0 : index
    %c0_71 = arith.constant 0 : index
    %84 = vector.load %arg1[%c1_69, %c0_70, %c0_71] : memref<2x104x128xbf16, #tpu.memory_space<vmem>>, vector<1x80x128xbf16>
    %85 = vector.shape_cast %84 : vector<1x80x128xbf16> to vector<80x128xbf16>
    %c0_72 = arith.constant 0 : index
    %c0_73 = arith.constant 0 : index
    %c0_74 = arith.constant 0 : index
    %86 = vector.load %arg2[%c0_72, %c0_73, %c0_74] : memref<9x128x128xbf16, #tpu.memory_space<vmem>>, vector<1x128x128xbf16>
    %87 = vector.shape_cast %86 : vector<1x128x128xbf16> to vector<128x128xbf16>
    %cst_75 = arith.constant dense<0.000000e+00> : vector<80x128xf32>
    %88 = tpu.matmul %85, %87, %cst_75 {dimension_numbers = #tpu.dot_dimension_numbers<[1], [0], [0], [1], [0, 0, 1, 1], [], []>} : vector<80x128xbf16>, vector<128x128xbf16>, vector<80x128xf32> -> vector<80x128xf32>
    %89 = arith.addf %83, %88 : vector<80x128xf32>
    %c1_76 = arith.constant 1 : index
    %c1_77 = arith.constant 1 : index
    %c0_78 = arith.constant 0 : index
    %90 = vector.load %arg1[%c1_76, %c1_77, %c0_78] : memref<2x104x128xbf16, #tpu.memory_space<vmem>>, vector<1x80x128xbf16>
    %91 = vector.shape_cast %90 : vector<1x80x128xbf16> to vector<80x128xbf16>
    %c1_79 = arith.constant 1 : index
    %c0_80 = arith.constant 0 : index
    %c0_81 = arith.constant 0 : index
    %92 = vector.load %arg2[%c1_79, %c0_80, %c0_81] : memref<9x128x128xbf16, #tpu.memory_space<vmem>>, vector<1x128x128xbf16>
    %93 = vector.shape_cast %92 : vector<1x128x128xbf16> to vector<128x128xbf16>
    %cst_82 = arith.constant dense<0.000000e+00> : vector<80x128xf32>
    %94 = tpu.matmul %91, %93, %cst_82 {dimension_numbers = #tpu.dot_dimension_numbers<[1], [0], [0], [1], [0, 0, 1, 1], [], []>} : vector<80x128xbf16>, vector<128x128xbf16>, vector<80x128xf32> -> vector<80x128xf32>
    %95 = arith.addf %89, %94 : vector<80x128xf32>
    %c1_83 = arith.constant 1 : index
    %c2_84 = arith.constant 2 : index
    %c0_85 = arith.constant 0 : index
    %96 = vector.load %arg1[%c1_83, %c2_84, %c0_85] : memref<2x104x128xbf16, #tpu.memory_space<vmem>>, vector<1x80x128xbf16>
    %97 = vector.shape_cast %96 : vector<1x80x128xbf16> to vector<80x128xbf16>
    %c2_86 = arith.constant 2 : index
    %c0_87 = arith.constant 0 : index
    %c0_88 = arith.constant 0 : index
    %98 = vector.load %arg2[%c2_86, %c0_87, %c0_88] : memref<9x128x128xbf16, #tpu.memory_space<vmem>>, vector<1x128x128xbf16>
    %99 = vector.shape_cast %98 : vector<1x128x128xbf16> to vector<128x128xbf16>
    %cst_89 = arith.constant dense<0.000000e+00> : vector<80x128xf32>
    %100 = tpu.matmul %97, %99, %cst_89 {dimension_numbers = #tpu.dot_dimension_numbers<[1], [0], [0], [1], [0, 0, 1, 1], [], []>} : vector<80x128xbf16>, vector<128x128xbf16>, vector<80x128xf32> -> vector<80x128xf32>
    %101 = arith.addf %95, %100 : vector<80x128xf32>
    %c1_90 = arith.constant 1 : index
    %c10_91 = arith.constant 10 : index
    %c0_92 = arith.constant 0 : index
    %102 = vector.load %arg1[%c1_90, %c10_91, %c0_92] : memref<2x104x128xbf16, #tpu.memory_space<vmem>>, vector<1x80x128xbf16>
    %103 = vector.shape_cast %102 : vector<1x80x128xbf16> to vector<80x128xbf16>
    %c3_93 = arith.constant 3 : index
    %c0_94 = arith.constant 0 : index
    %c0_95 = arith.constant 0 : index
    %104 = vector.load %arg2[%c3_93, %c0_94, %c0_95] : memref<9x128x128xbf16, #tpu.memory_space<vmem>>, vector<1x128x128xbf16>
    %105 = vector.shape_cast %104 : vector<1x128x128xbf16> to vector<128x128xbf16>
    %cst_96 = arith.constant dense<0.000000e+00> : vector<80x128xf32>
    %106 = tpu.matmul %103, %105, %cst_96 {dimension_numbers = #tpu.dot_dimension_numbers<[1], [0], [0], [1], [0, 0, 1, 1], [], []>} : vector<80x128xbf16>, vector<128x128xbf16>, vector<80x128xf32> -> vector<80x128xf32>
    %107 = arith.addf %101, %106 : vector<80x128xf32>
    %c1_97 = arith.constant 1 : index
    %c11_98 = arith.constant 11 : index
    %c0_99 = arith.constant 0 : index
    %108 = vector.load %arg1[%c1_97, %c11_98, %c0_99] : memref<2x104x128xbf16, #tpu.memory_space<vmem>>, vector<1x80x128xbf16>
    %109 = vector.shape_cast %108 : vector<1x80x128xbf16> to vector<80x128xbf16>
    %c4_100 = arith.constant 4 : index
    %c0_101 = arith.constant 0 : index
    %c0_102 = arith.constant 0 : index
    %110 = vector.load %arg2[%c4_100, %c0_101, %c0_102] : memref<9x128x128xbf16, #tpu.memory_space<vmem>>, vector<1x128x128xbf16>
    %111 = vector.shape_cast %110 : vector<1x128x128xbf16> to vector<128x128xbf16>
    %cst_103 = arith.constant dense<0.000000e+00> : vector<80x128xf32>
    %112 = tpu.matmul %109, %111, %cst_103 {dimension_numbers = #tpu.dot_dimension_numbers<[1], [0], [0], [1], [0, 0, 1, 1], [], []>} : vector<80x128xbf16>, vector<128x128xbf16>, vector<80x128xf32> -> vector<80x128xf32>
    %113 = arith.addf %107, %112 : vector<80x128xf32>
    %c1_104 = arith.constant 1 : index
    %c12_105 = arith.constant 12 : index
    %c0_106 = arith.constant 0 : index
    %114 = vector.load %arg1[%c1_104, %c12_105, %c0_106] : memref<2x104x128xbf16, #tpu.memory_space<vmem>>, vector<1x80x128xbf16>
    %115 = vector.shape_cast %114 : vector<1x80x128xbf16> to vector<80x128xbf16>
    %c5_107 = arith.constant 5 : index
    %c0_108 = arith.constant 0 : index
    %c0_109 = arith.constant 0 : index
    %116 = vector.load %arg2[%c5_107, %c0_108, %c0_109] : memref<9x128x128xbf16, #tpu.memory_space<vmem>>, vector<1x128x128xbf16>
    %117 = vector.shape_cast %116 : vector<1x128x128xbf16> to vector<128x128xbf16>
    %cst_110 = arith.constant dense<0.000000e+00> : vector<80x128xf32>
    %118 = tpu.matmul %115, %117, %cst_110 {dimension_numbers = #tpu.dot_dimension_numbers<[1], [0], [0], [1], [0, 0, 1, 1], [], []>} : vector<80x128xbf16>, vector<128x128xbf16>, vector<80x128xf32> -> vector<80x128xf32>
    %119 = arith.addf %113, %118 : vector<80x128xf32>
    %c1_111 = arith.constant 1 : index
    %c20_112 = arith.constant 20 : index
    %c0_113 = arith.constant 0 : index
    %120 = vector.load %arg1[%c1_111, %c20_112, %c0_113] : memref<2x104x128xbf16, #tpu.memory_space<vmem>>, vector<1x80x128xbf16>
    %121 = vector.shape_cast %120 : vector<1x80x128xbf16> to vector<80x128xbf16>
    %c6_114 = arith.constant 6 : index
    %c0_115 = arith.constant 0 : index
    %c0_116 = arith.constant 0 : index
    %122 = vector.load %arg2[%c6_114, %c0_115, %c0_116] : memref<9x128x128xbf16, #tpu.memory_space<vmem>>, vector<1x128x128xbf16>
    %123 = vector.shape_cast %122 : vector<1x128x128xbf16> to vector<128x128xbf16>
    %cst_117 = arith.constant dense<0.000000e+00> : vector<80x128xf32>
    %124 = tpu.matmul %121, %123, %cst_117 {dimension_numbers = #tpu.dot_dimension_numbers<[1], [0], [0], [1], [0, 0, 1, 1], [], []>} : vector<80x128xbf16>, vector<128x128xbf16>, vector<80x128xf32> -> vector<80x128xf32>
    %125 = arith.addf %119, %124 : vector<80x128xf32>
    %c1_118 = arith.constant 1 : index
    %c21_119 = arith.constant 21 : index
    %c0_120 = arith.constant 0 : index
    %126 = vector.load %arg1[%c1_118, %c21_119, %c0_120] : memref<2x104x128xbf16, #tpu.memory_space<vmem>>, vector<1x80x128xbf16>
    %127 = vector.shape_cast %126 : vector<1x80x128xbf16> to vector<80x128xbf16>
    %c7_121 = arith.constant 7 : index
    %c0_122 = arith.constant 0 : index
    %c0_123 = arith.constant 0 : index
    %128 = vector.load %arg2[%c7_121, %c0_122, %c0_123] : memref<9x128x128xbf16, #tpu.memory_space<vmem>>, vector<1x128x128xbf16>
    %129 = vector.shape_cast %128 : vector<1x128x128xbf16> to vector<128x128xbf16>
    %cst_124 = arith.constant dense<0.000000e+00> : vector<80x128xf32>
    %130 = tpu.matmul %127, %129, %cst_124 {dimension_numbers = #tpu.dot_dimension_numbers<[1], [0], [0], [1], [0, 0, 1, 1], [], []>} : vector<80x128xbf16>, vector<128x128xbf16>, vector<80x128xf32> -> vector<80x128xf32>
    %131 = arith.addf %125, %130 : vector<80x128xf32>
    %c1_125 = arith.constant 1 : index
    %c22_126 = arith.constant 22 : index
    %c0_127 = arith.constant 0 : index
    %132 = vector.load %arg1[%c1_125, %c22_126, %c0_127] : memref<2x104x128xbf16, #tpu.memory_space<vmem>>, vector<1x80x128xbf16>
    %133 = vector.shape_cast %132 : vector<1x80x128xbf16> to vector<80x128xbf16>
    %c8_128 = arith.constant 8 : index
    %c0_129 = arith.constant 0 : index
    %c0_130 = arith.constant 0 : index
    %134 = vector.load %arg2[%c8_128, %c0_129, %c0_130] : memref<9x128x128xbf16, #tpu.memory_space<vmem>>, vector<1x128x128xbf16>
    %135 = vector.shape_cast %134 : vector<1x128x128xbf16> to vector<128x128xbf16>
    %cst_131 = arith.constant dense<0.000000e+00> : vector<80x128xf32>
    %136 = tpu.matmul %133, %135, %cst_131 {dimension_numbers = #tpu.dot_dimension_numbers<[1], [0], [0], [1], [0, 0, 1, 1], [], []>} : vector<80x128xbf16>, vector<128x128xbf16>, vector<80x128xf32> -> vector<80x128xf32>
    %137 = arith.addf %131, %136 : vector<80x128xf32>
    %cst_132 = arith.constant 0.000000e+00 : f32
    %138 = vector.broadcast %cst_132 : f32 to vector<80x128xf32>
    %139 = arith.maximumf %137, %138 : vector<80x128xf32>
    %c0_133 = arith.constant 0 : index
    %c0_134 = arith.constant 0 : index
    %140 = vector.load %arg4[%c0_133, %c0_134] : memref<80x1xf32, #tpu.memory_space<vmem>>, vector<80x1xf32>
    %141 = vector.broadcast %140 : vector<80x1xf32> to vector<80x128xf32>
    %142 = arith.mulf %139, %141 : vector<80x128xf32>
    %143 = arith.truncf %142 : vector<80x128xf32> to vector<80x128xbf16>
    %c1_135 = arith.constant 1 : index
    %c16_136 = arith.constant 16 : index
    %c0_137 = arith.constant 0 : index
    %144 = vector.load %arg5[%c1_135, %c16_136, %c0_137] : memref<2x112x128xbf16, #tpu.memory_space<vmem>>, vector<1x80x128xbf16>
    %145 = vector.shape_cast %144 : vector<1x80x128xbf16> to vector<80x128xbf16>
    %146 = vector.shape_cast %143 : vector<80x128xbf16> to vector<1x80x128xbf16>
    tpu.vector_store %arg5[%c1_135, %c16_136, %c0_137], %146 {strides = array<i32>} : memref<2x112x128xbf16, #tpu.memory_space<vmem>>, vector<1x80x128xbf16>,
    return
  }
  func.func @transform_0(%arg0: i32) -> (i32, i32, i32) {
    %c0_i32 = arith.constant 0 : i32
    %c0_i32_0 = arith.constant 0 : i32
    %c0_i32_1 = arith.constant 0 : i32
    %c0_i32_2 = arith.constant 0 : i32
    return %c0_i32, %c0_i32_0, %c0_i32_1 : i32, i32, i32
  }
  func.func @transform_1(%arg0: i32) -> (i32, i32, i32) {
    %c0_i32 = arith.constant 0 : i32
    %c0_i32_0 = arith.constant 0 : i32
    %c0_i32_1 = arith.constant 0 : i32
    return %c0_i32, %c0_i32_0, %arg0 : i32, i32, i32
  }
  func.func @transform_2(%arg0: i32) -> (i32, i32) {
    %c0_i32 = arith.constant 0 : i32
    %c0_i32_0 = arith.constant 0 : i32
    return %c0_i32, %arg0 : i32, i32
  }
  func.func @transform_3(%arg0: i32) -> (i32, i32) {
    %c0_i32 = arith.constant 0 : i32
    %c0_i32_0 = arith.constant 0 : i32
    %c0_i32_1 = arith.constant 0 : i32
    return %c0_i32, %c0_i32_0 : i32, i32
  }
  func.func @transform_4(%arg0: i32) -> (i32, i32, i32) {
    %c0_i32 = arith.constant 0 : i32
    %c0_i32_0 = arith.constant 0 : i32
    %c0_i32_1 = arith.constant 0 : i32
    return %c0_i32, %c0_i32_0, %arg0 : i32, i32, i32
  }
}

module attributes {stable_mosaic.version = 11 : i64} {
  func.func @_tap_conv_kernel(%arg0: i32, %arg1: memref<2x112x128xbf16, #tpu.memory_space<vmem>>, %arg2: memref<9x128x128xbf16, #tpu.memory_space<vmem>>, %arg3: memref<1x128xf32, #tpu.memory_space<vmem>>, %arg4: memref<128x128xbf16, #tpu.memory_space<vmem>>, %arg5: memref<1x128xf32, #tpu.memory_space<vmem>>, %arg6: memref<2x80x128xbf16, #tpu.memory_space<vmem>>, %arg7: memref<2x80x128xf32, #tpu.memory_space<vmem>>) attributes {dimension_semantics = [#tpu.dimension_semantics<parallel>], iteration_bounds = array<i64: 1>, scalar_prefetch = 0 : i64, scratch_operands = 0 : i64, tpu.core_type = #tpu.core_type<tc>, window_params = [{pipeline_mode = #tpu.pipeline_mode<synchronous>, transform_indices = @transform_0, window_bounds = array<i64: 2, 112, 128>}, {transform_indices = @transform_1, window_bounds = array<i64: 9, 128, 128>}, {transform_indices = @transform_2, window_bounds = array<i64: 1, 128>}, {pipeline_mode = #tpu.pipeline_mode<synchronous>, transform_indices = @transform_3, window_bounds = array<i64: 128, 128>}, {pipeline_mode = #tpu.pipeline_mode<synchronous>, transform_indices = @transform_4, window_bounds = array<i64: 1, 128>}, {transform_indices = @transform_5, window_bounds = array<i64: 2, 80, 128>}, {pipeline_mode = #tpu.pipeline_mode<synchronous>, transform_indices = @transform_6, window_bounds = array<i64: 2, 80, 128>}]} {
    %c0 = arith.constant 0 : index
    %c0_0 = arith.constant 0 : index
    %0 = vector.load %arg3[%c0, %c0_0] : memref<1x128xf32, #tpu.memory_space<vmem>>, vector<1x128xf32>
    %c0_1 = arith.constant 0 : index
    %c0_2 = arith.constant 0 : index
    %1 = vector.load %arg5[%c0_1, %c0_2] : memref<1x128xf32, #tpu.memory_space<vmem>>, vector<1x128xf32>
    %2 = vector.shape_cast %0 : vector<1x128xf32> to vector<1x128xf32>
    %3 = vector.broadcast %2 : vector<1x128xf32> to vector<80x128xf32>
    %c0_3 = arith.constant 0 : index
    %c5 = arith.constant 5 : index
    %c0_4 = arith.constant 0 : index
    %4 = vector.load %arg1[%c0_3, %c5, %c0_4] : memref<2x112x128xbf16, #tpu.memory_space<vmem>>, vector<1x80x128xbf16>
    %5 = vector.shape_cast %4 : vector<1x80x128xbf16> to vector<80x128xbf16>
    %c0_5 = arith.constant 0 : index
    %c0_6 = arith.constant 0 : index
    %c0_7 = arith.constant 0 : index
    %6 = vector.load %arg2[%c0_5, %c0_6, %c0_7] : memref<9x128x128xbf16, #tpu.memory_space<vmem>>, vector<1x128x128xbf16>
    %7 = vector.shape_cast %6 : vector<1x128x128xbf16> to vector<128x128xbf16>
    %cst = arith.constant dense<0.000000e+00> : vector<80x128xf32>
    %8 = tpu.matmul %5, %7, %cst {dimension_numbers = #tpu.dot_dimension_numbers<[1], [0], [0], [1], [0, 0, 1, 1], [], []>} : vector<80x128xbf16>, vector<128x128xbf16>, vector<80x128xf32> -> vector<80x128xf32>
    %9 = arith.addf %3, %8 : vector<80x128xf32>
    %c0_8 = arith.constant 0 : index
    %c6 = arith.constant 6 : index
    %c0_9 = arith.constant 0 : index
    %10 = vector.load %arg1[%c0_8, %c6, %c0_9] : memref<2x112x128xbf16, #tpu.memory_space<vmem>>, vector<1x80x128xbf16>
    %11 = vector.shape_cast %10 : vector<1x80x128xbf16> to vector<80x128xbf16>
    %c1 = arith.constant 1 : index
    %c0_10 = arith.constant 0 : index
    %c0_11 = arith.constant 0 : index
    %12 = vector.load %arg2[%c1, %c0_10, %c0_11] : memref<9x128x128xbf16, #tpu.memory_space<vmem>>, vector<1x128x128xbf16>
    %13 = vector.shape_cast %12 : vector<1x128x128xbf16> to vector<128x128xbf16>
    %cst_12 = arith.constant dense<0.000000e+00> : vector<80x128xf32>
    %14 = tpu.matmul %11, %13, %cst_12 {dimension_numbers = #tpu.dot_dimension_numbers<[1], [0], [0], [1], [0, 0, 1, 1], [], []>} : vector<80x128xbf16>, vector<128x128xbf16>, vector<80x128xf32> -> vector<80x128xf32>
    %15 = arith.addf %9, %14 : vector<80x128xf32>
    %c0_13 = arith.constant 0 : index
    %c7 = arith.constant 7 : index
    %c0_14 = arith.constant 0 : index
    %16 = vector.load %arg1[%c0_13, %c7, %c0_14] : memref<2x112x128xbf16, #tpu.memory_space<vmem>>, vector<1x80x128xbf16>
    %17 = vector.shape_cast %16 : vector<1x80x128xbf16> to vector<80x128xbf16>
    %c2 = arith.constant 2 : index
    %c0_15 = arith.constant 0 : index
    %c0_16 = arith.constant 0 : index
    %18 = vector.load %arg2[%c2, %c0_15, %c0_16] : memref<9x128x128xbf16, #tpu.memory_space<vmem>>, vector<1x128x128xbf16>
    %19 = vector.shape_cast %18 : vector<1x128x128xbf16> to vector<128x128xbf16>
    %cst_17 = arith.constant dense<0.000000e+00> : vector<80x128xf32>
    %20 = tpu.matmul %17, %19, %cst_17 {dimension_numbers = #tpu.dot_dimension_numbers<[1], [0], [0], [1], [0, 0, 1, 1], [], []>} : vector<80x128xbf16>, vector<128x128xbf16>, vector<80x128xf32> -> vector<80x128xf32>
    %21 = arith.addf %15, %20 : vector<80x128xf32>
    %c0_18 = arith.constant 0 : index
    %c15 = arith.constant 15 : index
    %c0_19 = arith.constant 0 : index
    %22 = vector.load %arg1[%c0_18, %c15, %c0_19] : memref<2x112x128xbf16, #tpu.memory_space<vmem>>, vector<1x80x128xbf16>
    %23 = vector.shape_cast %22 : vector<1x80x128xbf16> to vector<80x128xbf16>
    %c3 = arith.constant 3 : index
    %c0_20 = arith.constant 0 : index
    %c0_21 = arith.constant 0 : index
    %24 = vector.load %arg2[%c3, %c0_20, %c0_21] : memref<9x128x128xbf16, #tpu.memory_space<vmem>>, vector<1x128x128xbf16>
    %25 = vector.shape_cast %24 : vector<1x128x128xbf16> to vector<128x128xbf16>
    %cst_22 = arith.constant dense<0.000000e+00> : vector<80x128xf32>
    %26 = tpu.matmul %23, %25, %cst_22 {dimension_numbers = #tpu.dot_dimension_numbers<[1], [0], [0], [1], [0, 0, 1, 1], [], []>} : vector<80x128xbf16>, vector<128x128xbf16>, vector<80x128xf32> -> vector<80x128xf32>
    %27 = arith.addf %21, %26 : vector<80x128xf32>
    %c0_23 = arith.constant 0 : index
    %c16 = arith.constant 16 : index
    %c0_24 = arith.constant 0 : index
    %28 = vector.load %arg1[%c0_23, %c16, %c0_24] : memref<2x112x128xbf16, #tpu.memory_space<vmem>>, vector<1x80x128xbf16>
    %29 = vector.shape_cast %28 : vector<1x80x128xbf16> to vector<80x128xbf16>
    %c4 = arith.constant 4 : index
    %c0_25 = arith.constant 0 : index
    %c0_26 = arith.constant 0 : index
    %30 = vector.load %arg2[%c4, %c0_25, %c0_26] : memref<9x128x128xbf16, #tpu.memory_space<vmem>>, vector<1x128x128xbf16>
    %31 = vector.shape_cast %30 : vector<1x128x128xbf16> to vector<128x128xbf16>
    %cst_27 = arith.constant dense<0.000000e+00> : vector<80x128xf32>
    %32 = tpu.matmul %29, %31, %cst_27 {dimension_numbers = #tpu.dot_dimension_numbers<[1], [0], [0], [1], [0, 0, 1, 1], [], []>} : vector<80x128xbf16>, vector<128x128xbf16>, vector<80x128xf32> -> vector<80x128xf32>
    %33 = arith.addf %27, %32 : vector<80x128xf32>
    %c0_28 = arith.constant 0 : index
    %c17 = arith.constant 17 : index
    %c0_29 = arith.constant 0 : index
    %34 = vector.load %arg1[%c0_28, %c17, %c0_29] : memref<2x112x128xbf16, #tpu.memory_space<vmem>>, vector<1x80x128xbf16>
    %35 = vector.shape_cast %34 : vector<1x80x128xbf16> to vector<80x128xbf16>
    %c5_30 = arith.constant 5 : index
    %c0_31 = arith.constant 0 : index
    %c0_32 = arith.constant 0 : index
    %36 = vector.load %arg2[%c5_30, %c0_31, %c0_32] : memref<9x128x128xbf16, #tpu.memory_space<vmem>>, vector<1x128x128xbf16>
    %37 = vector.shape_cast %36 : vector<1x128x128xbf16> to vector<128x128xbf16>
    %cst_33 = arith.constant dense<0.000000e+00> : vector<80x128xf32>
    %38 = tpu.matmul %35, %37, %cst_33 {dimension_numbers = #tpu.dot_dimension_numbers<[1], [0], [0], [1], [0, 0, 1, 1], [], []>} : vector<80x128xbf16>, vector<128x128xbf16>, vector<80x128xf32> -> vector<80x128xf32>
    %39 = arith.addf %33, %38 : vector<80x128xf32>
    %c0_34 = arith.constant 0 : index
    %c25 = arith.constant 25 : index
    %c0_35 = arith.constant 0 : index
    %40 = vector.load %arg1[%c0_34, %c25, %c0_35] : memref<2x112x128xbf16, #tpu.memory_space<vmem>>, vector<1x80x128xbf16>
    %41 = vector.shape_cast %40 : vector<1x80x128xbf16> to vector<80x128xbf16>
    %c6_36 = arith.constant 6 : index
    %c0_37 = arith.constant 0 : index
    %c0_38 = arith.constant 0 : index
    %42 = vector.load %arg2[%c6_36, %c0_37, %c0_38] : memref<9x128x128xbf16, #tpu.memory_space<vmem>>, vector<1x128x128xbf16>
    %43 = vector.shape_cast %42 : vector<1x128x128xbf16> to vector<128x128xbf16>
    %cst_39 = arith.constant dense<0.000000e+00> : vector<80x128xf32>
    %44 = tpu.matmul %41, %43, %cst_39 {dimension_numbers = #tpu.dot_dimension_numbers<[1], [0], [0], [1], [0, 0, 1, 1], [], []>} : vector<80x128xbf16>, vector<128x128xbf16>, vector<80x128xf32> -> vector<80x128xf32>
    %45 = arith.addf %39, %44 : vector<80x128xf32>
    %c0_40 = arith.constant 0 : index
    %c26 = arith.constant 26 : index
    %c0_41 = arith.constant 0 : index
    %46 = vector.load %arg1[%c0_40, %c26, %c0_41] : memref<2x112x128xbf16, #tpu.memory_space<vmem>>, vector<1x80x128xbf16>
    %47 = vector.shape_cast %46 : vector<1x80x128xbf16> to vector<80x128xbf16>
    %c7_42 = arith.constant 7 : index
    %c0_43 = arith.constant 0 : index
    %c0_44 = arith.constant 0 : index
    %48 = vector.load %arg2[%c7_42, %c0_43, %c0_44] : memref<9x128x128xbf16, #tpu.memory_space<vmem>>, vector<1x128x128xbf16>
    %49 = vector.shape_cast %48 : vector<1x128x128xbf16> to vector<128x128xbf16>
    %cst_45 = arith.constant dense<0.000000e+00> : vector<80x128xf32>
    %50 = tpu.matmul %47, %49, %cst_45 {dimension_numbers = #tpu.dot_dimension_numbers<[1], [0], [0], [1], [0, 0, 1, 1], [], []>} : vector<80x128xbf16>, vector<128x128xbf16>, vector<80x128xf32> -> vector<80x128xf32>
    %51 = arith.addf %45, %50 : vector<80x128xf32>
    %c0_46 = arith.constant 0 : index
    %c27 = arith.constant 27 : index
    %c0_47 = arith.constant 0 : index
    %52 = vector.load %arg1[%c0_46, %c27, %c0_47] : memref<2x112x128xbf16, #tpu.memory_space<vmem>>, vector<1x80x128xbf16>
    %53 = vector.shape_cast %52 : vector<1x80x128xbf16> to vector<80x128xbf16>
    %c8 = arith.constant 8 : index
    %c0_48 = arith.constant 0 : index
    %c0_49 = arith.constant 0 : index
    %54 = vector.load %arg2[%c8, %c0_48, %c0_49] : memref<9x128x128xbf16, #tpu.memory_space<vmem>>, vector<1x128x128xbf16>
    %55 = vector.shape_cast %54 : vector<1x128x128xbf16> to vector<128x128xbf16>
    %cst_50 = arith.constant dense<0.000000e+00> : vector<80x128xf32>
    %56 = tpu.matmul %53, %55, %cst_50 {dimension_numbers = #tpu.dot_dimension_numbers<[1], [0], [0], [1], [0, 0, 1, 1], [], []>} : vector<80x128xbf16>, vector<128x128xbf16>, vector<80x128xf32> -> vector<80x128xf32>
    %57 = arith.addf %51, %56 : vector<80x128xf32>
    %58 = arith.extf %29 : vector<80x128xbf16> to vector<80x128xf32>
    %59 = arith.addf %57, %58 : vector<80x128xf32>
    %cst_51 = arith.constant 0.000000e+00 : f32
    %60 = vector.broadcast %cst_51 : f32 to vector<80x128xf32>
    %61 = arith.maximumf %59, %60 : vector<80x128xf32>
    %62 = arith.truncf %61 : vector<80x128xf32> to vector<80x128xbf16>
    %c0_52 = arith.constant 0 : index
    %c0_53 = arith.constant 0 : index
    %c0_54 = arith.constant 0 : index
    %63 = vector.load %arg6[%c0_52, %c0_53, %c0_54] : memref<2x80x128xbf16, #tpu.memory_space<vmem>>, vector<1x80x128xbf16>
    %64 = vector.shape_cast %63 : vector<1x80x128xbf16> to vector<80x128xbf16>
    %65 = vector.shape_cast %62 : vector<80x128xbf16> to vector<1x80x128xbf16>
    tpu.vector_store %arg6[%c0_52, %c0_53, %c0_54], %65 {strides = array<i32>} : memref<2x80x128xbf16, #tpu.memory_space<vmem>>, vector<1x80x128xbf16>,
    %66 = arith.truncf %61 : vector<80x128xf32> to vector<80x128xbf16>
    %c0_55 = arith.constant 0 : index
    %c0_56 = arith.constant 0 : index
    %67 = vector.load %arg4[%c0_55, %c0_56] : memref<128x128xbf16, #tpu.memory_space<vmem>>, vector<128x128xbf16>
    %cst_57 = arith.constant dense<0.000000e+00> : vector<80x128xf32>
    %68 = tpu.matmul %66, %67, %cst_57 {dimension_numbers = #tpu.dot_dimension_numbers<[1], [0], [0], [1], [0, 0, 1, 1], [], []>} : vector<80x128xbf16>, vector<128x128xbf16>, vector<80x128xf32> -> vector<80x128xf32>
    %69 = vector.broadcast %1 : vector<1x128xf32> to vector<80x128xf32>
    %70 = arith.addf %68, %69 : vector<80x128xf32>
    %c0_58 = arith.constant 0 : index
    %c0_59 = arith.constant 0 : index
    %c0_60 = arith.constant 0 : index
    %71 = vector.load %arg7[%c0_58, %c0_59, %c0_60] : memref<2x80x128xf32, #tpu.memory_space<vmem>>, vector<1x80x128xf32>
    %72 = vector.shape_cast %71 : vector<1x80x128xf32> to vector<80x128xf32>
    %73 = vector.shape_cast %70 : vector<80x128xf32> to vector<1x80x128xf32>
    tpu.vector_store %arg7[%c0_58, %c0_59, %c0_60], %73 {strides = array<i32>} : memref<2x80x128xf32, #tpu.memory_space<vmem>>, vector<1x80x128xf32>,
    %74 = vector.shape_cast %0 : vector<1x128xf32> to vector<1x128xf32>
    %75 = vector.broadcast %74 : vector<1x128xf32> to vector<80x128xf32>
    %c1_61 = arith.constant 1 : index
    %c5_62 = arith.constant 5 : index
    %c0_63 = arith.constant 0 : index
    %76 = vector.load %arg1[%c1_61, %c5_62, %c0_63] : memref<2x112x128xbf16, #tpu.memory_space<vmem>>, vector<1x80x128xbf16>
    %77 = vector.shape_cast %76 : vector<1x80x128xbf16> to vector<80x128xbf16>
    %c0_64 = arith.constant 0 : index
    %c0_65 = arith.constant 0 : index
    %c0_66 = arith.constant 0 : index
    %78 = vector.load %arg2[%c0_64, %c0_65, %c0_66] : memref<9x128x128xbf16, #tpu.memory_space<vmem>>, vector<1x128x128xbf16>
    %79 = vector.shape_cast %78 : vector<1x128x128xbf16> to vector<128x128xbf16>
    %cst_67 = arith.constant dense<0.000000e+00> : vector<80x128xf32>
    %80 = tpu.matmul %77, %79, %cst_67 {dimension_numbers = #tpu.dot_dimension_numbers<[1], [0], [0], [1], [0, 0, 1, 1], [], []>} : vector<80x128xbf16>, vector<128x128xbf16>, vector<80x128xf32> -> vector<80x128xf32>
    %81 = arith.addf %75, %80 : vector<80x128xf32>
    %c1_68 = arith.constant 1 : index
    %c6_69 = arith.constant 6 : index
    %c0_70 = arith.constant 0 : index
    %82 = vector.load %arg1[%c1_68, %c6_69, %c0_70] : memref<2x112x128xbf16, #tpu.memory_space<vmem>>, vector<1x80x128xbf16>
    %83 = vector.shape_cast %82 : vector<1x80x128xbf16> to vector<80x128xbf16>
    %c1_71 = arith.constant 1 : index
    %c0_72 = arith.constant 0 : index
    %c0_73 = arith.constant 0 : index
    %84 = vector.load %arg2[%c1_71, %c0_72, %c0_73] : memref<9x128x128xbf16, #tpu.memory_space<vmem>>, vector<1x128x128xbf16>
    %85 = vector.shape_cast %84 : vector<1x128x128xbf16> to vector<128x128xbf16>
    %cst_74 = arith.constant dense<0.000000e+00> : vector<80x128xf32>
    %86 = tpu.matmul %83, %85, %cst_74 {dimension_numbers = #tpu.dot_dimension_numbers<[1], [0], [0], [1], [0, 0, 1, 1], [], []>} : vector<80x128xbf16>, vector<128x128xbf16>, vector<80x128xf32> -> vector<80x128xf32>
    %87 = arith.addf %81, %86 : vector<80x128xf32>
    %c1_75 = arith.constant 1 : index
    %c7_76 = arith.constant 7 : index
    %c0_77 = arith.constant 0 : index
    %88 = vector.load %arg1[%c1_75, %c7_76, %c0_77] : memref<2x112x128xbf16, #tpu.memory_space<vmem>>, vector<1x80x128xbf16>
    %89 = vector.shape_cast %88 : vector<1x80x128xbf16> to vector<80x128xbf16>
    %c2_78 = arith.constant 2 : index
    %c0_79 = arith.constant 0 : index
    %c0_80 = arith.constant 0 : index
    %90 = vector.load %arg2[%c2_78, %c0_79, %c0_80] : memref<9x128x128xbf16, #tpu.memory_space<vmem>>, vector<1x128x128xbf16>
    %91 = vector.shape_cast %90 : vector<1x128x128xbf16> to vector<128x128xbf16>
    %cst_81 = arith.constant dense<0.000000e+00> : vector<80x128xf32>
    %92 = tpu.matmul %89, %91, %cst_81 {dimension_numbers = #tpu.dot_dimension_numbers<[1], [0], [0], [1], [0, 0, 1, 1], [], []>} : vector<80x128xbf16>, vector<128x128xbf16>, vector<80x128xf32> -> vector<80x128xf32>
    %93 = arith.addf %87, %92 : vector<80x128xf32>
    %c1_82 = arith.constant 1 : index
    %c15_83 = arith.constant 15 : index
    %c0_84 = arith.constant 0 : index
    %94 = vector.load %arg1[%c1_82, %c15_83, %c0_84] : memref<2x112x128xbf16, #tpu.memory_space<vmem>>, vector<1x80x128xbf16>
    %95 = vector.shape_cast %94 : vector<1x80x128xbf16> to vector<80x128xbf16>
    %c3_85 = arith.constant 3 : index
    %c0_86 = arith.constant 0 : index
    %c0_87 = arith.constant 0 : index
    %96 = vector.load %arg2[%c3_85, %c0_86, %c0_87] : memref<9x128x128xbf16, #tpu.memory_space<vmem>>, vector<1x128x128xbf16>
    %97 = vector.shape_cast %96 : vector<1x128x128xbf16> to vector<128x128xbf16>
    %cst_88 = arith.constant dense<0.000000e+00> : vector<80x128xf32>
    %98 = tpu.matmul %95, %97, %cst_88 {dimension_numbers = #tpu.dot_dimension_numbers<[1], [0], [0], [1], [0, 0, 1, 1], [], []>} : vector<80x128xbf16>, vector<128x128xbf16>, vector<80x128xf32> -> vector<80x128xf32>
    %99 = arith.addf %93, %98 : vector<80x128xf32>
    %c1_89 = arith.constant 1 : index
    %c16_90 = arith.constant 16 : index
    %c0_91 = arith.constant 0 : index
    %100 = vector.load %arg1[%c1_89, %c16_90, %c0_91] : memref<2x112x128xbf16, #tpu.memory_space<vmem>>, vector<1x80x128xbf16>
    %101 = vector.shape_cast %100 : vector<1x80x128xbf16> to vector<80x128xbf16>
    %c4_92 = arith.constant 4 : index
    %c0_93 = arith.constant 0 : index
    %c0_94 = arith.constant 0 : index
    %102 = vector.load %arg2[%c4_92, %c0_93, %c0_94] : memref<9x128x128xbf16, #tpu.memory_space<vmem>>, vector<1x128x128xbf16>
    %103 = vector.shape_cast %102 : vector<1x128x128xbf16> to vector<128x128xbf16>
    %cst_95 = arith.constant dense<0.000000e+00> : vector<80x128xf32>
    %104 = tpu.matmul %101, %103, %cst_95 {dimension_numbers = #tpu.dot_dimension_numbers<[1], [0], [0], [1], [0, 0, 1, 1], [], []>} : vector<80x128xbf16>, vector<128x128xbf16>, vector<80x128xf32> -> vector<80x128xf32>
    %105 = arith.addf %99, %104 : vector<80x128xf32>
    %c1_96 = arith.constant 1 : index
    %c17_97 = arith.constant 17 : index
    %c0_98 = arith.constant 0 : index
    %106 = vector.load %arg1[%c1_96, %c17_97, %c0_98] : memref<2x112x128xbf16, #tpu.memory_space<vmem>>, vector<1x80x128xbf16>
    %107 = vector.shape_cast %106 : vector<1x80x128xbf16> to vector<80x128xbf16>
    %c5_99 = arith.constant 5 : index
    %c0_100 = arith.constant 0 : index
    %c0_101 = arith.constant 0 : index
    %108 = vector.load %arg2[%c5_99, %c0_100, %c0_101] : memref<9x128x128xbf16, #tpu.memory_space<vmem>>, vector<1x128x128xbf16>
    %109 = vector.shape_cast %108 : vector<1x128x128xbf16> to vector<128x128xbf16>
    %cst_102 = arith.constant dense<0.000000e+00> : vector<80x128xf32>
    %110 = tpu.matmul %107, %109, %cst_102 {dimension_numbers = #tpu.dot_dimension_numbers<[1], [0], [0], [1], [0, 0, 1, 1], [], []>} : vector<80x128xbf16>, vector<128x128xbf16>, vector<80x128xf32> -> vector<80x128xf32>
    %111 = arith.addf %105, %110 : vector<80x128xf32>
    %c1_103 = arith.constant 1 : index
    %c25_104 = arith.constant 25 : index
    %c0_105 = arith.constant 0 : index
    %112 = vector.load %arg1[%c1_103, %c25_104, %c0_105] : memref<2x112x128xbf16, #tpu.memory_space<vmem>>, vector<1x80x128xbf16>
    %113 = vector.shape_cast %112 : vector<1x80x128xbf16> to vector<80x128xbf16>
    %c6_106 = arith.constant 6 : index
    %c0_107 = arith.constant 0 : index
    %c0_108 = arith.constant 0 : index
    %114 = vector.load %arg2[%c6_106, %c0_107, %c0_108] : memref<9x128x128xbf16, #tpu.memory_space<vmem>>, vector<1x128x128xbf16>
    %115 = vector.shape_cast %114 : vector<1x128x128xbf16> to vector<128x128xbf16>
    %cst_109 = arith.constant dense<0.000000e+00> : vector<80x128xf32>
    %116 = tpu.matmul %113, %115, %cst_109 {dimension_numbers = #tpu.dot_dimension_numbers<[1], [0], [0], [1], [0, 0, 1, 1], [], []>} : vector<80x128xbf16>, vector<128x128xbf16>, vector<80x128xf32> -> vector<80x128xf32>
    %117 = arith.addf %111, %116 : vector<80x128xf32>
    %c1_110 = arith.constant 1 : index
    %c26_111 = arith.constant 26 : index
    %c0_112 = arith.constant 0 : index
    %118 = vector.load %arg1[%c1_110, %c26_111, %c0_112] : memref<2x112x128xbf16, #tpu.memory_space<vmem>>, vector<1x80x128xbf16>
    %119 = vector.shape_cast %118 : vector<1x80x128xbf16> to vector<80x128xbf16>
    %c7_113 = arith.constant 7 : index
    %c0_114 = arith.constant 0 : index
    %c0_115 = arith.constant 0 : index
    %120 = vector.load %arg2[%c7_113, %c0_114, %c0_115] : memref<9x128x128xbf16, #tpu.memory_space<vmem>>, vector<1x128x128xbf16>
    %121 = vector.shape_cast %120 : vector<1x128x128xbf16> to vector<128x128xbf16>
    %cst_116 = arith.constant dense<0.000000e+00> : vector<80x128xf32>
    %122 = tpu.matmul %119, %121, %cst_116 {dimension_numbers = #tpu.dot_dimension_numbers<[1], [0], [0], [1], [0, 0, 1, 1], [], []>} : vector<80x128xbf16>, vector<128x128xbf16>, vector<80x128xf32> -> vector<80x128xf32>
    %123 = arith.addf %117, %122 : vector<80x128xf32>
    %c1_117 = arith.constant 1 : index
    %c27_118 = arith.constant 27 : index
    %c0_119 = arith.constant 0 : index
    %124 = vector.load %arg1[%c1_117, %c27_118, %c0_119] : memref<2x112x128xbf16, #tpu.memory_space<vmem>>, vector<1x80x128xbf16>
    %125 = vector.shape_cast %124 : vector<1x80x128xbf16> to vector<80x128xbf16>
    %c8_120 = arith.constant 8 : index
    %c0_121 = arith.constant 0 : index
    %c0_122 = arith.constant 0 : index
    %126 = vector.load %arg2[%c8_120, %c0_121, %c0_122] : memref<9x128x128xbf16, #tpu.memory_space<vmem>>, vector<1x128x128xbf16>
    %127 = vector.shape_cast %126 : vector<1x128x128xbf16> to vector<128x128xbf16>
    %cst_123 = arith.constant dense<0.000000e+00> : vector<80x128xf32>
    %128 = tpu.matmul %125, %127, %cst_123 {dimension_numbers = #tpu.dot_dimension_numbers<[1], [0], [0], [1], [0, 0, 1, 1], [], []>} : vector<80x128xbf16>, vector<128x128xbf16>, vector<80x128xf32> -> vector<80x128xf32>
    %129 = arith.addf %123, %128 : vector<80x128xf32>
    %130 = arith.extf %101 : vector<80x128xbf16> to vector<80x128xf32>
    %131 = arith.addf %129, %130 : vector<80x128xf32>
    %cst_124 = arith.constant 0.000000e+00 : f32
    %132 = vector.broadcast %cst_124 : f32 to vector<80x128xf32>
    %133 = arith.maximumf %131, %132 : vector<80x128xf32>
    %134 = arith.truncf %133 : vector<80x128xf32> to vector<80x128xbf16>
    %c1_125 = arith.constant 1 : index
    %c0_126 = arith.constant 0 : index
    %c0_127 = arith.constant 0 : index
    %135 = vector.load %arg6[%c1_125, %c0_126, %c0_127] : memref<2x80x128xbf16, #tpu.memory_space<vmem>>, vector<1x80x128xbf16>
    %136 = vector.shape_cast %135 : vector<1x80x128xbf16> to vector<80x128xbf16>
    %137 = vector.shape_cast %134 : vector<80x128xbf16> to vector<1x80x128xbf16>
    tpu.vector_store %arg6[%c1_125, %c0_126, %c0_127], %137 {strides = array<i32>} : memref<2x80x128xbf16, #tpu.memory_space<vmem>>, vector<1x80x128xbf16>,
    %138 = arith.truncf %133 : vector<80x128xf32> to vector<80x128xbf16>
    %c0_128 = arith.constant 0 : index
    %c0_129 = arith.constant 0 : index
    %139 = vector.load %arg4[%c0_128, %c0_129] : memref<128x128xbf16, #tpu.memory_space<vmem>>, vector<128x128xbf16>
    %cst_130 = arith.constant dense<0.000000e+00> : vector<80x128xf32>
    %140 = tpu.matmul %138, %139, %cst_130 {dimension_numbers = #tpu.dot_dimension_numbers<[1], [0], [0], [1], [0, 0, 1, 1], [], []>} : vector<80x128xbf16>, vector<128x128xbf16>, vector<80x128xf32> -> vector<80x128xf32>
    %141 = vector.broadcast %1 : vector<1x128xf32> to vector<80x128xf32>
    %142 = arith.addf %140, %141 : vector<80x128xf32>
    %c1_131 = arith.constant 1 : index
    %c0_132 = arith.constant 0 : index
    %c0_133 = arith.constant 0 : index
    %143 = vector.load %arg7[%c1_131, %c0_132, %c0_133] : memref<2x80x128xf32, #tpu.memory_space<vmem>>, vector<1x80x128xf32>
    %144 = vector.shape_cast %143 : vector<1x80x128xf32> to vector<80x128xf32>
    %145 = vector.shape_cast %142 : vector<80x128xf32> to vector<1x80x128xf32>
    tpu.vector_store %arg7[%c1_131, %c0_132, %c0_133], %145 {strides = array<i32>} : memref<2x80x128xf32, #tpu.memory_space<vmem>>, vector<1x80x128xf32>,
    return
  }
  func.func @transform_0(%arg0: i32) -> (i32, i32, i32) {
    %c0_i32 = arith.constant 0 : i32
    %c0_i32_0 = arith.constant 0 : i32
    %c0_i32_1 = arith.constant 0 : i32
    %c0_i32_2 = arith.constant 0 : i32
    return %c0_i32, %c0_i32_0, %c0_i32_1 : i32, i32, i32
  }
  func.func @transform_1(%arg0: i32) -> (i32, i32, i32) {
    %c0_i32 = arith.constant 0 : i32
    %c0_i32_0 = arith.constant 0 : i32
    %c0_i32_1 = arith.constant 0 : i32
    return %c0_i32, %c0_i32_0, %arg0 : i32, i32, i32
  }
  func.func @transform_2(%arg0: i32) -> (i32, i32) {
    %c0_i32 = arith.constant 0 : i32
    %c0_i32_0 = arith.constant 0 : i32
    return %c0_i32, %arg0 : i32, i32
  }
  func.func @transform_3(%arg0: i32) -> (i32, i32) {
    %c0_i32 = arith.constant 0 : i32
    %c0_i32_0 = arith.constant 0 : i32
    %c0_i32_1 = arith.constant 0 : i32
    return %c0_i32, %c0_i32_0 : i32, i32
  }
  func.func @transform_4(%arg0: i32) -> (i32, i32) {
    %c0_i32 = arith.constant 0 : i32
    %c0_i32_0 = arith.constant 0 : i32
    %c0_i32_1 = arith.constant 0 : i32
    return %c0_i32, %c0_i32_0 : i32, i32
  }
  func.func @transform_5(%arg0: i32) -> (i32, i32, i32) {
    %c0_i32 = arith.constant 0 : i32
    %c0_i32_0 = arith.constant 0 : i32
    %c0_i32_1 = arith.constant 0 : i32
    return %c0_i32, %c0_i32_0, %arg0 : i32, i32, i32
  }
  func.func @transform_6(%arg0: i32) -> (i32, i32, i32) {
    %c0_i32 = arith.constant 0 : i32
    %c0_i32_0 = arith.constant 0 : i32
    %c0_i32_1 = arith.constant 0 : i32
    %c0_i32_2 = arith.constant 0 : i32
    return %c0_i32, %c0_i32_0, %c0_i32_1 : i32, i32, i32
  }
}

</mosaic_0001>

<bundles_post_ra>
// kernel: conv_block.2
= control target key start
LH: loop header
LB: loop body
LE: loop exit
PB: predicated region body
PF: predicated region fallthrough
CT: control target
= control target key end

     0   :  { %v5849_v0 = vmov 0.0   ;;  %vm5850_vm0 = vmmov 0   ;;  %vm272_vm1 = vsmask.f32 7424  ;;  %vm474_vm2 = vcmask 1046528   ;;  %s7309_s1 = inlined_call_operand.vmem [shape: bf16[9,128,128], index: 1, kind: input, shape index: {}]   ;;  %s7310_s0 = inlined_call_operand.vmem [shape: bf16[2,104,128], index: 0, kind: input, shape index: {}]   ;;  %s7311_s4 = inlined_call_operand.vmem [shape: bf16[2,112,128], index: 4, kind: output, shape index: {}]   ;;  %s7312_s3 = inlined_call_operand.vmem [shape: f32[80,1], index: 3, kind: input, shape index: {}]   ;;  %s7313_s2 = inlined_call_operand.vmem [shape: f32[1,128], index: 2, kind: input, shape index: {}]  }
   0x1   :  { %4656 = vmatprep.subr.bf16.mxu0 %v5849_v0  ;;  %4980 = vmatprep.subr.bf16.mxu1 %v5849_v0  ;;  %v5649_v1 = vld [vmem:[%s7309_s1] sm:$0xff]   ;;  %v5651_v3 = vld [vmem:[%s7309_s1 + $0x8] sm:$0xff]   ;;  %v5653_v5 = vld [vmem:[%s7309_s1 + $0x10] sm:$0xff]   ;;  %vm1057_vm3 = vcmask 1045504   ;;  %vm846_vm4 = vsmask.f32 6400 }
   0x2   :  { %v5650_v2 = vld [vmem:[%s7309_s1] sm:$0xff]   ;;  %4672 = vmatprep.mubr.msk.bf16.mxu0 %vm5850_vm0, %v5849_v0  ;;  %4996 = vmatprep.mubr.msk.bf16.mxu1 %vm5850_vm0, %v5849_v0  ;;  %v5652_v4 = vld [vmem:[%s7309_s1 + $0x8] sm:$0xff]   ;;  %v5654_v6 = vld [vmem:[%s7309_s1 + $0x10] sm:$0xff]   ;;  %vm1640_vm5 = vcmask 1044480   ;;  %vm1429_vm6 = vsmask.f32 5376 }
   0x3   :  { %4657 = vmatpush3.bf16.msra.mxu0 %v5649_v1  ;;  %4981 = vmatpush3.bf16.msra.mxu1 %v5650_v2  ;;  %v5655_v7 = vld [vmem:[%s7309_s1 + $0x18] sm:$0xff]   ;;  %v5657_v9 = vld [vmem:[%s7309_s1 + $0x20] sm:$0xff]   ;;  %v5659_v11 = vld [vmem:[%s7309_s1 + $0x28] sm:$0xff]  }
   0x4   :  { %4658 = vmatprep.subr.bf16.mxu0 %v5849_v0  ;;  %4982 = vmatprep.subr.bf16.mxu1 %v5849_v0  ;;  %v5656_v8 = vld [vmem:[%s7309_s1 + $0x18] sm:$0xff]   ;;  %v5658_v10 = vld [vmem:[%s7309_s1 + $0x20] sm:$0xff]   ;;  %v5660_v12 = vld [vmem:[%s7309_s1 + $0x28] sm:$0xff]  }
   0x5   :  { %v5661_v13 = vld [vmem:[%s7309_s1 + $0x30] sm:$0xff]   ;;  %v5663_v15 = vld [vmem:[%s7309_s1 + $0x38] sm:$0xff]   ;;  %v5665_v17 = vld [vmem:[%s7310_s0] sm:$0xff]  }
   0x6   :  { %v5662_v14 = vld [vmem:[%s7309_s1 + $0x30] sm:$0xff]   ;;  %v5664_v16 = vld [vmem:[%s7309_s1 + $0x38] sm:$0xff]   ;;  %v5667_v19 = vld [vmem:[%s7309_s1 + $0x40] sm:$0xff]  }
   0x7   :  { %4659 = vmatpush3.bf16.msra.mxu0 %v5651_v3  ;;  %4983 = vmatpush3.bf16.msra.mxu1 %v5652_v4  ;;  %v5666_v18 = vld [vmem:[%s7310_s0 + $0x34] sm:$0xff]   ;;  %v5668_v20 = vld [vmem:[%s7309_s1 + $0x40] sm:$0xff]   ;;  %v5669_v21 = vld [vmem:[%s7309_s1 + $0x48] sm:$0xff]  }
   0x8   :  { %4660 = vmatprep.subr.bf16.mxu0 %v5849_v0  ;;  %4984 = vmatprep.subr.bf16.mxu1 %v5849_v0  ;;  %v5670_v22 = vld [vmem:[%s7309_s1 + $0x48] sm:$0xff]   ;;  %v5672_v24 = vld [vmem:[%s7310_s0 + $0x3c] sm:$0xff]   ;;  %v5673_v25 = vld [vmem:[%s7309_s1 + $0x50] sm:$0xff]  }
   0x9   :  { %v5671_v23 = vld [vmem:[%s7310_s0 + $0x8] sm:$0xff]   ;;  %v5674_v26 = vld [vmem:[%s7309_s1 + $0x50] sm:$0xff]   ;;  %v5676_v27 = vld [vmem:[%s7309_s1 + $0x58] sm:$0xff]  }
   0xa   :  { %v5678_v28 = vld [vmem:[%s7309_s1 + $0x58] sm:$0xff]   ;;  %v5675_v29 = vld [vmem:[%s7310_s0 + $0x10] sm:$0xff]   ;;  %v5677_v30 = vld [vmem:[%s7310_s0 + $0x44] sm:$0xff]  }
   0xb   :  { %4661 = vmatpush3.bf16.msra.mxu0 %v5653_v5  ;;  %4985 = vmatpush3.bf16.msra.mxu1 %v5654_v6  ;;  %v5679_v31 = vld [vmem:[%s7309_s1 + $0x60] sm:$0xff]   ;;  %v5683_v33 = vld [vmem:[%s7309_s1 + $0x68] sm:$0xff]   ;;  %v4069_v37 = vld [vmem:[%s7310_s0 + $0x34] sm:$0xf] }
   0xc   :  { %4662 = vmatprep.subr.bf16.mxu0 %v5849_v0  ;;  %4986 = vmatprep.subr.bf16.mxu1 %v5849_v0  ;;  %v5680_v32 = vld [vmem:[%s7309_s1 + $0x60] sm:$0xff]   ;;  %v5684_v34 = vld [vmem:[%s7309_s1 + $0x68] sm:$0xff]   ;;  %v6036_v38 = vld [vmem:[%s7310_s0 + $0x38] sm:$0xf] }
   0xd   :  { %v216_v35 = vld [vmem:[%s7310_s0] sm:$0xf]  ;;  %v6023_v36 = vld [vmem:[%s7310_s0 + $0x4] sm:$0xf]  ;;  %v5681_v39 = vld [vmem:[%s7310_s0 + $0x18] sm:$0xff]   ;;  %v4096_v43 = vcombine.low %v4069_v37, %v6036_v38 }
   0xe   :  { %v5682_v40 = vld [vmem:[%s7310_s0 + $0x4c] sm:$0xff]   ;;  %v3833_v41 = vcombine.low %v216_v35, %v6023_v36  ;;  %v5689_v46 = vld [vmem:[%s7309_s1 + $0x78] sm:$0xff]   ;;  %v5687_v48 = vld [vmem:[%s7310_s0 + $0x20] sm:$0xff]  }
   0xf   :  { %4663 = vmatpush3.bf16.msra.mxu0 %v5655_v7  ;;  %4987 = vmatpush3.bf16.msra.mxu1 %v5656_v8  ;;  %v5685_v42 = vld [vmem:[%s7309_s1 + $0x70] sm:$0xff]   ;;  %v6058_v45 = vld [vmem:[%s7310_s0 + $0x8] sm:$0xff]   ;;  %v6073_v49 = vld [vmem:[%s7310_s0 + $0x3c] sm:$0xff]   ;;  %v2169_v50 = vshll.u32 %v4096_v43, 16  ;;  %v2167_v56 = vshrl.u32 %v4096_v43, 16 }
  0x10   :  { %4664 = vmatprep.subr.bf16.mxu0 %v5849_v0  ;;  %4988 = vmatprep.subr.bf16.mxu1 %v5849_v0  ;;  %v5686_v44 = vld [vmem:[%s7309_s1 + $0x70] sm:$0xff]   ;;  %v276_v47 = vshll.u32 %v3833_v41, 16  ;;  %v5690_v52 = vld [vmem:[%s7309_s1 + $0x78] sm:$0xff]   ;;  %v274_v53 = vshrl.u32 %v3833_v41, 16  ;;  %v281_v54 = vshll.u32 %v6058_v45, 16  ;;  %v2174_v58 = vshll.u32 %v6073_v49, 16 }
  0x11   :  { %v5688_v51 = vld [vmem:[%s7310_s0 + $0x54] sm:$0xff]   ;;  %v2171_v57 = vrot.slane %v2169_v50, 1  ;;  %v6099_v1 = vld [vmem:[%s7310_s0 + $0x44] sm:$0xff]   ;;  %v285_v4 = vshrl.u32 %v6058_v45, 16  ;;  %v2178_v8 = vshrl.u32 %v6073_v49, 16 }
  0x12   :  { %v278_v55 = vrot.slane %v276_v47, 1  ;;  %v283_v60 = vrot.slane %v281_v54, 1  ;;  %v6092_v61 = vld [vmem:[%s7310_s0 + $0x10] sm:$0xff]   ;;  %v2176_v63 = vrot.slane %v2174_v58, 1  ;;  %v5695_v3 = vld [vmem:[%s7309_s1 + $0x80] sm:$0xff]   ;;  %v5711_v50 = vld [vmem:[%s7309_s1 + $0xa8] sm:$0xff]  }
  0x13   :  { %4665 = vmatpush3.bf16.msra.mxu0 %v5657_v9  ;;  %4989 = vmatpush3.bf16.msra.mxu1 %v5658_v10  ;;  %v2172_v62 = vor.u32 %v2171_v57, %v2167_v56  ;;  %v289_v5 = vshll.u32 %v6092_v61, 16  ;;  %v5696_v7 = vld [vmem:[%s7309_s1 + $0x80] sm:$0xff]   ;;  %v2182_v9 = vshll.u32 %v6099_v1, 16  ;;  %v5697_v10 = vld [vmem:[%s7309_s1 + $0x88] sm:$0xff]   ;;  %v5713_v54 = vld [vmem:[%s7309_s1 + $0xb0] sm:$0xff]  }
  0x14   :  { %4666 = vmatprep.subr.bf16.mxu0 %v5849_v0  ;;  %4990 = vmatprep.subr.bf16.mxu1 %v5849_v0  ;;  %v279_v59 = vor.u32 %v278_v55, %v274_v53  ;;  %v5708_v41 = vld [vmem:[%s7309_s1 + $0xa0] sm:$0xff]   ;;  %v5712_v53 = vld [vmem:[%s7309_s1 + $0xa8] sm:$0xff]  }
  0x15   :  { %v2177_v6 = vsel %vm272_vm1, %v2172_v62, %v2176_v63  ;;  %v5714_v62 = vld [vmem:[%s7309_s1 + $0xb0] sm:$0xff]  }
  0x16   :  { %v284_v2 = vsel %vm272_vm1, %v279_v59, %v283_v60 }
  0x17   :  { %4667 = vmatpush3.bf16.msra.mxu0 %v5659_v11  ;;  %4991 = vmatpush3.bf16.msra.mxu1 %v5660_v12  ;;  %v287_v11 = vor.u32 %v285_v4, %v283_v60  ;;  %v291_v12 = vrot.slane %v289_v5, 1  ;;  %v5717_v4 = vld [vmem:[%s7309_s1 + $0xb8] sm:$0xff]  }
  0x18   :  { %4668 = vmatprep.subr.bf16.mxu0 %v5849_v0  ;;  %4992 = vmatprep.subr.bf16.mxu1 %v5849_v0 }
  0x1b   :  { %4669 = vmatpush3.bf16.msra.mxu0 %v5661_v13  ;;  %4993 = vmatpush3.bf16.msra.mxu1 %v5662_v14  ;;  %v6119_v13 = vld [vmem:[%s7310_s0 + $0x18] sm:$0xff]   ;;  %v5698_v14 = vld [vmem:[%s7309_s1 + $0x88] sm:$0xff]  }
  0x1c   :  { %4670 = vmatprep.subr.bf16.mxu0 %v5849_v0  ;;  %4994 = vmatprep.subr.bf16.mxu1 %v5849_v0  ;;  %v301_v37 = vshrl.u32 %v6119_v13, 16 }
  0x1f   :  { %4671 = vmatpush3.bf16.msra.mxu0 %v5663_v15  ;;  %4995 = vmatpush3.bf16.msra.mxu1 %v5664_v16  ;;  %v2180_v15 = vor.u32 %v2178_v8, %v2176_v63  ;;  %v2184_v16 = vrot.slane %v2182_v9, 1  ;;  %v453_v63 = vld [vmem:[%s7310_s0] sm:$0xe]  ;;  %v4110_v8 = vld [vmem:[%s7310_s0 + $0x34] sm:$0xe] }
  0x20   :  { %4692 = vmatprep.subr.bf16.mxu0 %v5849_v0  ;;  %5016 = vmatprep.subr.bf16.mxu1 %v5849_v0 }
  0x22   :  { %4673 = vmatmul.mubr.bf16.vlgmr.msra.gmra.mrb[0].mxu0 %v5665_v17  ;;  %4997 = vmatmul.mubr.bf16.vlgmr.msra.gmra.mrb[0].mxu1 %v5666_v18  ;;  %v6128_v17 = vld [vmem:[%s7310_s0 + $0x4c] sm:$0xff]  }
  0x23   :  { %4693 = vmatpush3.bf16.msra.mxu0 %v5667_v19  ;;  %5017 = vmatpush3.bf16.msra.mxu1 %v5668_v20  ;;  %v5701_v18 = vld [vmem:[%s7309_s1 + $0x90] sm:$0xff]   ;;  %v292_v20 = vsel %vm272_vm1, %v287_v11, %v291_v12 }
  0x24   :  { %4694 = vmatprep.subr.bf16.mxu0 %v5849_v0  ;;  %5018 = vmatprep.subr.bf16.mxu1 %v5849_v0  ;;  %v5702_v19 = vld [vmem:[%s7309_s1 + $0x90] sm:$0xff]  }
  0x25   :  { %4676 = vmatprep.mubr.msk.bf16.mxu0 %vm5850_vm0, %v5849_v0  ;;  %5000 = vmatprep.mubr.msk.bf16.mxu1 %vm5850_vm0, %v5849_v0 }
  0x27   :  { %4695 = vmatpush3.bf16.msra.mxu0 %v5669_v21  ;;  %5019 = vmatpush3.bf16.msra.mxu1 %v5670_v22  ;;  %v293_v21 = vshrl.u32 %v6092_v61, 16  ;;  %v297_v22 = vshll.u32 %v6119_v13, 16 }
  0x28   :  { %4696 = vmatprep.subr.bf16.mxu0 %v5849_v0  ;;  %5020 = vmatprep.subr.bf16.mxu1 %v5849_v0 }
  0x2a   :  { %4677 = vmatmul.mubr.bf16.gmra.mrb[4].mxu0 %v5671_v23  ;;  %5001 = vmatmul.mubr.bf16.gmra.mrb[4].mxu1 %v5672_v24  ;;  %v2185_v23 = vsel %vm272_vm1, %v2180_v15, %v2184_v16  ;;  %v2186_v24 = vshrl.u32 %v6099_v1, 16  ;;  %v476_v15 = vrot.slane %v6058_v45, 1  ;;  %v5723_v45 = vld [vmem:[%s7309_s1 + $0xc8] sm:$0xff]  }
  0x2b   :  { %4697 = vmatpush3.bf16.msra.mxu0 %v5673_v25  ;;  %5021 = vmatpush3.bf16.msra.mxu1 %v5674_v26  ;;  %v2190_v25 = vshll.u32 %v6128_v17, 16  ;;  %v5704_v26 = vld [vmem:[%s7309_s1 + $0x98] sm:$0xff]  }
  0x2c   :  { %4680 = vmatprep.mubr.msk.bf16.mxu0 %vm5850_vm0, %v5849_v0  ;;  %4698 = vmatprep.subr.bf16.mxu0 %v5849_v0 }
  0x2d   :  { %5004 = vmatprep.mubr.msk.bf16.mxu1 %vm5850_vm0, %v5849_v0  ;;  %5022 = vmatprep.subr.bf16.mxu1 %v5849_v0 }
  0x2f   :  { %4699 = vmatpush3.bf16.msra.mxu0 %v5676_v27  ;;  %5023 = vmatpush3.bf16.msra.mxu1 %v5678_v28  ;;  %v5706_v27 = vld [vmem:[%s7309_s1 + $0x98] sm:$0xff]   ;;  %v295_v28 = vor.u32 %v293_v21, %v291_v12  ;;  %v4127_v12 = vcombine.low %v4110_v8, %v6036_v38  ;;  %v2367_v38 = vrot.slane %v6073_v49, 1  ;;  %v478_v49 = vrot.slane %v6092_v61, 1  ;;  %v5724_v21 = vld [vmem:[%s7309_s1 + $0xc8] sm:$0xff]   ;;  %v5725_v61 = vld [vmem:[%s7309_s1 + $0xd0] sm:$0xff]  }
  0x30   :  { %4700 = vmatprep.subr.bf16.mxu0 %v5849_v0  ;;  %5024 = vmatprep.subr.bf16.mxu1 %v5849_v0  ;;  %v6403_v8 = vld [vmem:[%s7310_s0 + $0x50] sm:$0xff]  }
  0x32   :  { %4681 = vmatmul.mubr.bf16.gmra.mrb[8].mxu0 %v5675_v29  ;;  %5005 = vmatmul.mubr.bf16.gmra.mrb[8].mxu1 %v5677_v30  ;;  %v299_v29 = vrot.slane %v297_v22, 1  ;;  %v6158_v30 = vld [vmem:[%s7310_s0 + $0x20] sm:$0xff]   ;;  %v2369_v22 = vrot.slane %v6099_v1, 1  ;;  %v5726_v1 = vld [vmem:[%s7309_s1 + $0xd0] sm:$0xff]  }
  0x33   :  { %4701 = vmatpush3.bf16.msra.mxu0 %v5679_v31  ;;  %5025 = vmatpush3.bf16.msra.mxu1 %v5680_v32  ;;  %v2188_v31 = vor.u32 %v2186_v24, %v2184_v16  ;;  %v2192_v32 = vrot.slane %v2190_v25, 1  ;;  %v309_v56 = vshrl.u32 %v6158_v30, 16  ;;  %v480_v25 = vrot.slane %v6119_v13, 1 }
  0x34   :  { %4684 = vmatprep.mubr.msk.bf16.mxu0 %vm5850_vm0, %v5849_v0  ;;  %5008 = vmatprep.mubr.msk.bf16.mxu1 %vm5850_vm0, %v5849_v0  ;;  %v300_v35 = vsel %vm272_vm1, %v295_v28, %v299_v29  ;;  %v303_v47 = vor.u32 %v301_v37, %v299_v29  ;;  %v2370_v24 = vsel %vm474_vm2, %v2367_v38, %v2369_v22  ;;  %v5728_v28 = vld [vmem:[%s7309_s1 + $0xd8] sm:$0xff]   ;;  %v5729_v29 = vld [vmem:[%s7309_s1 + $0xe0] sm:$0xff]   ;;  %v5732_v37 = vld [vmem:[%s7309_s1 + $0xe8] sm:$0xff]  }
  0x35   :  { %4702 = vmatprep.subr.bf16.mxu0 %v5849_v0  ;;  %5026 = vmatprep.subr.bf16.mxu1 %v5849_v0  ;;  %v481_v13 = vsel %vm474_vm2, %v478_v49, %v480_v25 }
  0x37   :  { %4703 = vmatpush3.bf16.msra.mxu0 %v5683_v33  ;;  %5027 = vmatpush3.bf16.msra.mxu1 %v5684_v34  ;;  %v6165_v33 = vld [vmem:[%s7310_s0 + $0x54] sm:$0xff]   ;;  %v5707_v34 = vld [vmem:[%s7309_s1 + $0xa0] sm:$0xff]  }
  0x38   :  { %4704 = vmatprep.subr.bf16.mxu0 %v5849_v0  ;;  %5028 = vmatprep.subr.bf16.mxu1 %v5849_v0  ;;  %v2198_v43 = vshll.u32 %v6165_v33, 16  ;;  %v2202_v59 = vshrl.u32 %v6165_v33, 16 }
  0x3a   :  { %4685 = vmatmul.mubr.bf16.gmra.mrb[12].mxu0 %v5681_v39  ;;  %5009 = vmatmul.mubr.bf16.gmra.mrb[12].mxu1 %v5682_v40  ;;  %v305_v39 = vshll.u32 %v6158_v30, 16  ;;  %v2193_v40 = vsel %vm272_vm1, %v2188_v31, %v2192_v32  ;;  %v5730_v31 = vld [vmem:[%s7309_s1 + $0xe0] sm:$0xff]  }
  0x3b   :  { %4688 = vmatprep.mubr.msk.bf16.mxu0 %vm5850_vm0, %v5849_v0  ;;  %4705 = vmatpush3.bf16.msra.mxu0 %v5685_v42  ;;  %v2194_v42 = vshrl.u32 %v6128_v17, 16 }
  0x3c   :  { %5012 = vmatprep.mubr.msk.bf16.mxu1 %vm5850_vm0, %v5849_v0  ;;  %5029 = vmatpush3.bf16.msra.mxu1 %v5686_v44  ;;  %v6188_v44 = vld [vmem:[%s7310_s0 + $0x28] ss:$0 sps:$4 sm:$0x11]  }
  0x3d   :  { %4706 = vmatprep.subr.bf16.mxu0 %v5849_v0  ;;  %5030 = vmatprep.subr.bf16.mxu1 %v5849_v0  ;;  %v313_v57 = vshll.u32 %v6188_v44, 16 }
  0x3f   :  { %4707 = vmatpush3.bf16.msra.mxu0 %v5689_v46  ;;  %v6193_v46 = vld [vmem:[%s7310_s0 + $0x5c] ss:$0 sps:$4 sm:$0x11]  }
  0x40   :  { %5031 = vmatpush3.bf16.msra.mxu1 %v5690_v52  ;;  %4728 = vmatprep.subr.bf16.mxu0 %v5849_v0  ;;  %v2200_v52 = vrot.slane %v2198_v43, 1  ;;  %v2206_v60 = vshll.u32 %v6193_v46, 16 }
  0x41   :  { %5052 = vmatprep.subr.bf16.mxu1 %v5849_v0 }
  0x42   :  { %4689 = vmatmul.mubr.bf16.gmra.mrb[16].mxu0 %v5687_v48  ;;  %5013 = vmatmul.mubr.bf16.gmra.mrb[16].mxu1 %v5688_v51  ;;  %v307_v48 = vrot.slane %v305_v39, 1  ;;  %v2196_v51 = vor.u32 %v2194_v42, %v2192_v32  ;;  %v2204_v5 = vor.u32 %v2202_v59, %v2200_v52  ;;  %v482_v32 = vrot.slane %v6158_v30, 1  ;;  %v5733_v30 = vld [vmem:[%s7309_s1 + $0xf0] sm:$0xff]  }
  0x43   :  { %4708 = vmatprep.mubr.msk.bf16.mxu0 %vm5850_vm0, %v5849_v0  ;;  %5032 = vmatprep.mubr.msk.bf16.mxu1 %vm5850_vm0, %v5849_v0  ;;  %v6335_v42 = vld [vmem:[%s7310_s0 + $0xc] sm:$0xff]   ;;  %v6376_v59 = vld [vmem:[%s7310_s0 + $0x14] sm:$0xff]  }
  0x44   :  { %v308_v55 = vsel %vm272_vm1, %v303_v47, %v307_v48  ;;  %v2201_v58 = vsel %vm272_vm1, %v2196_v51, %v2200_v52  ;;  %v483_v39 = vsel %vm474_vm2, %v480_v25, %v482_v32  ;;  %v4137_v47 = vld [vmem:[%s7310_s0 + $0x3c] sm:$0xf]  ;;  %v1036_v51 = vld [vmem:[%s7310_s0 + $0x4] sm:$0xc]  ;;  %v4203_v52 = vld [vmem:[%s7310_s0 + $0x38] sm:$0xc] }
  0x45   :  { %v5741_v25 = vld [vmem:[%s7309_s1 + $0x100] sm:$0xff]  }
  0x4a   :  { %4709 = vmatmul.mubr.bf16.vlgmr.msra.gmra.mrb[0].mxu0 %v284_v2  ;;  %5033 = vmatmul.mubr.bf16.vlgmr.msra.gmra.mrb[0].mxu1 %v2177_v6  ;;  %v311_v2 = vor.u32 %v309_v56, %v307_v48  ;;  %v2208_v6 = vrot.slane %v2206_v60, 1  ;;  %v622_v48 = vld [vmem:[%s7310_s0 + $0x4] sm:$0xe]  ;;  %v5736_v56 = vld [vmem:[%s7309_s1 + $0xf8] sm:$0xff]   ;;  %v6381_v60 = vld [vmem:[%s7310_s0 + $0x48] sm:$0xff]  }
  0x4b   :  { %4729 = vmatpush3.bf16.msra.mxu0 %v5695_v3  ;;  %5053 = vmatpush3.bf16.msra.mxu1 %v5696_v7  ;;  %v315_v3 = vrot.slane %v313_v57, 1  ;;  %v5718_v7 = vld [vmem:[%s7309_s1 + $0xb8] sm:$0xff]  }
  0x4c   :  { %4730 = vmatprep.subr.bf16.mxu0 %v5849_v0  ;;  %5054 = vmatprep.subr.bf16.mxu1 %v5849_v0  ;;  %v2209_v11 = vsel %vm272_vm1, %v2204_v5, %v2208_v6  ;;  %v4136_v57 = vld [vmem:[%s7310_s0 + $0x38] sm:$0xe]  ;;  %v1061_v6 = vrot.slane %v6376_v59, 2 }
  0x4d   :  { %4712 = vmatprep.mubr.msk.bf16.mxu0 %vm5850_vm0, %v5849_v0  ;;  %5036 = vmatprep.mubr.msk.bf16.mxu1 %vm5850_vm0, %v5849_v0  ;;  %v316_v9 = vsel %vm272_vm1, %v311_v2, %v315_v3  ;;  %v6390_v3 = vld [vmem:[%s7310_s0 + $0x1c] sm:$0xff]  }
  0x4f   :  { %4731 = vmatpush3.bf16.msra.mxu0 %v5697_v10  ;;  %5055 = vmatpush3.bf16.msra.mxu1 %v5698_v14  ;;  %v3863_v10 = vcombine.low %v453_v63, %v6023_v36  ;;  %v2366_v36 = vrot.slane %v4127_v12, 1  ;;  %v6412_v12 = vld [vmem:[%s7310_s0 + $0x24] sm:$0xff]  }
  0x50   :  { %4732 = vmatprep.subr.bf16.mxu0 %v5849_v0  ;;  %5056 = vmatprep.subr.bf16.mxu1 %v5849_v0 }
  0x51   :  { %v475_v14 = vrot.slane %v3863_v10, 1 }
  0x52   :  { %4713 = vmatmul.mubr.bf16.gmra.mrb[4].mxu0 %v292_v20  ;;  %5037 = vmatmul.mubr.bf16.gmra.mrb[4].mxu1 %v2185_v23  ;;  %v5722_v20 = vld [vmem:[%s7309_s1 + $0xc0] sm:$0xff]   ;;  %v479_v23 = vsel %vm474_vm2, %v476_v15, %v478_v49 }
  0x53   :  { %4733 = vmatpush3.bf16.msra.mxu0 %v5701_v18  ;;  %5057 = vmatpush3.bf16.msra.mxu1 %v5702_v19  ;;  %v477_v16 = vsel %vm474_vm2, %v475_v14, %v476_v15  ;;  %v5721_v18 = vld [vmem:[%s7309_s1 + $0xc0] sm:$0xff]   ;;  %v2368_v19 = vsel %vm474_vm2, %v2366_v36, %v2367_v38  ;;  %v1063_v15 = vrot.slane %v6390_v3, 2  ;;  %v6422_v36 = vld [vmem:[%s7310_s0 + $0x58] sm:$0xff]  }
  0x54   :  { %4716 = vmatprep.mubr.msk.bf16.mxu0 %vm5850_vm0, %v5849_v0  ;;  %4734 = vmatprep.subr.bf16.mxu0 %v5849_v0 }
  0x55   :  { %5040 = vmatprep.mubr.msk.bf16.mxu1 %vm5850_vm0, %v5849_v0  ;;  %5058 = vmatprep.subr.bf16.mxu1 %v5849_v0 }
  0x57   :  { %4735 = vmatpush3.bf16.msra.mxu0 %v5704_v26  ;;  %5059 = vmatpush3.bf16.msra.mxu1 %v5706_v27  ;;  %v5727_v26 = vld [vmem:[%s7309_s1 + $0xd8] sm:$0xff]   ;;  %v2371_v27 = vrot.slane %v6128_v17, 1 }
  0x58   :  { %4736 = vmatprep.subr.bf16.mxu0 %v5849_v0  ;;  %5060 = vmatprep.subr.bf16.mxu1 %v5849_v0 }
  0x59   :  { %v2372_v17 = vsel %vm474_vm2, %v2369_v22, %v2371_v27 }
  0x5a   :  { %4717 = vmatmul.mubr.bf16.gmra.mrb[8].mxu0 %v300_v35  ;;  %5041 = vmatmul.mubr.bf16.gmra.mrb[8].mxu1 %v2193_v40  ;;  %v2373_v35 = vrot.slane %v6165_v33, 1  ;;  %v5734_v33 = vld [vmem:[%s7309_s1 + $0xf0] sm:$0xff]   ;;  %v484_v40 = vrot.slane %v6188_v44, 1  ;;  %v2375_v44 = vrot.slane %v6193_v46, 1  ;;  %v5735_v46 = vld [vmem:[%s7309_s1 + $0xf8] sm:$0xff]  }
  0x5b   :  { %4737 = vmatpush3.bf16.msra.mxu0 %v5707_v34  ;;  %5061 = vmatpush3.bf16.msra.mxu1 %v5708_v41  ;;  %v5731_v34 = vld [vmem:[%s7309_s1 + $0xe8] sm:$0xff]  }
  0x5c   :  { %4720 = vmatprep.mubr.msk.bf16.mxu0 %vm5850_vm0, %v5849_v0  ;;  %5044 = vmatprep.mubr.msk.bf16.mxu1 %vm5850_vm0, %v5849_v0  ;;  %v623_v41 = vld [vmem:[%s7310_s0 + $0x8] sm:$0xf]  ;;  %v2374_v43 = vsel %vm474_vm2, %v2371_v27, %v2373_v35  ;;  %v2376_v10 = vsel %vm474_vm2, %v2373_v35, %v2375_v44  ;;  %v5742_v27 = vld [vmem:[%s7309_s1 + $0x100] sm:$0xff]   ;;  %v685_v44 = vrot.slane %v6412_v12, 1 }
  0x5d   :  { %4738 = vmatprep.subr.bf16.mxu0 %v5849_v0  ;;  %5062 = vmatprep.subr.bf16.mxu1 %v5849_v0  ;;  %v6385_v2 = vcombine.low %v622_v48, %v623_v41  ;;  %v5757_v48 = vld [vmem:[%s7309_s1 + $0x128] sm:$0xff]  }
  0x5f   :  { %4739 = vmatpush3.bf16.msra.mxu0 %v5711_v50  ;;  %5063 = vmatpush3.bf16.msra.mxu1 %v5712_v53  ;;  %v6350_v50 = vld [vmem:[%s7310_s0 + $0x40] sm:$0xff]   ;;  %v3943_v53 = vcombine.low %v1036_v51, %v623_v41  ;;  %v2575_v51 = vrot.slane %v6422_v36, 1 }
  0x60   :  { %4740 = vmatprep.subr.bf16.mxu0 %v5849_v0  ;;  %5064 = vmatprep.subr.bf16.mxu1 %v5849_v0  ;;  %v5753_v41 = vld [vmem:[%s7309_s1 + $0x120] sm:$0xff]  }
  0x62   :  { %4721 = vmatmul.mubr.bf16.gmra.mrb[12].mxu0 %v308_v55  ;;  %5045 = vmatmul.mubr.bf16.gmra.mrb[12].mxu1 %v2201_v58  ;;  %v4220_v55 = vcombine.low %v4203_v52, %v4137_v47  ;;  %v2945_v58 = vrot.slane %v6350_v50, 2  ;;  %v5758_v52 = vld [vmem:[%s7309_s1 + $0x128] sm:$0xff]  }
  0x63   :  { %4724 = vmatprep.mubr.msk.bf16.mxu0 %vm5850_vm0, %v5849_v0  ;;  %4741 = vmatpush3.bf16.msra.mxu0 %v5713_v54  ;;  %v1059_v54 = vrot.slane %v6335_v42, 2 }
  0x64   :  { %5048 = vmatprep.mubr.msk.bf16.mxu1 %vm5850_vm0, %v5849_v0  ;;  %5065 = vmatpush3.bf16.msra.mxu1 %v5714_v62  ;;  %v1058_v62 = vrot.slane %v3943_v53, 2  ;;  %v2944_v63 = vrot.slane %v4220_v55, 2  ;;  %v5762_v53 = vld [vmem:[%s7310_s0 + $0x60] ss:$0 sps:$4 sm:$0x11]  }
  0x65   :  { %4742 = vmatprep.subr.bf16.mxu0 %v5849_v0  ;;  %5066 = vmatprep.subr.bf16.mxu1 %v5849_v0  ;;  %v6415_v14 = vsel %vm1057_vm3, %v1059_v54, %v1061_v6 }
  0x66   :  { %v6396_v5 = vsel %vm1057_vm3, %v2944_v63, %v2945_v58  ;;  %v856_v63 = vshrl.u32 %v6335_v42, 16 }
  0x67   :  { %4743 = vmatpush3.bf16.msra.mxu0 %v5717_v4  ;;  %v6393_v4 = vsel %vm1057_vm3, %v1058_v62, %v1059_v54  ;;  %v851_v62 = vshll.u32 %v6385_v2, 16 }
  0x68   :  { %5067 = vmatpush3.bf16.msra.mxu1 %v5718_v7  ;;  %4764 = vmatprep.subr.bf16.mxu0 %v5849_v0  ;;  %v485_v7 = vsel %vm474_vm2, %v482_v32, %v484_v40  ;;  %v5747_v32 = vld [vmem:[%s7309_s1 + $0x110] sm:$0xff]  }
  0x69   :  { %5088 = vmatprep.subr.bf16.mxu1 %v5849_v0 }
  0x6a   :  { %4725 = vmatmul.mubr.bf16.gmra.mrb[16].mxu0 %v316_v9  ;;  %5049 = vmatmul.mubr.bf16.gmra.mrb[16].mxu1 %v2209_v11  ;;  %v2947_v9 = vrot.slane %v6381_v60, 2  ;;  %v6407_v11 = vcombine.low %v4136_v57, %v4137_v47  ;;  %v5754_v47 = vld [vmem:[%s7309_s1 + $0x120] sm:$0xff]   ;;  %v5760_v57 = vld [vmem:[%s7309_s1 + $0x130] sm:$0xff]  }
  0x6b   :  { %4744 = vmatprep.mubr.msk.bf16.mxu0 %vm5850_vm0, %v5849_v0  ;;  %5068 = vmatprep.mubr.msk.bf16.mxu1 %vm5850_vm0, %v5849_v0 }
  0x6c   :  { %v6425_v38 = vsel %vm1057_vm3, %v2945_v58, %v2947_v9  ;;  %v2568_v22 = vrot.slane %v6407_v11, 1  ;;  %v848_v58 = vshrl.u32 %v6385_v2, 16 }
  0x72   :  { %4745 = vmatmul.mubr.bf16.vlgmr.msra.gmra.mrb[0].mxu0 %v477_v16  ;;  %5069 = vmatmul.mubr.bf16.vlgmr.msra.gmra.mrb[0].mxu1 %v2368_v19  ;;  %v2949_v16 = vrot.slane %v6403_v8, 2  ;;  %v6431_v19 = vsel %vm1057_vm3, %v1061_v6, %v1063_v15  ;;  %v859_v6 = vshll.u32 %v6335_v42, 16 }
  0x73   :  { %4765 = vmatpush3.bf16.msra.mxu0 %v5721_v18  ;;  %5089 = vmatpush3.bf16.msra.mxu1 %v5722_v20  ;;  %v678_v18 = vrot.slane %v6385_v2, 1  ;;  %v1065_v20 = vrot.slane %v6412_v12, 2  ;;  %v2747_v2 = vshll.u32 %v6350_v50, 16 }
  0x74   :  { %4766 = vmatprep.subr.bf16.mxu0 %v5849_v0  ;;  %5090 = vmatprep.subr.bf16.mxu1 %v5849_v0  ;;  %v6438_v49 = vsel %vm1057_vm3, %v2947_v9, %v2949_v16 }
  0x75   :  { %4748 = vmatprep.mubr.msk.bf16.mxu0 %vm5850_vm0, %v5849_v0  ;;  %5072 = vmatprep.mubr.msk.bf16.mxu1 %vm5850_vm0, %v5849_v0 }
  0x77   :  { %4767 = vmatpush3.bf16.msra.mxu0 %v5723_v45  ;;  %5091 = vmatpush3.bf16.msra.mxu1 %v5724_v21  ;;  %v679_v45 = vrot.slane %v6335_v42, 1  ;;  %v2951_v21 = vrot.slane %v6422_v36, 2  ;;  %v2744_v42 = vshrl.u32 %v6350_v50, 16 }
  0x78   :  { %4768 = vmatprep.subr.bf16.mxu0 %v5849_v0  ;;  %5092 = vmatprep.subr.bf16.mxu1 %v5849_v0 }
  0x7a   :  { %4749 = vmatmul.mubr.bf16.gmra.mrb[4].mxu0 %v479_v23  ;;  %5073 = vmatmul.mubr.bf16.gmra.mrb[4].mxu1 %v2370_v24  ;;  %v6448_v23 = vsel %vm1057_vm3, %v1063_v15, %v1065_v20  ;;  %v6453_v24 = vsel %vm1057_vm3, %v2949_v16, %v2951_v21  ;;  %v5763_v15 = vld [vmem:[%s7309_s1 + $0x138] sm:$0xff]   ;;  %v2739_v16 = vshll.u32 %v6407_v11, 16 }
  0x7b   :  { %4769 = vmatpush3.bf16.msra.mxu0 %v5725_v61  ;;  %5093 = vmatpush3.bf16.msra.mxu1 %v5726_v1  ;;  %v2569_v61 = vrot.slane %v6350_v50, 1  ;;  %v680_v1 = vsel %vm474_vm2, %v678_v18, %v679_v45  ;;  %v5764_v18 = vld [vmem:[%s7309_s1 + $0x138] sm:$0xff]  }
  0x7c   :  { %4752 = vmatprep.mubr.msk.bf16.mxu0 %vm5850_vm0, %v5849_v0  ;;  %4770 = vmatprep.subr.bf16.mxu0 %v5849_v0  ;;  %v2741_v50 = vrot.slane %v2739_v16, 2  ;;  %v5772_v16 = vld [vmem:[%s7309_s1 + $0x158] sm:$0xff]  }
  0x7d   :  { %5076 = vmatprep.mubr.msk.bf16.mxu1 %vm5850_vm0, %v5849_v0  ;;  %5094 = vmatprep.subr.bf16.mxu1 %v5849_v0 }
  0x7f   :  { %4771 = vmatpush3.bf16.msra.mxu0 %v5727_v26  ;;  %5095 = vmatpush3.bf16.msra.mxu1 %v5728_v28  ;;  %v2570_v26 = vsel %vm474_vm2, %v2568_v22, %v2569_v61  ;;  %v5743_v28 = vld [vmem:[%s7309_s1 + $0x108] sm:$0xff]   ;;  %v853_v22 = vrot.slane %v851_v62, 2 }
  0x80   :  { %4772 = vmatprep.subr.bf16.mxu0 %v5849_v0  ;;  %5096 = vmatprep.subr.bf16.mxu1 %v5849_v0 }
  0x82   :  { %4753 = vmatmul.mubr.bf16.gmra.mrb[8].mxu0 %v481_v13  ;;  %5077 = vmatmul.mubr.bf16.gmra.mrb[8].mxu1 %v2372_v17  ;;  %v681_v13 = vrot.slane %v6376_v59, 1  ;;  %v2571_v17 = vrot.slane %v6381_v60, 1 }
  0x83   :  { %4773 = vmatpush3.bf16.msra.mxu0 %v5729_v29  ;;  %5097 = vmatpush3.bf16.msra.mxu1 %v5730_v31  ;;  %v5744_v29 = vld [vmem:[%s7309_s1 + $0x108] sm:$0xff]  }
  0x84   :  { %4756 = vmatprep.mubr.msk.bf16.mxu0 %vm5850_vm0, %v5849_v0  ;;  %5080 = vmatprep.mubr.msk.bf16.mxu1 %vm5850_vm0, %v5849_v0  ;;  %v682_v31 = vsel %vm474_vm2, %v679_v45, %v681_v13  ;;  %v2572_v35 = vsel %vm474_vm2, %v2569_v61, %v2571_v17  ;;  %v850_v45 = vrot.slane %v848_v58, 1  ;;  %v858_v61 = vrot.slane %v856_v63, 1 }
  0x85   :  { %4774 = vmatprep.subr.bf16.mxu0 %v5849_v0  ;;  %5098 = vmatprep.subr.bf16.mxu1 %v5849_v0 }
  0x87   :  { %4775 = vmatpush3.bf16.msra.mxu0 %v5731_v34  ;;  %5099 = vmatpush3.bf16.msra.mxu1 %v5732_v37  ;;  %v5748_v34 = vld [vmem:[%s7309_s1 + $0x110] sm:$0xff]   ;;  %v683_v37 = vrot.slane %v6390_v3, 1 }
  0x88   :  { %4776 = vmatprep.subr.bf16.mxu0 %v5849_v0  ;;  %5100 = vmatprep.subr.bf16.mxu1 %v5849_v0 }
  0x89   :  { %v684_v40 = vsel %vm474_vm2, %v681_v13, %v683_v37  ;;  %v686_v54 = vsel %vm474_vm2, %v683_v37, %v685_v44  ;;  %v865_v13 = vshrl.u32 %v6376_v59, 16 }
  0x8a   :  { %4757 = vmatmul.mubr.bf16.gmra.mrb[12].mxu0 %v483_v39  ;;  %5081 = vmatmul.mubr.bf16.gmra.mrb[12].mxu1 %v2374_v43  ;;  %v2573_v39 = vrot.slane %v6403_v8, 1 }
  0x8b   :  { %4760 = vmatprep.mubr.msk.bf16.mxu0 %vm5850_vm0, %v5849_v0  ;;  %4777 = vmatpush3.bf16.msra.mxu0 %v5733_v30  ;;  %v5750_v30 = vld [vmem:[%s7309_s1 + $0x118] sm:$0xff]  }
  0x8c   :  { %5084 = vmatprep.mubr.msk.bf16.mxu1 %vm5850_vm0, %v5849_v0  ;;  %5101 = vmatpush3.bf16.msra.mxu1 %v5734_v33  ;;  %v5752_v33 = vld [vmem:[%s7309_s1 + $0x118] sm:$0xff]   ;;  %v2574_v43 = vsel %vm474_vm2, %v2571_v17, %v2573_v39  ;;  %v2576_v55 = vsel %vm474_vm2, %v2573_v39, %v2575_v51  ;;  %v2753_v17 = vshrl.u32 %v6381_v60, 16 }
  0x8d   :  { %4778 = vmatprep.subr.bf16.mxu0 %v5849_v0  ;;  %5102 = vmatprep.subr.bf16.mxu1 %v5849_v0 }
  0x8f   :  { %4779 = vmatpush3.bf16.msra.mxu0 %v5735_v46  ;;  %v5761_v46 = vld [vmem:[%s7310_s0 + $0x2c] ss:$0 sps:$4 sm:$0x11]  }
  0x90   :  { %5103 = vmatpush3.bf16.msra.mxu1 %v5736_v56  ;;  %4800 = vmatprep.subr.bf16.mxu0 %v5849_v0  ;;  %v5759_v56 = vld [vmem:[%s7309_s1 + $0x130] sm:$0xff]   ;;  %v687_v9 = vrot.slane %v5761_v46, 1 }
  0x91   :  { %5124 = vmatprep.subr.bf16.mxu1 %v5849_v0 }
  0x92   :  { %4761 = vmatmul.mubr.bf16.gmra.mrb[16].mxu0 %v485_v7  ;;  %5085 = vmatmul.mubr.bf16.gmra.mrb[16].mxu1 %v2376_v10  ;;  %v2736_v7 = vshrl.u32 %v6407_v11, 16  ;;  %v2577_v10 = vrot.slane %v5762_v53, 1  ;;  %v688_v11 = vsel %vm474_vm2, %v685_v44, %v687_v9  ;;  %v2762_v44 = vshrl.u32 %v6403_v8, 16 }
  0x93   :  { %4780 = vmatprep.mubr.msk.bf16.mxu0 %vm5850_vm0, %v5849_v0  ;;  %5104 = vmatprep.mubr.msk.bf16.mxu1 %vm5850_vm0, %v5849_v0  ;;  %v883_v9 = vshrl.u32 %v6412_v12, 16 }
  0x9a   :  { %4781 = vmatmul.mubr.bf16.vlgmr.msra.gmra.mrb[0].mxu0 %v680_v1  ;;  %5105 = vmatmul.mubr.bf16.vlgmr.msra.gmra.mrb[0].mxu1 %v2570_v26  ;;  %v861_v1 = vrot.slane %v859_v6, 2  ;;  %v2578_v26 = vsel %vm474_vm2, %v2575_v51, %v2577_v10  ;;  %v886_v10 = vshll.u32 %v6412_v12, 16  ;;  %v6862_v12 = vld [vmem:[%s7310_s0 + $0x44] sm:$0xff]  }
  0x9b   :  { %4801 = vmatpush3.bf16.msra.mxu0 %v5741_v25  ;;  %5125 = vmatpush3.bf16.msra.mxu1 %v5742_v27  ;;  %v2738_v25 = vrot.slane %v2736_v7, 1  ;;  %v2746_v27 = vrot.slane %v2744_v42, 1  ;;  %v5771_v7 = vld [vmem:[%s7309_s1 + $0x158] sm:$0xff]   ;;  %v2771_v42 = vshrl.u32 %v6422_v36, 16 }
  0x9c   :  { %4802 = vmatprep.subr.bf16.mxu0 %v5849_v0  ;;  %5126 = vmatprep.subr.bf16.mxu1 %v5849_v0 }
  0x9d   :  { %4784 = vmatprep.mubr.msk.bf16.mxu0 %vm5850_vm0, %v5849_v0  ;;  %5108 = vmatprep.mubr.msk.bf16.mxu1 %vm5850_vm0, %v5849_v0 }
  0x9f   :  { %4803 = vmatpush3.bf16.msra.mxu0 %v5743_v28  ;;  %5127 = vmatpush3.bf16.msra.mxu1 %v5744_v29  ;;  %v2749_v28 = vrot.slane %v2747_v2, 2  ;;  %v868_v29 = vshll.u32 %v6376_v59, 16  ;;  %v5765_v59 = vld [vmem:[%s7309_s1 + $0x140] sm:$0xff]   ;;  %v2774_v2 = vshll.u32 %v6422_v36, 16  ;;  %v6869_v36 = vld [vmem:[%s7312_s3 + $0x18] sm:$0xff] }
  0xa0   :  { %4804 = vmatprep.subr.bf16.mxu0 %v5849_v0  ;;  %5128 = vmatprep.subr.bf16.mxu1 %v5849_v0 }
  0xa1   :  { %v2750_v37 = vor.u32 %v2749_v28, %v2746_v27  ;;  %v870_v39 = vrot.slane %v868_v29, 2  ;;  %v6640_v27 = vld [vmem:[%s7310_s0 + $0x60] ss:$0 sps:$4 sm:$0x33]  }
  0xa2   :  { %4785 = vmatmul.mubr.bf16.gmra.mrb[4].mxu0 %v682_v31  ;;  %5109 = vmatmul.mubr.bf16.gmra.mrb[4].mxu1 %v2572_v35  ;;  %v2756_v31 = vshll.u32 %v6381_v60, 16  ;;  %v2742_v35 = vor.u32 %v2741_v50, %v2738_v25  ;;  %v5766_v60 = vld [vmem:[%s7309_s1 + $0x140] sm:$0xff]   ;;  %v2776_v50 = vrot.slane %v2774_v2, 2  ;;  %v6829_v2 = vld [vmem:[%s7312_s3 + $0x10] sm:$0xff] }
  0xa3   :  { %4805 = vmatpush3.bf16.msra.mxu0 %v5747_v32  ;;  %5129 = vmatpush3.bf16.msra.mxu1 %v5748_v34  ;;  %v854_v32 = vor.u32 %v853_v22, %v850_v45  ;;  %v862_v34 = vor.u32 %v861_v1, %v858_v61  ;;  %v5773_v45 = vld [vmem:[%s7309_s1 + $0x160] sm:$0xff]   ;;  %v885_v22 = vrot.slane %v883_v9, 1  ;;  %v6630_v61 = vld [vmem:[%s7310_s0 + $0x2c] ss:$0 sps:$4 sm:$0x33]  }
  0xa4   :  { %4788 = vmatprep.mubr.msk.bf16.mxu0 %vm5850_vm0, %v5849_v0  ;;  %4806 = vmatprep.subr.bf16.mxu0 %v5849_v0  ;;  %v2751_v51 = vsel %vm846_vm4, %v2742_v35, %v2750_v37  ;;  %v5774_v25 = vld [vmem:[%s7309_s1 + $0x160] sm:$0xff]   ;;  %v892_v29 = vshrl.u32 %v6630_v61, 16  ;;  %v2783_v35 = vshll.u32 %v6640_v27, 16  ;;  %v1067_v9 = vrot.slane %v6630_v61, 2 }
  0xa5   :  { %5112 = vmatprep.mubr.msk.bf16.mxu1 %vm5850_vm0, %v5849_v0  ;;  %5130 = vmatprep.subr.bf16.mxu1 %v5849_v0 }
  0xa7   :  { %4807 = vmatpush3.bf16.msra.mxu0 %v5750_v30  ;;  %5131 = vmatpush3.bf16.msra.mxu1 %v5752_v33  ;;  %v867_v30 = vrot.slane %v865_v13, 1  ;;  %v2755_v33 = vrot.slane %v2753_v17, 1  ;;  %v5775_v13 = vld [vmem:[%s7309_s1 + $0x168] sm:$0xff]   ;;  %v895_v17 = vshll.u32 %v6630_v61, 16 }
  0xa8   :  { %4808 = vmatprep.subr.bf16.mxu0 %v5849_v0  ;;  %5132 = vmatprep.subr.bf16.mxu1 %v5849_v0 }
  0xa9   :  { %v871_v46 = vor.u32 %v870_v39, %v867_v30  ;;  %v897_v30 = vrot.slane %v895_v17, 2  ;;  %v5805_v17 = vld [vmem:[%s7309_s1 + $0x1c0] sm:$0xff]  }
  0xaa   :  { %4789 = vmatmul.mubr.bf16.gmra.mrb[8].mxu0 %v684_v40  ;;  %5113 = vmatmul.mubr.bf16.gmra.mrb[8].mxu1 %v2574_v43  ;;  %v2758_v40 = vrot.slane %v2756_v31, 2  ;;  %v877_v43 = vshll.u32 %v6390_v3, 16 }
  0xab   :  { %4809 = vmatpush3.bf16.msra.mxu0 %v5753_v41  ;;  %5133 = vmatpush3.bf16.msra.mxu1 %v5754_v47  ;;  %v874_v41 = vshrl.u32 %v6390_v3, 16  ;;  %v863_v47 = vsel %vm846_vm4, %v854_v32, %v862_v34  ;;  %v5768_v3 = vld [vmem:[%s7309_s1 + $0x148] sm:$0xff]   ;;  %v872_v62 = vsel %vm846_vm4, %v862_v34, %v871_v46  ;;  %v2780_v34 = vshrl.u32 %v6640_v27, 16 }
  0xac   :  { %4792 = vmatprep.mubr.msk.bf16.mxu0 %vm5850_vm0, %v5849_v0  ;;  %5116 = vmatprep.mubr.msk.bf16.mxu1 %vm5850_vm0, %v5849_v0  ;;  %v2759_v53 = vor.u32 %v2758_v40, %v2755_v33  ;;  %v5776_v32 = vld [vmem:[%s7309_s1 + $0x168] sm:$0xff]   ;;  %v2785_v40 = vrot.slane %v2783_v35, 2 }
  0xad   :  { %4810 = vmatprep.subr.bf16.mxu0 %v5849_v0  ;;  %5134 = vmatprep.subr.bf16.mxu1 %v5849_v0  ;;  %v2782_v33 = vrot.slane %v2780_v34, 1  ;;  %v6908_v34 = vld [vmem:[%s7310_s0 + $0x4c] sm:$0xff]  }
  0xae   :  { %v2760_v63 = vsel %vm846_vm4, %v2750_v37, %v2759_v53  ;;  %v5807_v35 = vld [vmem:[%s7309_s1 + $0x1c8] sm:$0xff]  }
  0xaf   :  { %4811 = vmatpush3.bf16.msra.mxu0 %v5757_v48  ;;  %5135 = vmatpush3.bf16.msra.mxu1 %v5758_v52  ;;  %v2765_v48 = vshll.u32 %v6403_v8, 16  ;;  %v5767_v52 = vld [vmem:[%s7309_s1 + $0x148] sm:$0xff]   ;;  %v5769_v8 = vld [vmem:[%s7309_s1 + $0x150] sm:$0xff]  }
  0xb0   :  { %4812 = vmatprep.subr.bf16.mxu0 %v5849_v0  ;;  %5136 = vmatprep.subr.bf16.mxu1 %v5849_v0 }
  0xb1   :  { %v2767_v58 = vrot.slane %v2765_v48, 2  ;;  %v5782_v48 = vld [vmem:[%s7309_s1 + $0x178] sm:$0xff]  }
  0xb2   :  { %4793 = vmatmul.mubr.bf16.gmra.mrb[12].mxu0 %v686_v54  ;;  %5117 = vmatmul.mubr.bf16.gmra.mrb[12].mxu1 %v2576_v55  ;;  %v5770_v54 = vld [vmem:[%s7309_s1 + $0x150] sm:$0xff]   ;;  %v876_v55 = vrot.slane %v874_v41, 1 }
  0xb3   :  { %4796 = vmatprep.mubr.msk.bf16.mxu0 %vm5850_vm0, %v5849_v0  ;;  %4813 = vmatpush3.bf16.msra.mxu0 %v5759_v56  ;;  %v879_v56 = vrot.slane %v877_v43, 2  ;;  %v5778_v41 = vld [vmem:[%s7309_s1 + $0x170] sm:$0xff]  }
  0xb4   :  { %5120 = vmatprep.mubr.msk.bf16.mxu1 %vm5850_vm0, %v5849_v0  ;;  %5137 = vmatpush3.bf16.msra.mxu1 %v5760_v57  ;;  %v2764_v57 = vrot.slane %v2762_v44, 1  ;;  %v5781_v44 = vld [vmem:[%s7309_s1 + $0x178] sm:$0xff]  }
  0xb5   :  { %4814 = vmatprep.subr.bf16.mxu0 %v5849_v0  ;;  %5138 = vmatprep.subr.bf16.mxu1 %v5849_v0  ;;  %v880_v6 = vor.u32 %v879_v56, %v876_v55  ;;  %v5785_v55 = vld [vmem:[%s7309_s1 + $0x180] sm:$0xff]  }
  0xb6   :  { %v5786_v56 = vld [vmem:[%s7309_s1 + $0x180] sm:$0xff]  }
  0xb7   :  { %4815 = vmatpush3.bf16.msra.mxu0 %v5763_v15  ;;  %v2768_v15 = vor.u32 %v2767_v58, %v2764_v57  ;;  %v5787_v57 = vld [vmem:[%s7309_s1 + $0x188] sm:$0xff]  }
  0xb8   :  { %5139 = vmatpush3.bf16.msra.mxu1 %v5764_v18  ;;  %4836 = vmatprep.subr.bf16.mxu0 %v5849_v0  ;;  %v881_v18 = vsel %vm846_vm4, %v871_v46, %v880_v6  ;;  %v6688_v46 = vld [vmem:[%s7310_s0 + $0x10] sm:$0xff]   ;;  %v5788_v58 = vld [vmem:[%s7309_s1 + $0x188] sm:$0xff]  }
  0xb9   :  { %5160 = vmatprep.subr.bf16.mxu1 %v5849_v0  ;;  %v2769_v1 = vsel %vm846_vm4, %v2759_v53, %v2768_v15  ;;  %v1642_v53 = vrot.slane %v6688_v46, 3 }
  0xba   :  { %4797 = vmatmul.mubr.bf16.gmra.mrb[16].mxu0 %v688_v11  ;;  %5121 = vmatmul.mubr.bf16.gmra.mrb[16].mxu1 %v2578_v26  ;;  %v888_v11 = vrot.slane %v886_v10, 2  ;;  %v2773_v26 = vrot.slane %v2771_v42, 1  ;;  %v5799_v10 = vld [vmem:[%s7309_s1 + $0x1b8] sm:$0xff]   ;;  %v5851_v42 = vmov 0  }
  0xbb   :  { %4816 = vmatprep.mubr.msk.bf16.mxu0 %vm5850_vm0, %v5849_v0  ;;  %5140 = vmatprep.mubr.msk.bf16.mxu1 %vm5850_vm0, %v5849_v0  ;;  %19 = vst [vmem:[%s7311_s4] sm:$0xf] %v5851_v42  ;;  %20 = vst [vmem:[%s7311_s4 + $0x4] sm:$0xf] %v5851_v42 }
  0xbc   :  { %v889_v28 = vor.u32 %v888_v11, %v885_v22  ;;  %v2777_v31 = vor.u32 %v2776_v50, %v2773_v26  ;;  %21 = vst [vmem:[%s7311_s4 + $0x30] sm:$0xf] %v5851_v42  ;;  %22 = vst [vmem:[%s7311_s4 + $0x34] sm:$0xf] %v5851_v42  ;;  %v6843_v22 = vld [vmem:[%s7312_s3] sm:$0xff]  ;;  %5648 = vset.pattern.permute.xlu1 %v5851_v42  ;;  %v1068_v11 = vsel %vm1057_vm3, %v1065_v20, %v1067_v9  ;;  %v6875_v20 = vld [vmem:[%s7312_s3 + $0x8] sm:$0xff] }
  0xbd   :  { %4042 = vst [vmem:[%s7311_s4 + $0x38] sm:$0xf] %v5851_v42  ;;  %4043 = vst [vmem:[%s7311_s4 + $0x3c] sm:$0xf] %v5851_v42  ;;  %5647 = vset.pattern.permute.xlu0 %v5851_v42  ;;  %1820 = vperm.xlu1 %5648, %v6829_v2   ;;  %v1262_v26 = vrot.slane %v6688_v46, 2 }
  0xbe   :  { %v890_v37 = vsel %vm846_vm4, %v880_v6, %v889_v28  ;;  %v2778_v39 = vsel %vm846_vm4, %v2768_v15, %v2777_v31  ;;  %v5795_v6 = vld [vmem:[%s7309_s1 + $0x1a8] sm:$0xff]   ;;  %v5800_v15 = vld [vmem:[%s7309_s1 + $0x1b8] sm:$0xff]   ;;  %4044 = vst [vmem:[%s7311_s4 + $0x68] sm:$0xf] %v5851_v42  ;;  %4045 = vst [vmem:[%s7311_s4 + $0x6c] sm:$0xf] %v5851_v42  ;;  %1810 = vperm.xlu0 %5647, %v6843_v22  }
  0xbf   :  { %v5826_v9 = vld [vmem:[%s7310_s0 + $0x64] ss:$0 sps:$4 sm:$0x33]  }
  0xc1   :  { %1825 = vperm.xlu1 %5648, %v6869_v36  }
  0xc2   :  { %4817 = vmatmul.mubr.bf16.vlgmr.msra.gmra.mrb[0].mxu0 %v863_v47  ;;  %5141 = vmatmul.mubr.bf16.vlgmr.msra.gmra.mrb[0].mxu1 %v2751_v51  ;;  %v2786_v47 = vor.u32 %v2785_v40, %v2782_v33  ;;  %v5811_v40 = vld [vmem:[%s7309_s1 + $0x1d0] sm:$0xff]  }
  0xc3   :  { %4837 = vmatpush3.bf16.msra.mxu0 %v5765_v59  ;;  %5161 = vmatpush3.bf16.msra.mxu1 %v5766_v60  ;;  %v894_v59 = vrot.slane %v892_v29, 1  ;;  %v5777_v60 = vld [vmem:[%s7309_s1 + $0x170] sm:$0xff]  }
  0xc4   :  { %4838 = vmatprep.subr.bf16.mxu0 %v5849_v0  ;;  %5162 = vmatprep.subr.bf16.mxu1 %v5849_v0 }
  0xc5   :  { %4820 = vmatprep.mubr.msk.bf16.mxu0 %vm5850_vm0, %v5849_v0  ;;  %5144 = vmatprep.mubr.msk.bf16.mxu1 %vm5850_vm0, %v5849_v0  ;;  %v898_v43 = vor.u32 %v897_v30, %v894_v59  ;;  %v6919_v59 = vld [vmem:[%s7312_s3 + $0x38] sm:$0xff]  ;;  %v5808_v30 = vld [vmem:[%s7309_s1 + $0x1c8] sm:$0xff]  }
  0xc6   :  { %1815 = vperm.xlu0 %5647, %v6875_v20  }
  0xc7   :  { %4839 = vmatpush3.bf16.msra.mxu0 %v5767_v52  ;;  %5163 = vmatpush3.bf16.msra.mxu1 %v5768_v3  ;;  %v899_v51 = vsel %vm846_vm4, %v889_v28, %v898_v43  ;;  %v2787_v52 = vsel %vm846_vm4, %v2777_v31, %v2786_v47  ;;  %v6693_v3 = vld [vmem:[%s7310_s0 + $0x18] sm:$0xff]   ;;  %v6890_v28 = vld [vmem:[%s7312_s3 + $0x28] sm:$0xff] }
  0xc8   :  { %4840 = vmatprep.subr.bf16.mxu0 %v5849_v0  ;;  %5164 = vmatprep.subr.bf16.mxu1 %v5849_v0  ;;  %v6950_v43 = vld [vmem:[%s7312_s3 + $0x48] sm:$0xff] }
  0xc9   :  { %1835 = vperm.xlu1 %5648, %v6890_v28  }
  0xca   :  { %4821 = vmatmul.mubr.bf16.gmra.mrb[4].mxu0 %v872_v62  ;;  %5145 = vmatmul.mubr.bf16.gmra.mrb[4].mxu1 %v2760_v63  ;;  %v5791_v62 = vld [vmem:[%s7309_s1 + $0x198] sm:$0xff]  }
  0xcb   :  { %4841 = vmatpush3.bf16.msra.mxu0 %v5769_v8  ;;  %5165 = vmatpush3.bf16.msra.mxu1 %v5770_v54  ;;  %v1644_v8 = vrot.slane %v6693_v3, 3  ;;  %v5792_v63 = vld [vmem:[%s7309_s1 + $0x198] sm:$0xff]  }
  0xcc   :  { %4824 = vmatprep.mubr.msk.bf16.mxu0 %vm5850_vm0, %v5849_v0  ;;  %4842 = vmatprep.subr.bf16.mxu0 %v5849_v0 }
  0xcd   :  { %5148 = vmatprep.mubr.msk.bf16.mxu1 %vm5850_vm0, %v5849_v0  ;;  %5166 = vmatprep.subr.bf16.mxu1 %v5849_v0  ;;  %v6706_v54 = vsel %vm1640_vm5, %v1642_v53, %v1644_v8 }
  0xce   :  { %1845 = vperm.xlu1 %5648, %v6919_v59  }
  0xcf   :  { %4843 = vmatpush3.bf16.msra.mxu0 %v5771_v7  ;;  %5167 = vmatpush3.bf16.msra.mxu1 %v5772_v16  ;;  %v5796_v7 = vld [vmem:[%s7309_s1 + $0x1a8] sm:$0xff]  }
  0xd0   :  { %4844 = vmatprep.subr.bf16.mxu0 %v5849_v0  ;;  %5168 = vmatprep.subr.bf16.mxu1 %v5849_v0  ;;  %v6800_v16 = vld [vmem:[%s7310_s0 + $0xc] sm:$0xf] }
  0xd2   :  { %4825 = vmatmul.mubr.bf16.gmra.mrb[8].mxu0 %v881_v18  ;;  %5149 = vmatmul.mubr.bf16.gmra.mrb[8].mxu1 %v2769_v1  ;;  %v4229_v18 = vld [vmem:[%s7310_s0 + $0x3c] sm:$0xc] }
  0xd3   :  { %4845 = vmatpush3.bf16.msra.mxu0 %v5773_v45  ;;  %5169 = vmatpush3.bf16.msra.mxu1 %v5774_v25  ;;  %v6838_v45 = vld [vmem:[%s7310_s0 + $0x40] sm:$0xf] }
  0xd4   :  { %4828 = vmatprep.mubr.msk.bf16.mxu0 %vm5850_vm0, %v5849_v0  ;;  %5152 = vmatprep.mubr.msk.bf16.mxu1 %vm5850_vm0, %v5849_v0  ;;  %v6857_v25 = vcombine.low %v4229_v18, %v6838_v45  ;;  %v3155_v18 = vrot.slane %v5826_v9, 2 }
  0xd5   :  { %4846 = vmatprep.subr.bf16.mxu0 %v5849_v0  ;;  %5170 = vmatprep.subr.bf16.mxu1 %v5849_v0 }
  0xd6   :  { %v3146_v50 = vrot.slane %v6857_v25, 2  ;;  %1855 = vperm.xlu1 %5648, %v6950_v43  }
  0xd7   :  { %4847 = vmatpush3.bf16.msra.mxu0 %v5775_v13  ;;  %5171 = vmatpush3.bf16.msra.mxu1 %v5776_v32  ;;  %v6895_v13 = vld [vmem:[%s7312_s3 + $0x20] sm:$0xff] }
  0xd8   :  { %4848 = vmatprep.subr.bf16.mxu0 %v5849_v0  ;;  %5172 = vmatprep.subr.bf16.mxu1 %v5849_v0  ;;  %v5806_v32 = vld [vmem:[%s7309_s1 + $0x1c0] sm:$0xff]  }
  0xd9   :  { %1830 = vperm.xlu0 %5647, %v6895_v13  }
  0xda   :  { %4829 = vmatmul.mubr.bf16.gmra.mrb[12].mxu0 %v890_v37  ;;  %5153 = vmatmul.mubr.bf16.gmra.mrb[12].mxu1 %v2778_v39  ;;  %v1264_v37 = vrot.slane %v6693_v3, 2  ;;  %v3149_v39 = vrot.slane %v6908_v34, 2 }
  0xdb   :  { %4832 = vmatprep.mubr.msk.bf16.mxu0 %vm5850_vm0, %v5849_v0  ;;  %4849 = vmatpush3.bf16.msra.mxu0 %v5777_v60  ;;  %v6929_v60 = vld [vmem:[%s7312_s3 + $0x30] sm:$0xff] }
  0xdc   :  { %5156 = vmatprep.mubr.msk.bf16.mxu1 %vm5850_vm0, %v5849_v0  ;;  %5173 = vmatpush3.bf16.msra.mxu1 %v5778_v41  ;;  %v1265_v33 = vsel %vm1057_vm3, %v1262_v26, %v1264_v37  ;;  %v6944_v41 = vld [vmem:[%s7310_s0 + $0x20] sm:$0xff]  }
  0xdd   :  { %4850 = vmatprep.subr.bf16.mxu0 %v5849_v0  ;;  %5174 = vmatprep.subr.bf16.mxu1 %v5849_v0 }
  0xde   :  { %1840 = vperm.xlu0 %5647, %v6929_v60   ;;  %3696 = vperm.xlu1 %5648, %v6875_v20   ;;  %v3314_v20 = vshrl.u32 %v6857_v25, 16 }
  0xdf   :  { %4851 = vmatpush3.bf16.msra.mxu0 %v5781_v44  ;;  %v5812_v44 = vld [vmem:[%s7309_s1 + $0x1d0] sm:$0xff]  }
  0xe0   :  { %5175 = vmatpush3.bf16.msra.mxu1 %v5782_v48  ;;  %4872 = vmatprep.subr.bf16.mxu0 %v5849_v0  ;;  %v6960_v48 = vld [vmem:[%s7310_s0 + $0x54] sm:$0xff]  }
  0xe1   :  { %5196 = vmatprep.subr.bf16.mxu1 %v5849_v0  ;;  %v3343_v9 = vshll.u32 %v6960_v48, 16 }
  0xe2   :  { %4833 = vmatmul.mubr.bf16.gmra.mrb[16].mxu0 %v899_v51  ;;  %5157 = vmatmul.mubr.bf16.gmra.mrb[16].mxu1 %v2787_v52  ;;  %v1266_v51 = vrot.slane %v6944_v41, 2  ;;  %v5814_v52 = vld [vmem:[%s7309_s1 + $0x1d8] sm:$0xff]  }
  0xe3   :  { %4852 = vmatprep.mubr.msk.bf16.mxu0 %vm5850_vm0, %v5849_v0  ;;  %5176 = vmatprep.mubr.msk.bf16.mxu1 %vm5850_vm0, %v5849_v0 }
  0xe4   :  { %3706 = vperm.xlu1 %5648, %v6869_v36   ;;  %v5827_v36 = vld [vmem:[%s7309_s1 + $0x1f8] sm:$0xff]  }
  0xe8   :  { %3716 = vperm.xlu1 %5648, %v6890_v28  }
  0xea   :  { %4853 = vmatmul.mubr.bf16.vlgmr.msra.gmra.mrb[0].mxu0 %v6393_v4  ;;  %5177 = vmatmul.mubr.bf16.vlgmr.msra.gmra.mrb[0].mxu1 %v6396_v5  ;;  %v5789_v4 = vld [vmem:[%s7309_s1 + $0x190] sm:$0xff]  }
  0xeb   :  { %4873 = vmatpush3.bf16.msra.mxu0 %v5785_v55  ;;  %5197 = vmatpush3.bf16.msra.mxu1 %v5786_v56  ;;  %v5790_v5 = vld [vmem:[%s7309_s1 + $0x190] sm:$0xff]   ;;  %v6971_v55 = vld [vmem:[%s7312_s3 + $0x40] sm:$0xff]  ;;  %v3151_v56 = vrot.slane %v6960_v48, 2 }
  0xec   :  { %4874 = vmatprep.subr.bf16.mxu0 %v5849_v0  ;;  %5198 = vmatprep.subr.bf16.mxu1 %v5849_v0 }
  0xed   :  { %4856 = vmatprep.mubr.msk.bf16.mxu0 %vm5850_vm0, %v5849_v0  ;;  %5180 = vmatprep.mubr.msk.bf16.mxu1 %vm5850_vm0, %v5849_v0 }
  0xee   :  { %1850 = vperm.xlu0 %5647, %v6971_v55   ;;  %3726 = vperm.xlu1 %5648, %v6919_v59   ;;  %v1448_v59 = vshrl.u32 %v6693_v3, 16 }
  0xef   :  { %4875 = vmatpush3.bf16.msra.mxu0 %v5787_v57  ;;  %5199 = vmatpush3.bf16.msra.mxu1 %v5788_v58  ;;  %v5816_v57 = vld [vmem:[%s7309_s1 + $0x1d8] sm:$0xff]   ;;  %v1267_v58 = vsel %vm1057_vm3, %v1264_v37, %v1266_v51 }
  0xf0   :  { %4876 = vmatprep.subr.bf16.mxu0 %v5849_v0  ;;  %5200 = vmatprep.subr.bf16.mxu1 %v5849_v0 }
  0xf2   :  { %4857 = vmatmul.mubr.bf16.gmra.mrb[4].mxu0 %v6415_v14  ;;  %5181 = vmatmul.mubr.bf16.gmra.mrb[4].mxu1 %v6425_v38  ;;  %v5793_v14 = vld [vmem:[%s7309_s1 + $0x1a0] sm:$0xff]  }
  0xf3   :  { %4877 = vmatpush3.bf16.msra.mxu0 %v5789_v4  ;;  %5201 = vmatpush3.bf16.msra.mxu1 %v5790_v5  ;;  %v5794_v38 = vld [vmem:[%s7309_s1 + $0x1a0] sm:$0xff]   ;;  %v6991_v5 = vld [vmem:[%s7310_s0 + $0x28] sm:$0xff]  }
  0xf4   :  { %4860 = vmatprep.mubr.msk.bf16.mxu0 %vm5850_vm0, %v5849_v0  ;;  %4878 = vmatprep.subr.bf16.mxu0 %v5849_v0  ;;  %v5817_v4 = vld [vmem:[%s7309_s1 + $0x1e0] sm:$0xff]  }
  0xf5   :  { %5184 = vmatprep.mubr.msk.bf16.mxu1 %vm5850_vm0, %v5849_v0  ;;  %5202 = vmatprep.subr.bf16.mxu1 %v5849_v0 }
  0xf6   :  { %3691 = vperm.xlu0 %5647, %v6843_v22   ;;  %3736 = vperm.xlu1 %5648, %v6950_v43  }
  0xf7   :  { %4879 = vmatpush3.bf16.msra.mxu0 %v5791_v62  ;;  %5203 = vmatpush3.bf16.msra.mxu1 %v5792_v63  ;;  %v3152_v62 = vsel %vm1057_vm3, %v3149_v39, %v3151_v56  ;;  %v5818_v63 = vld [vmem:[%s7309_s1 + $0x1e0] sm:$0xff]  }
  0xf8   :  { %4880 = vmatprep.subr.bf16.mxu0 %v5849_v0  ;;  %5204 = vmatprep.subr.bf16.mxu1 %v5849_v0 }
  0xfa   :  { %4861 = vmatmul.mubr.bf16.gmra.mrb[8].mxu0 %v6431_v19  ;;  %5185 = vmatmul.mubr.bf16.gmra.mrb[8].mxu1 %v6438_v49  ;;  %v5797_v19 = vld [vmem:[%s7309_s1 + $0x1b0] sm:$0xff]  }
  0xfb   :  { %4881 = vmatpush3.bf16.msra.mxu0 %v5793_v14  ;;  %5205 = vmatpush3.bf16.msra.mxu1 %v5794_v38  ;;  %v5798_v49 = vld [vmem:[%s7309_s1 + $0x1b0] sm:$0xff]   ;;  %v7002_v14 = vld [vmem:[%s7310_s0 + $0x5c] sm:$0xff]   ;;  %v1268_v38 = vrot.slane %v6991_v5, 2 }
  0xfc   :  { %4864 = vmatprep.mubr.msk.bf16.mxu0 %vm5850_vm0, %v5849_v0  ;;  %5188 = vmatprep.mubr.msk.bf16.mxu1 %vm5850_vm0, %v5849_v0 }
  0xfd   :  { %4882 = vmatprep.subr.bf16.mxu0 %v5849_v0  ;;  %5206 = vmatprep.subr.bf16.mxu1 %v5849_v0 }
  0xfe   :  { %3701 = vperm.xlu0 %5647, %v6829_v2  }
  0xff   :  { %4883 = vmatpush3.bf16.msra.mxu0 %v5795_v6  ;;  %5207 = vmatpush3.bf16.msra.mxu1 %v5796_v7  ;;  %v5821_v6 = vld [vmem:[%s7309_s1 + $0x1e8] sm:$0xff]   ;;  %v3153_v7 = vrot.slane %v7002_v14, 2 }
 0x100   :  { %4884 = vmatprep.subr.bf16.mxu0 %v5849_v0  ;;  %5208 = vmatprep.subr.bf16.mxu1 %v5849_v0 }
 0x101   :  { %v3156_v28 = vsel %vm1057_vm3, %v3153_v7, %v3155_v18  ;;  %v5834_v18 = vld [vmem:[%s7309_s1 + $0x210] sm:$0xff]  }
 0x102   :  { %4865 = vmatmul.mubr.bf16.gmra.mrb[12].mxu0 %v6448_v23  ;;  %5189 = vmatmul.mubr.bf16.gmra.mrb[12].mxu1 %v6453_v24  ;;  %v2953_v23 = vrot.slane %v6640_v27, 2  ;;  %v1205_v24 = vld [vmem:[%s7310_s0 + $0x8] sm:$0xc]  ;;  %v3147_v27 = vrot.slane %v6862_v12, 2 }
 0x103   :  { %4868 = vmatprep.mubr.msk.bf16.mxu0 %vm5850_vm0, %v5849_v0  ;;  %4885 = vmatpush3.bf16.msra.mxu0 %v5797_v19  ;;  %v6850_v61 = vcombine.low %v1205_v24, %v6800_v16  ;;  %v5822_v19 = vld [vmem:[%s7309_s1 + $0x1e8] sm:$0xff]   ;;  %v5824_v24 = vld [vmem:[%s7309_s1 + $0x1f0] sm:$0xff]  }
 0x104   :  { %5192 = vmatprep.mubr.msk.bf16.mxu1 %vm5850_vm0, %v5849_v0  ;;  %5209 = vmatpush3.bf16.msra.mxu1 %v5798_v49  ;;  %v2954_v1 = vsel %vm1057_vm3, %v2951_v21, %v2953_v23  ;;  %v3148_v31 = vsel %vm1057_vm3, %v3146_v50, %v3147_v27  ;;  %v3150_v47 = vsel %vm1057_vm3, %v3147_v27, %v3149_v39  ;;  %v5825_v49 = vld [vmem:[%s7310_s0 + $0x30] ss:$0 sps:$4 sm:$0x33]   ;;  %v5828_v50 = vld [vmem:[%s7309_s1 + $0x1f8] sm:$0xff]  }
 0x105   :  { %4886 = vmatprep.subr.bf16.mxu0 %v5849_v0  ;;  %5210 = vmatprep.subr.bf16.mxu1 %v5849_v0  ;;  %v1261_v21 = vrot.slane %v6850_v61, 2  ;;  %v5823_v23 = vld [vmem:[%s7309_s1 + $0x1f0] sm:$0xff]   ;;  %v1270_v42 = vrot.slane %v5825_v49, 2  ;;  %v1431_v2 = vshrl.u32 %v6850_v61, 16  ;;  %v1434_v22 = vshll.u32 %v6850_v61, 16 }
 0x106   :  { %v3325_v61 = vshll.u32 %v6862_v12, 16  ;;  %3711 = vperm.xlu0 %5647, %v6895_v13   ;;  %v3340_v49 = vshrl.u32 %v6960_v48, 16 }
 0x107   :  { %4887 = vmatpush3.bf16.msra.mxu0 %v5799_v10  ;;  %v1263_v29 = vsel %vm1057_vm3, %v1261_v21, %v1262_v26  ;;  %v1269_v10 = vsel %vm1057_vm3, %v1266_v51, %v1268_v38  ;;  %v3317_v21 = vshll.u32 %v6857_v25, 16  ;;  %v3322_v26 = vshrl.u32 %v6862_v12, 16 }
 0x108   :  { %5211 = vmatpush3.bf16.msra.mxu1 %v5800_v15  ;;  %4908 = vmatprep.subr.bf16.mxu0 %v5849_v0  ;;  %v3154_v15 = vsel %vm1057_vm3, %v3151_v56, %v3153_v7  ;;  %v1271_v27 = vsel %vm1057_vm3, %v1268_v38, %v1270_v42  ;;  %v1433_v25 = vrot.slane %v1431_v2, 2  ;;  %v3334_v51 = vshll.u32 %v6908_v34, 16  ;;  %v5829_v56 = vld [vmem:[%s7309_s1 + $0x200] sm:$0xff]  }
 0x109   :  { %5232 = vmatprep.subr.bf16.mxu1 %v5849_v0  ;;  %v3324_v37 = vrot.slane %v3322_v26, 2  ;;  %v1460_v7 = vshll.u32 %v6944_v41, 16  ;;  %v3342_v2 = vrot.slane %v3340_v49, 2  ;;  %v5836_v26 = vld [vmem:[%s7309_s1 + $0x218] sm:$0xff]  }
 0x10a   :  { %4869 = vmatmul.mubr.bf16.gmra.mrb[16].mxu0 %v1068_v11  ;;  %5193 = vmatmul.mubr.bf16.gmra.mrb[16].mxu1 %v2954_v1  ;;  %v1439_v11 = vshrl.u32 %v6688_v46, 16  ;;  %v1442_v1 = vshll.u32 %v6688_v46, 16  ;;  %v3336_v38 = vrot.slane %v3334_v51, 3  ;;  %v1646_v46 = vrot.slane %v6944_v41, 3 }
 0x10b   :  { %4888 = vmatprep.mubr.msk.bf16.mxu0 %vm5850_vm0, %v5849_v0  ;;  %5212 = vmatprep.mubr.msk.bf16.mxu1 %vm5850_vm0, %v5849_v0 }
 0x10c   :  { %3721 = vperm.xlu0 %5647, %v6929_v60   ;;  %v5831_v60 = vld [vmem:[%s7309_s1 + $0x208] sm:$0xff]  }
 0x110   :  { %3731 = vperm.xlu0 %5647, %v6971_v55  }
 0x112   :  { %4889 = vmatmul.mubr.bf16.vlgmr.msra.gmra.mrb[0].mxu0 %v1263_v29  ;;  %5213 = vmatmul.mubr.bf16.vlgmr.msra.gmra.mrb[0].mxu1 %v3148_v31  ;;  %v1436_v29 = vrot.slane %v1434_v22, 3  ;;  %v1444_v31 = vrot.slane %v1442_v1, 3  ;;  %v3345_v22 = vrot.slane %v3343_v9, 3  ;;  %v5835_v1 = vld [vmem:[%s7309_s1 + $0x218] sm:$0xff]  }
 0x113   :  { %4909 = vmatpush3.bf16.msra.mxu0 %v5805_v17  ;;  %5233 = vmatpush3.bf16.msra.mxu1 %v5806_v32  ;;  %v1441_v17 = vrot.slane %v1439_v11, 2  ;;  %v3316_v32 = vrot.slane %v3314_v20, 2  ;;  %v1469_v20 = vshll.u32 %v6991_v5, 16 }
 0x114   :  { %4910 = vmatprep.subr.bf16.mxu0 %v5849_v0  ;;  %5234 = vmatprep.subr.bf16.mxu1 %v5849_v0  ;;  %v1437_v13 = vor.u32 %v1436_v29, %v1433_v25 }
 0x115   :  { %4892 = vmatprep.mubr.msk.bf16.mxu0 %vm5850_vm0, %v5849_v0  ;;  %5216 = vmatprep.mubr.msk.bf16.mxu1 %vm5850_vm0, %v5849_v0  ;;  %v1445_v39 = vor.u32 %v1444_v31, %v1441_v17  ;;  %v1471_v29 = vrot.slane %v1469_v20, 3  ;;  %v7133_v17 = vld [vmem:[%s7310_s0 + $0x30] ss:$0 sps:$4 sm:$0x77]  }
 0x117   :  { %4911 = vmatpush3.bf16.msra.mxu0 %v5807_v35  ;;  %5235 = vmatpush3.bf16.msra.mxu1 %v5808_v30  ;;  %v3319_v35 = vrot.slane %v3317_v21, 3  ;;  %v3327_v30 = vrot.slane %v3325_v61, 3  ;;  %v3346_v21 = vor.u32 %v3345_v22, %v3342_v2  ;;  %v3349_v61 = vshrl.u32 %v7002_v14, 16 }
 0x118   :  { %4912 = vmatprep.subr.bf16.mxu0 %v5849_v0  ;;  %5236 = vmatprep.subr.bf16.mxu1 %v5849_v0 }
 0x11a   :  { %4893 = vmatmul.mubr.bf16.gmra.mrb[4].mxu0 %v1265_v33  ;;  %5217 = vmatmul.mubr.bf16.gmra.mrb[4].mxu1 %v3150_v47  ;;  %v1451_v33 = vshll.u32 %v6693_v3, 16  ;;  %v3328_v47 = vor.u32 %v3327_v30, %v3324_v37  ;;  %v7143_v30 = vld [vmem:[%s7310_s0 + $0x64] ss:$0 sps:$4 sm:$0x77]  }
 0x11b   :  { %4913 = vmatpush3.bf16.msra.mxu0 %v5811_v40  ;;  %5237 = vmatpush3.bf16.msra.mxu1 %v5812_v44  ;;  %v3320_v40 = vor.u32 %v3319_v35, %v3316_v32  ;;  %v3331_v44 = vshrl.u32 %v6908_v34, 16  ;;  %v5838_v32 = vld [vmem:[%s7309_s1 + $0x220] sm:$0xff]   ;;  %v3351_v35 = vrot.slane %v3349_v61, 2  ;;  %v3361_v51 = vshll.u32 %v7143_v30, 16 }
 0x11c   :  { %4896 = vmatprep.mubr.msk.bf16.mxu0 %vm5850_vm0, %v5849_v0  ;;  %4914 = vmatprep.subr.bf16.mxu0 %v5849_v0 }
 0x11d   :  { %5220 = vmatprep.mubr.msk.bf16.mxu1 %vm5850_vm0, %v5849_v0  ;;  %5238 = vmatprep.subr.bf16.mxu1 %v5849_v0 }
 0x11f   :  { %4915 = vmatpush3.bf16.msra.mxu0 %v5814_v52  ;;  %5239 = vmatpush3.bf16.msra.mxu1 %v5816_v57  ;;  %v1446_v52 = vsel %vm1429_vm6, %v1437_v13, %v1445_v39  ;;  %v1450_v57 = vrot.slane %v1448_v59, 2  ;;  %v1475_v59 = vshrl.u32 %v7133_v17, 16 }
 0x120   :  { %4916 = vmatprep.subr.bf16.mxu0 %v5849_v0  ;;  %5240 = vmatprep.subr.bf16.mxu1 %v5849_v0 }
 0x122   :  { %4897 = vmatmul.mubr.bf16.gmra.mrb[8].mxu0 %v1267_v58  ;;  %5221 = vmatmul.mubr.bf16.gmra.mrb[8].mxu1 %v3152_v62  ;;  %v1453_v58 = vrot.slane %v1451_v33, 3  ;;  %v5830_v62 = vld [vmem:[%s7309_s1 + $0x200] sm:$0xff]   ;;  %v1478_v33 = vshll.u32 %v7133_v17, 16 }
 0x123   :  { %4917 = vmatpush3.bf16.msra.mxu0 %v5817_v4  ;;  %5241 = vmatpush3.bf16.msra.mxu1 %v5818_v63  ;;  %v3329_v4 = vsel %vm1429_vm6, %v3320_v40, %v3328_v47  ;;  %v3333_v63 = vrot.slane %v3331_v44, 2  ;;  %v3358_v44 = vshrl.u32 %v7143_v30, 16 }
 0x124   :  { %4900 = vmatprep.mubr.msk.bf16.mxu0 %vm5850_vm0, %v5849_v0  ;;  %5224 = vmatprep.mubr.msk.bf16.mxu1 %vm5850_vm0, %v5849_v0  ;;  %v1454_v43 = vor.u32 %v1453_v58, %v1450_v57  ;;  %v1480_v57 = vrot.slane %v1478_v33, 3 }
 0x125   :  { %4918 = vmatprep.subr.bf16.mxu0 %v5849_v0  ;;  %5242 = vmatprep.subr.bf16.mxu1 %v5849_v0  ;;  %v3337_v55 = vor.u32 %v3336_v38, %v3333_v63  ;;  %v3363_v63 = vrot.slane %v3361_v51, 3  ;;  %v5842_v38 = vld [vmem:[%s7309_s1 + $0x230] sm:$0xff]  }
 0x127   :  { %4919 = vmatpush3.bf16.msra.mxu0 %v5821_v6  ;;  %5243 = vmatpush3.bf16.msra.mxu1 %v5822_v19  ;;  %v1457_v6 = vshrl.u32 %v6944_v41, 16  ;;  %v5832_v19 = vld [vmem:[%s7309_s1 + $0x208] sm:$0xff]   ;;  %v3338_v42 = vsel %vm1429_vm6, %v3328_v47, %v3337_v55  ;;  %v3347_v31 = vsel %vm1429_vm6, %v3337_v55, %v3346_v21  ;;  %v4296_v55 = vld [vmem:[%s7310_s0 + $0x3c] sm:$0x8]  ;;  %v3529_v41 = vrot.slane %v7002_v14, 3 }
 0x128   :  { %4920 = vmatprep.subr.bf16.mxu0 %v5849_v0  ;;  %5244 = vmatprep.subr.bf16.mxu1 %v5849_v0  ;;  %v5840_v47 = vld [vmem:[%s7309_s1 + $0x228] sm:$0xff]  }
 0x12a   :  { %4901 = vmatmul.mubr.bf16.gmra.mrb[12].mxu0 %v1269_v10  ;;  %5225 = vmatmul.mubr.bf16.gmra.mrb[12].mxu1 %v3154_v15  ;;  %v1455_v10 = vsel %vm1429_vm6, %v1445_v39, %v1454_v43  ;;  %v5833_v15 = vld [vmem:[%s7309_s1 + $0x210] sm:$0xff]   ;;  %v5839_v39 = vld [vmem:[%s7309_s1 + $0x228] sm:$0xff]  }
 0x12b   :  { %4904 = vmatprep.mubr.msk.bf16.mxu0 %vm5850_vm0, %v5849_v0  ;;  %4921 = vmatpush3.bf16.msra.mxu0 %v5823_v23  ;;  %v1459_v23 = vrot.slane %v1457_v6, 2  ;;  %v5845_v6 = vld [vmem:[%s7309_s1 + $0x238] sm:$0xff]  }
 0x12c   :  { %5228 = vmatprep.mubr.msk.bf16.mxu1 %vm5850_vm0, %v5849_v0  ;;  %5245 = vmatpush3.bf16.msra.mxu1 %v5824_v24  ;;  %v1462_v24 = vrot.slane %v1460_v7, 3  ;;  %v1619_v7 = vld [vmem:[%s7310_s0 + $0x8] sm:$0x8] }
 0x12d   :  { %4922 = vmatprep.subr.bf16.mxu0 %v5849_v0  ;;  %5246 = vmatprep.subr.bf16.mxu1 %v5849_v0  ;;  %v4023_v9 = vcombine.low %v1619_v7, %v6800_v16 }
 0x12e   :  { %v1463_v11 = vor.u32 %v1462_v24, %v1459_v23 }
 0x12f   :  { %4923 = vmatpush3.bf16.msra.mxu0 %v5827_v36  ;;  %v1466_v36 = vshrl.u32 %v6991_v5, 16  ;;  %v1641_v23 = vrot.slane %v4023_v9, 3 }
 0x130   :  { %5247 = vmatpush3.bf16.msra.mxu1 %v5828_v50  ;;  %4944 = vmatprep.subr.bf16.mxu0 %v5849_v0  ;;  %v3352_v50 = vshll.u32 %v7002_v14, 16 }
 0x131   :  { %5268 = vmatprep.subr.bf16.mxu1 %v5849_v0  ;;  %v1468_v25 = vrot.slane %v1466_v36, 2  ;;  %v1643_v16 = vsel %vm1640_vm5, %v1641_v23, %v1642_v53  ;;  %v3527_v53 = vrot.slane %v6960_v48, 3 }
 0x132   :  { %4905 = vmatmul.mubr.bf16.gmra.mrb[16].mxu0 %v1271_v27  ;;  %5229 = vmatmul.mubr.bf16.gmra.mrb[16].mxu1 %v3156_v28  ;;  %v1464_v27 = vsel %vm1429_vm6, %v1454_v43, %v1463_v11  ;;  %v5837_v28 = vld [vmem:[%s7309_s1 + $0x220] sm:$0xff]   ;;  %v3354_v37 = vrot.slane %v3352_v50, 3 }
 0x133   :  { %4924 = vmatprep.mubr.msk.bf16.mxu0 %vm5850_vm0, %v5849_v0  ;;  %5248 = vmatprep.mubr.msk.bf16.mxu1 %vm5850_vm0, %v5849_v0  ;;  %v1472_v13 = vor.u32 %v1471_v29, %v1468_v25  ;;  %v3530_v3 = vsel %vm1640_vm5, %v3527_v53, %v3529_v41 }
 0x134   :  { %v3355_v40 = vor.u32 %v3354_v37, %v3351_v35 }
 0x136   :  { %v3356_v58 = vsel %vm1429_vm6, %v3346_v21, %v3355_v40 }
 0x13a   :  { %4925 = vmatmul.mubr.bf16.vlgmr.msra.gmra.mrb[0].mxu0 %v1446_v52  ;;  %5249 = vmatmul.mubr.bf16.vlgmr.msra.gmra.mrb[0].mxu1 %v3329_v4  ;;  %v1473_v52 = vsel %vm1429_vm6, %v1463_v11, %v1472_v13  ;;  %v5841_v4 = vld [vmem:[%s7309_s1 + $0x230] sm:$0xff]  }
 0x13b   :  { %4945 = vmatpush3.bf16.msra.mxu0 %v5829_v56  ;;  %5269 = vmatpush3.bf16.msra.mxu1 %v5830_v62  ;;  %v1477_v56 = vrot.slane %v1475_v59, 2  ;;  %v3360_v62 = vrot.slane %v3358_v44, 2 }
 0x13c   :  { %4946 = vmatprep.subr.bf16.mxu0 %v5849_v0  ;;  %5270 = vmatprep.subr.bf16.mxu1 %v5849_v0  ;;  %v1821_v11 = vpop.permute.xlu1 %1820 }
 0x13d   :  { %4928 = vmatprep.mubr.msk.bf16.mxu0 %vm5850_vm0, %v5849_v0  ;;  %5252 = vmatprep.mubr.msk.bf16.mxu1 %vm5850_vm0, %v5849_v0  ;;  %v3364_v43 = vor.u32 %v3363_v63, %v3360_v62 }
 0x13f   :  { %4947 = vmatpush3.bf16.msra.mxu0 %v5831_v60  ;;  %5271 = vmatpush3.bf16.msra.mxu1 %v5832_v19  ;;  %v1481_v60 = vor.u32 %v1480_v57, %v1477_v56  ;;  %v5846_v19 = vld [vmem:[%s7309_s1 + $0x238] sm:$0xff]  }
 0x140   :  { %4948 = vmatprep.subr.bf16.mxu0 %v5849_v0  ;;  %5272 = vmatprep.subr.bf16.mxu1 %v5849_v0  ;;  %v1826_v36 = vpop.permute.xlu1 %1825 }
 0x141   :  { %v1482_v49 = vsel %vm1429_vm6, %v1472_v13, %v1481_v60 }
 0x142   :  { %4929 = vmatmul.mubr.bf16.gmra.mrb[4].mxu0 %v1455_v10  ;;  %5253 = vmatmul.mubr.bf16.gmra.mrb[4].mxu1 %v3338_v42  ;;  %v3365_v10 = vsel %vm1429_vm6, %v3355_v40, %v3364_v43  ;;  %v3523_v42 = vrot.slane %v6862_v12, 3  ;;  %v1647_v12 = vsel %vm1640_vm5, %v1644_v8, %v1646_v46  ;;  %v1650_v8 = vrot.slane %v7133_v17, 3 }
 0x143   :  { %4949 = vmatpush3.bf16.msra.mxu0 %v5833_v15  ;;  %5273 = vmatpush3.bf16.msra.mxu1 %v5834_v18  ;;  %v4313_v15 = vcombine.low %v4296_v55, %v6838_v45  ;;  %v3525_v45 = vrot.slane %v6908_v34, 3 }
 0x144   :  { %4932 = vmatprep.mubr.msk.bf16.mxu0 %vm5850_vm0, %v5849_v0  ;;  %4950 = vmatprep.subr.bf16.mxu0 %v5849_v0 }
 0x145   :  { %5256 = vmatprep.mubr.msk.bf16.mxu1 %vm5850_vm0, %v5849_v0  ;;  %5274 = vmatprep.subr.bf16.mxu1 %v5849_v0  ;;  %v3522_v24 = vrot.slane %v4313_v15, 3  ;;  %v3526_v2 = vsel %vm1640_vm5, %v3523_v42, %v3525_v45  ;;  %v3528_v34 = vsel %vm1640_vm5, %v3525_v45, %v3527_v53 }
 0x147   :  { %4951 = vmatpush3.bf16.msra.mxu0 %v5835_v1  ;;  %5275 = vmatpush3.bf16.msra.mxu1 %v5836_v26  ;;  %v3524_v18 = vsel %vm1640_vm5, %v3522_v24, %v3523_v42  ;;  %v1811_v1 = vpop.permute.xlu0 %1810 }
 0x148   :  { %4952 = vmatprep.subr.bf16.mxu0 %v5849_v0  ;;  %5276 = vmatprep.subr.bf16.mxu1 %v5849_v0  ;;  %v7236_v21 = vpop.permute.xlu1 %1835 }
 0x14a   :  { %4933 = vmatmul.mubr.bf16.gmra.mrb[8].mxu0 %v1464_v27  ;;  %5257 = vmatmul.mubr.bf16.gmra.mrb[8].mxu1 %v3347_v31 }
 0x14b   :  { %4953 = vmatpush3.bf16.msra.mxu0 %v5837_v28  ;;  %5277 = vmatpush3.bf16.msra.mxu1 %v5838_v32  ;;  %v1816_v20 = vpop.permute.xlu0 %1815 }
 0x14c   :  { %4936 = vmatprep.mubr.msk.bf16.mxu0 %vm5850_vm0, %v5849_v0  ;;  %5260 = vmatprep.mubr.msk.bf16.mxu1 %vm5850_vm0, %v5849_v0 }
 0x14d   :  { %4954 = vmatprep.subr.bf16.mxu0 %v5849_v0  ;;  %5278 = vmatprep.subr.bf16.mxu1 %v5849_v0  ;;  %v7240_v61 = vpop.permute.xlu1 %1845 }
 0x14f   :  { %4955 = vmatpush3.bf16.msra.mxu0 %v5839_v39  ;;  %5279 = vmatpush3.bf16.msra.mxu1 %v5840_v47 }
 0x150   :  { %4956 = vmatprep.subr.bf16.mxu0 %v5849_v0  ;;  %5280 = vmatprep.subr.bf16.mxu1 %v5849_v0 }
 0x152   :  { %4937 = vmatmul.mubr.bf16.gmra.mrb[12].mxu0 %v1473_v52  ;;  %5261 = vmatmul.mubr.bf16.gmra.mrb[12].mxu1 %v3356_v58 }
 0x153   :  { %4940 = vmatprep.mubr.msk.bf16.mxu0 %vm5850_vm0, %v5849_v0  ;;  %4957 = vmatpush3.bf16.msra.mxu0 %v5841_v4 }
 0x154   :  { %5264 = vmatprep.mubr.msk.bf16.mxu1 %vm5850_vm0, %v5849_v0  ;;  %5281 = vmatpush3.bf16.msra.mxu1 %v5842_v38 }
 0x155   :  { %4958 = vmatprep.subr.bf16.mxu0 %v5849_v0  ;;  %5282 = vmatprep.subr.bf16.mxu1 %v5849_v0  ;;  %v7249_v27 = vpop.permute.xlu1 %1855 }
 0x157   :  { %4959 = vmatpush3.bf16.msra.mxu0 %v5845_v6 }
 0x158   :  { %5283 = vmatpush3.bf16.msra.mxu1 %v5846_v19  ;;  %v7238_v26 = vpop.permute.xlu0 %1830 }
 0x15a   :  { %4941 = vmatmul.mubr.bf16.gmra.mrb[16].mxu0 %v1482_v49  ;;  %5265 = vmatmul.mubr.bf16.gmra.mrb[16].mxu1 %v3365_v10 }
 0x15b   :  { %4960 = vmatprep.mubr.msk.bf16.mxu0 %vm5850_vm0, %v5849_v0  ;;  %5284 = vmatprep.mubr.msk.bf16.mxu1 %vm5850_vm0, %v5849_v0 }
 0x15d   :  { %v7242_v50 = vpop.permute.xlu0 %1840  ;;  %v3697_v52 = vpop.permute.xlu1 %3696 }
 0x162   :  { %4961 = vmatmul.mubr.bf16.vlgmr.msra.gmra.mrb[0].mxu0 %v1643_v16  ;;  %5285 = vmatmul.mubr.bf16.vlgmr.msra.gmra.mrb[0].mxu1 %v3524_v18 }
 0x163   :  { %4964 = vmatprep.mubr.msk.bf16.mxu0 %vm5850_vm0, %v5849_v0  ;;  %5288 = vmatprep.mubr.msk.bf16.mxu1 %vm5850_vm0, %v5849_v0 }
 0x16a   :  { %4965 = vmatmul.mubr.bf16.gmra.mrb[4].mxu0 %v6706_v54  ;;  %5289 = vmatmul.mubr.bf16.gmra.mrb[4].mxu1 %v3526_v2  ;;  %v1648_v54 = vrot.slane %v6991_v5, 3  ;;  %v3531_v5 = vrot.slane %v7143_v30, 3  ;;  %v3707_v2 = vpop.permute.xlu1 %3706 }
 0x16b   :  { %4968 = vmatprep.mubr.msk.bf16.mxu0 %vm5850_vm0, %v5849_v0  ;;  %5292 = vmatprep.mubr.msk.bf16.mxu1 %vm5850_vm0, %v5849_v0 }
 0x16c   :  { %v1649_v48 = vsel %vm1640_vm5, %v1646_v46, %v1648_v54  ;;  %v1651_v22 = vsel %vm1640_vm5, %v1648_v54, %v1650_v8  ;;  %v3532_v14 = vsel %vm1640_vm5, %v3529_v41, %v3531_v5 }
 0x16d   :  { %v7251_v28 = vpop.permute.xlu0 %1850 }
 0x172   :  { %4969 = vmatmul.mubr.bf16.gmra.mrb[8].mxu0 %v1647_v12  ;;  %5293 = vmatmul.mubr.bf16.gmra.mrb[8].mxu1 %v3528_v34 }
 0x173   :  { %4972 = vmatprep.mubr.msk.bf16.mxu0 %vm5850_vm0, %v5849_v0  ;;  %5296 = vmatprep.mubr.msk.bf16.mxu1 %vm5850_vm0, %v5849_v0 }
 0x175   :  { %v3692_v56 = vpop.permute.xlu0 %3691 }
 0x17a   :  { %4973 = vmatmul.mubr.bf16.gmra.mrb[12].mxu0 %v1649_v48  ;;  %5297 = vmatmul.mubr.bf16.gmra.mrb[12].mxu1 %v3530_v3 }
 0x17b   :  { %4976 = vmatprep.mubr.msk.bf16.mxu0 %vm5850_vm0, %v5849_v0  ;;  %5300 = vmatprep.mubr.msk.bf16.mxu1 %vm5850_vm0, %v5849_v0  ;;  %v7247_v0 = vld [vmem:[%s7313_s2] ss:$0 sm:$0xff] }
 0x17d   :  { %v3702_v46 = vpop.permute.xlu0 %3701 }
 0x182   :  { %4977 = vmatmul.mubr.bf16.gmra.mrb[16].mxu0 %v1651_v22  ;;  %5301 = vmatmul.mubr.bf16.gmra.mrb[16].mxu1 %v3532_v14 }
 0x235   :  { %v1739_v25 = vpop.f32.mrb[0].mxu0  ;;  %v3620_v17 = vpop.f32.mrb[0].mxu1 }
 0x236   :  { %v5304_v29 = vadd.f32 %v7247_v0, %v1739_v25  ;;  %v4962_v31 = vpop.f32.mrb[1].mxu0  ;;  %v5314_v32 = vadd.f32 %v7247_v0, %v3620_v17  ;;  %v5286_v35 = vpop.f32.mrb[1].mxu1 }
 0x237   :  { %v1742_v37 = vpop.f32.mrb[2].mxu0  ;;  %v3623_v39 = vpop.f32.mrb[2].mxu1 }
 0x238   :  { %v1788_v30 = vmax.f32 %v5304_v29, 0.0  ;;  %v5305_v13 = vadd.f32 %v7247_v0, %v1742_v37  ;;  %v4963_v59 = vpop.f32.mrb[3].mxu0  ;;  %v3669_v33 = vmax.f32 %v5314_v32, 0.0  ;;  %v5315_v40 = vadd.f32 %v7247_v0, %v3623_v39  ;;  %v5287_v47 = vpop.f32.mrb[3].mxu1 }
 0x23a   :  { %v1789_v44 = vmax.f32 %v5305_v13, 0.0  ;;  %v3670_v51 = vmax.f32 %v5315_v40, 0.0  ;;  %v1858_v57 = vmul.f32 %v1811_v1, %v1788_v30  ;;  %v3739_v4 = vmul.f32 %v3692_v56, %v3669_v33  ;;  %v3717_v30 = vpop.permute.xlu1 %3716  ;;  %v3712_v13 = vpop.permute.xlu0 %3711 }
 0x23c   :  { %v1859_v58 = vmul.f32 %v1816_v20, %v1789_v44  ;;  %v3740_v62 = vmul.f32 %v3697_v52, %v3670_v51 }
 0x23d   :  { %v1747_v63 = vpop.f32.mrb[4].mxu0  ;;  %v3628_v43 = vpop.f32.mrb[4].mxu1 }
 0x23e   :  { %v4365_v38 = vpack.c.bf16 %v1859_v58, %v1858_v57  ;;  %v5306_v60 = vadd.f32 %v7247_v0, %v1747_v63  ;;  %v4966_v6 = vpop.f32.mrb[5].mxu0  ;;  %v4390_v7 = vpack.c.bf16 %v3740_v62, %v3739_v4  ;;  %v5316_v19 = vadd.f32 %v7247_v0, %v3628_v43  ;;  %v5290_v55 = vpop.f32.mrb[5].mxu1 }
 0x23f   :  { %v1750_v49 = vpop.f32.mrb[6].mxu0  ;;  %v3631_v15 = vpop.f32.mrb[6].mxu1 }
 0x240   :  { %4412 = vst [vmem:[%s7311_s4 + $0x8] sm:$0xff] %v4365_v38   ;;  %v1790_v9 = vmax.f32 %v5306_v60, 0.0  ;;  %v5307_v10 = vadd.f32 %v7247_v0, %v1750_v49  ;;  %v4967_v23 = vpop.f32.mrb[7].mxu0  ;;  %4417 = vst [vmem:[%s7311_s4 + $0x40] sm:$0xff] %v4390_v7   ;;  %v3671_v24 = vmax.f32 %v5316_v19, 0.0  ;;  %v5317_v42 = vadd.f32 %v7247_v0, %v3631_v15  ;;  %v5291_v16 = vpop.f32.mrb[7].mxu1 }
 0x241   :  { %v3727_v55 = vpop.permute.xlu1 %3726  ;;  %v3722_v49 = vpop.permute.xlu0 %3721 }
 0x242   :  { %v1791_v18 = vmax.f32 %v5307_v10, 0.0  ;;  %v3672_v45 = vmax.f32 %v5317_v42, 0.0  ;;  %v1860_v53 = vmul.f32 %v1821_v11, %v1790_v9  ;;  %v3741_v34 = vmul.f32 %v3702_v46, %v3671_v24 }
 0x244   :  { %v1861_v12 = vmul.f32 %v1826_v36, %v1791_v18  ;;  %v3742_v54 = vmul.f32 %v3707_v2, %v3672_v45 }
 0x245   :  { %v1755_v41 = vpop.f32.mrb[8].mxu0  ;;  %v3636_v8 = vpop.f32.mrb[8].mxu1 }
 0x246   :  { %v4370_v48 = vpack.c.bf16 %v1861_v12, %v1860_v53  ;;  %v5308_v3 = vadd.f32 %v7247_v0, %v1755_v41  ;;  %v4970_v5 = vpop.f32.mrb[9].mxu0  ;;  %v4395_v22 = vpack.c.bf16 %v3742_v54, %v3741_v34  ;;  %v5318_v14 = vadd.f32 %v7247_v0, %v3636_v8  ;;  %v5294_v1 = vpop.f32.mrb[9].mxu1 }
 0x247   :  { %v1758_v20 = vpop.f32.mrb[10].mxu0  ;;  %v3639_v36 = vpop.f32.mrb[10].mxu1 }
 0x248   :  { %4413 = vst [vmem:[%s7311_s4 + $0x10] sm:$0xff] %v4370_v48   ;;  %v1792_v25 = vmax.f32 %v5308_v3, 0.0  ;;  %v5309_v11 = vadd.f32 %v7247_v0, %v1758_v20  ;;  %v4971_v29 = vpop.f32.mrb[11].mxu0  ;;  %4418 = vst [vmem:[%s7311_s4 + $0x48] sm:$0xff] %v4395_v22   ;;  %v3673_v17 = vmax.f32 %v5318_v14, 0.0  ;;  %v5319_v31 = vadd.f32 %v7247_v0, %v3639_v36  ;;  %v5295_v32 = vpop.f32.mrb[11].mxu1 }
 0x249   :  { %v3737_v22 = vpop.permute.xlu1 %3736  ;;  %v3732_v14 = vpop.permute.xlu0 %3731 }
 0x24a   :  { %v1793_v35 = vmax.f32 %v5309_v11, 0.0  ;;  %v3674_v37 = vmax.f32 %v5319_v31, 0.0  ;;  %v1862_v39 = vmul.f32 %v7238_v26, %v1792_v25  ;;  %v3743_v33 = vmul.f32 %v3712_v13, %v3673_v17 }
 0x24c   :  { %v1863_v59 = vmul.f32 %v7236_v21, %v1793_v35  ;;  %v3744_v40 = vmul.f32 %v3717_v30, %v3674_v37 }
 0x24d   :  { %v1763_v47 = vpop.f32.mrb[12].mxu0  ;;  %v3644_v52 = vpop.f32.mrb[12].mxu1 }
 0x24e   :  { %v4375_v44 = vpack.c.bf16 %v1863_v59, %v1862_v39  ;;  %v5310_v51 = vadd.f32 %v7247_v0, %v1763_v47  ;;  %v4974_v56 = vpop.f32.mrb[13].mxu0  ;;  %v4400_v57 = vpack.c.bf16 %v3744_v40, %v3743_v33  ;;  %v5320_v58 = vadd.f32 %v7247_v0, %v3644_v52  ;;  %v5298_v4 = vpop.f32.mrb[13].mxu1 }
 0x24f   :  { %v1766_v62 = vpop.f32.mrb[14].mxu0  ;;  %v3647_v63 = vpop.f32.mrb[14].mxu1 }
 0x250   :  { %4414 = vst [vmem:[%s7311_s4 + $0x18] sm:$0xff] %v4375_v44   ;;  %v1794_v26 = vmax.f32 %v5310_v51, 0.0  ;;  %v5311_v21 = vadd.f32 %v7247_v0, %v1766_v62  ;;  %v4975_v38 = vpop.f32.mrb[15].mxu0  ;;  %4419 = vst [vmem:[%s7311_s4 + $0x50] sm:$0xff] %v4400_v57   ;;  %v3675_v60 = vmax.f32 %v5320_v58, 0.0  ;;  %v5321_v43 = vadd.f32 %v7247_v0, %v3647_v63  ;;  %v5299_v6 = vpop.f32.mrb[15].mxu1 }
 0x252   :  { %v1795_v7 = vmax.f32 %v5311_v21, 0.0  ;;  %v3676_v19 = vmax.f32 %v5321_v43, 0.0  ;;  %v1864_v9 = vmul.f32 %v7242_v50, %v1794_v26  ;;  %v3745_v15 = vmul.f32 %v3722_v49, %v3675_v60 }
 0x254   :  { %v1865_v10 = vmul.f32 %v7240_v61, %v1795_v7  ;;  %v3746_v23 = vmul.f32 %v3727_v55, %v3676_v19 }
 0x255   :  { %v1771_v24 = vpop.f32.mrb[16].mxu0  ;;  %v3652_v18 = vpop.f32.mrb[16].mxu1 }
 0x256   :  { %v4380_v42 = vpack.c.bf16 %v1865_v10, %v1864_v9  ;;  %v5312_v16 = vadd.f32 %v7247_v0, %v1771_v24  ;;  %v4978_v45 = vpop.f32.mrb[17].mxu0  ;;  %v4405_v2 = vpack.c.bf16 %v3746_v23, %v3745_v15  ;;  %v5322_v46 = vadd.f32 %v7247_v0, %v3652_v18  ;;  %v5302_v53 = vpop.f32.mrb[17].mxu1 }
 0x257   :  { %v1774_v12 = vpop.f32.mrb[18].mxu0  ;;  %v3655_v34 = vpop.f32.mrb[18].mxu1 }
 0x258   :  { %4415 = vst [vmem:[%s7311_s4 + $0x20] sm:$0xff] %v4380_v42   ;;  %v1796_v50 = vmax.f32 %v5312_v16, 0.0  ;;  %v5313_v61 = vadd.f32 %v7247_v0, %v1774_v12  ;;  %v4979_v54 = vpop.f32.mrb[19].mxu0  ;;  %4420 = vst [vmem:[%s7311_s4 + $0x58] sm:$0xff] %v4405_v2   ;;  %v3677_v41 = vmax.f32 %v5322_v46, 0.0  ;;  %v5323_v48 = vadd.f32 %v7247_v0, %v3655_v34  ;;  %v5303_v3 = vpop.f32.mrb[19].mxu1 }
 0x25a   :  { %v1797_v8 = vmax.f32 %v5313_v61, 0.0  ;;  %v3678_v5 = vmax.f32 %v5323_v48, 0.0  ;;  %v1866_v1 = vmul.f32 %v7251_v28, %v1796_v50  ;;  %v3747_v25 = vmul.f32 %v3732_v14, %v3677_v41 }
 0x25c   :  { %v1867_v20 = vmul.f32 %v7249_v27, %v1797_v8  ;;  %v3748_v11 = vmul.f32 %v3737_v22, %v3678_v5 }
 0x25e   :  { %v4385_v36 = vpack.c.bf16 %v1867_v20, %v1866_v1  ;;  %v4410_v29 = vpack.c.bf16 %v3748_v11, %v3747_v25 }
 0x260   :  { %4416 = vst [vmem:[%s7311_s4 + $0x28] sm:$0xff] %v4385_v36   ;;  %4421 = vst [vmem:[%s7311_s4 + $0x60] sm:$0xff] %v4410_v29  }

// kernel: conv_block.3
= control target key start
LH: loop header
LB: loop body
LE: loop exit
PB: predicated region body
PF: predicated region fallthrough
CT: control target
= control target key end

     0   :  { %v6050_v0 = vmov 0.0   ;;  %vm6051_vm0 = vmmov 0   ;;  %vm86_vm1 = vsmask.f32 5376  ;;  %vm297_vm2 = vcmask 1044480   ;;  %s8104_s1 = inlined_call_operand.vmem [shape: bf16[9,128,128], index: 1, kind: input, shape index: {}]   ;;  %s8105_s0 = inlined_call_operand.vmem [shape: bf16[2,112,128], index: 0, kind: input, shape index: {}]   ;;  %s8106_s2 = inlined_call_operand.vmem [shape: f32[1,128], index: 2, kind: input, shape index: {}]   ;;  %s8107_s3 = inlined_call_operand.vmem [shape: bf16[128,128], index: 3, kind: input, shape index: {}]   ;;  %s8108_s5 = inlined_call_operand.vmem [shape: bf16[2,80,128], index: 5, kind: output, shape index: {0}]   ;;  %s8109_s4 = inlined_call_operand.vmem [shape: f32[1,128], index: 4, kind: input, shape index: {}]   ;;  %s8110_s6 = inlined_call_operand.vmem [shape: f32[2,80,128], index: 6, kind: output, shape index: {1}]  }
   0x1   :  { %5081 = vmatprep.subr.bf16.mxu0 %v6050_v0  ;;  %v5803_v1 = vld [vmem:[%s8104_s1] sm:$0xff]   ;;  %5117 = vmatprep.subr.bf16.mxu1 %v6050_v0  ;;  %v5805_v3 = vld [vmem:[%s8104_s1 + $0x8] sm:$0xff]   ;;  %v5807_v5 = vld [vmem:[%s8104_s1 + $0x10] sm:$0xff]   ;;  %vm466_vm3 = vsmask.f32 4352  ;;  %vm1533_vm5 = vcmask 1046528  }
   0x2   :  { %v5804_v2 = vld [vmem:[%s8104_s1 + $0x40] sm:$0xff]   ;;  %5097 = vmatprep.mubr.msk.bf16.mxu0 %vm6051_vm0, %v6050_v0  ;;  %5133 = vmatprep.mubr.msk.bf16.mxu1 %vm6051_vm0, %v6050_v0  ;;  %v5806_v4 = vld [vmem:[%s8104_s1 + $0x48] sm:$0xff]   ;;  %v5808_v6 = vld [vmem:[%s8104_s1 + $0x50] sm:$0xff]   ;;  %vm1095_vm4 = vsmask.f32 7424 }
   0x3   :  { %5082 = vmatpush3.bf16.msra.mxu0 %v5803_v1  ;;  %5118 = vmatpush3.bf16.msra.mxu1 %v5804_v2  ;;  %v5809_v7 = vld [vmem:[%s8104_s1 + $0x18] sm:$0xff]   ;;  %v5811_v9 = vld [vmem:[%s8104_s1 + $0x20] sm:$0xff]   ;;  %v5813_v11 = vld [vmem:[%s8104_s1 + $0x28] sm:$0xff]   ;;  %vm1702_vm6 = vsmask.f32 6400 }
   0x4   :  { %5083 = vmatprep.subr.bf16.mxu0 %v6050_v0  ;;  %5119 = vmatprep.subr.bf16.mxu1 %v6050_v0  ;;  %v5810_v8 = vld [vmem:[%s8104_s1 + $0x58] sm:$0xff]   ;;  %v5812_v10 = vld [vmem:[%s8104_s1 + $0x60] sm:$0xff]   ;;  %v6143_v15 = vld [vmem:[%s8105_s0 + $0x8] sm:$0xff]  }
   0x5   :  { %v31_v12 = vld [vmem:[%s8105_s0] sm:$0xc]  ;;  %v32_v13 = vld [vmem:[%s8105_s0 + $0x4] sm:$0xf]  ;;  %v5814_v16 = vld [vmem:[%s8104_s1 + $0x68] sm:$0xff]   ;;  %v96_v20 = vshrl.u32 %v6143_v15, 16 }
   0x6   :  { %v4171_v14 = vcombine.low %v31_v12, %v32_v13  ;;  %v276_v17 = vld [vmem:[%s8105_s0] sm:$0x8]  ;;  %v99_v21 = vshll.u32 %v6143_v15, 16  ;;  %v5815_v22 = vld [vmem:[%s8104_s1 + $0x30] sm:$0xff]   ;;  %v299_v31 = vrot.slane %v6143_v15, 3  ;;  %v5817_v32 = vld [vmem:[%s8104_s1 + $0x38] sm:$0xff]  }
   0x7   :  { %5084 = vmatpush3.bf16.msra.mxu0 %v5805_v3  ;;  %5120 = vmatpush3.bf16.msra.mxu1 %v5806_v4  ;;  %v98_v25 = vrot.slane %v96_v20, 2  ;;  %v6160_v26 = vcombine.low %v276_v17, %v32_v13  ;;  %v6167_v28 = vld [vmem:[%s8105_s0 + $0x10] sm:$0xff]   ;;  %v5818_v33 = vld [vmem:[%s8104_s1 + $0x78] sm:$0xff]   ;;  %v5821_v38 = vld [vmem:[%s8104_s1 + $0x80] sm:$0xff]  }
   0x8   :  { %5085 = vmatprep.subr.bf16.mxu0 %v6050_v0  ;;  %5121 = vmatprep.subr.bf16.mxu1 %v6050_v0  ;;  %v88_v18 = vshrl.u32 %v4171_v14, 16  ;;  %v91_v19 = vshll.u32 %v4171_v14, 16  ;;  %v101_v27 = vrot.slane %v99_v21, 3  ;;  %v5816_v29 = vld [vmem:[%s8104_s1 + $0x70] sm:$0xff]   ;;  %v105_v36 = vshrl.u32 %v6167_v28, 16  ;;  %v6192_v39 = vld [vmem:[%s8105_s0 + $0x18] sm:$0xff]  }
   0x9   :  { %v298_v30 = vrot.slane %v6160_v26, 3  ;;  %v108_v37 = vshll.u32 %v6167_v28, 16  ;;  %v5826_v44 = vld [vmem:[%s8104_s1 + $0xc0] sm:$0xff]   ;;  %v114_v45 = vshrl.u32 %v6192_v39, 16  ;;  %v117_v46 = vshll.u32 %v6192_v39, 16  ;;  %v5823_v47 = vld [vmem:[%s8104_s1 + $0x88] sm:$0xff]  }
   0xa   :  { %v90_v23 = vrot.slane %v88_v18, 2  ;;  %v93_v24 = vrot.slane %v91_v19, 3  ;;  %v102_v35 = vor.u32 %v101_v27, %v98_v25  ;;  %v107_v41 = vrot.slane %v105_v36, 2  ;;  %v5827_v50 = vld [vmem:[%s8104_s1 + $0xc8] sm:$0xff]   ;;  %v5825_v51 = vld [vmem:[%s8104_s1 + $0x90] sm:$0xff]   ;;  %v6230_v54 = vld [vmem:[%s8105_s0 + $0x20] sm:$0xff]  }
   0xb   :  { %5086 = vmatpush3.bf16.msra.mxu0 %v5807_v5  ;;  %5122 = vmatpush3.bf16.msra.mxu1 %v5808_v6  ;;  %v110_v42 = vrot.slane %v108_v37, 3  ;;  %v300_v43 = vsel %vm297_vm2, %v298_v30, %v299_v31  ;;  %v301_v49 = vrot.slane %v6167_v28, 3  ;;  %v116_v52 = vrot.slane %v114_v45, 2  ;;  %v5830_v57 = vld [vmem:[%s8104_s1 + $0xd0] sm:$0xff]   ;;  %v5829_v59 = vld [vmem:[%s8104_s1 + $0x98] sm:$0xff]   ;;  %v5831_v3 = vld [vmem:[%s8104_s1 + $0xa0] sm:$0xff]  }
   0xc   :  { %5087 = vmatprep.subr.bf16.mxu0 %v6050_v0  ;;  %5123 = vmatprep.subr.bf16.mxu1 %v6050_v0  ;;  %v94_v34 = vor.u32 %v93_v24, %v90_v23  ;;  %v119_v53 = vrot.slane %v117_v46, 3  ;;  %v123_v60 = vshrl.u32 %v6230_v54, 16  ;;  %v126_v61 = vshll.u32 %v6230_v54, 16  ;;  %v5832_v63 = vld [vmem:[%s8104_s1 + $0xd8] sm:$0xff]   ;;  %v5837_v13 = vld [vmem:[%s8104_s1 + $0xe8] sm:$0xff]   ;;  %v5836_v27 = vld [vmem:[%s8104_s1 + $0xb0] sm:$0xff]  }
   0xd   :  { %v111_v48 = vor.u32 %v110_v42, %v107_v41  ;;  %v302_v56 = vsel %vm297_vm2, %v299_v31, %v301_v49  ;;  %v303_v62 = vrot.slane %v6192_v39, 3  ;;  %v6257_v1 = vld [vmem:[%s8105_s0 + $0x28] ss:$0 sps:$4 sm:$0x77]   ;;  %v636_v14 = vld [vmem:[%s8105_s0 + $0x4] sm:$0x8] }
   0xe   :  { %v103_v40 = vsel %vm86_vm1, %v94_v34, %v102_v35  ;;  %v120_v58 = vor.u32 %v119_v53, %v116_v52  ;;  %v125_v4 = vrot.slane %v123_v60, 2  ;;  %v128_v5 = vrot.slane %v126_v61, 3  ;;  %v6297_v17 = vld [vmem:[%s8105_s0 + $0xc] sm:$0xf]  ;;  %v6302_v18 = vld [vmem:[%s8105_s0 + $0x10] sm:$0xf] }
   0xf   :  { %5088 = vmatpush3.bf16.msra.mxu0 %v5809_v7  ;;  %5124 = vmatpush3.bf16.msra.mxu1 %v5810_v8  ;;  %v112_v55 = vsel %vm86_vm1, %v102_v35, %v111_v48  ;;  %v304_v6 = vsel %vm297_vm2, %v301_v49, %v303_v62  ;;  %v305_v7 = vrot.slane %v6230_v54, 3  ;;  %v5834_v8 = vld [vmem:[%s8104_s1 + $0xa8] sm:$0xff]   ;;  %v307_v30 = vrot.slane %v6257_v1, 3  ;;  %v5839_v31 = vld [vmem:[%s8104_s1 + $0xf0] sm:$0xff]   ;;  %v5840_v34 = vld [vmem:[%s8104_s1 + $0xb8] sm:$0xff]  }
  0x10   :  { %5089 = vmatprep.subr.bf16.mxu0 %v6050_v0  ;;  %5125 = vmatprep.subr.bf16.mxu1 %v6050_v0  ;;  %v121_v2 = vsel %vm86_vm1, %v111_v48, %v120_v58  ;;  %v129_v12 = vor.u32 %v128_v5, %v125_v4  ;;  %v6328_v35 = vld [vmem:[%s8105_s0 + $0x14] sm:$0xf]  ;;  %v475_v49 = vrot.slane %v96_v20, 3  ;;  %v6357_v15 = vld [vmem:[%s8105_s0 + $0x1c] sm:$0xf] }
  0x11   :  { %v306_v25 = vsel %vm297_vm2, %v303_v62, %v305_v7  ;;  %v308_v52 = vsel %vm297_vm2, %v305_v7, %v307_v30  ;;  %v6362_v20 = vld [vmem:[%s8105_s0 + $0x20] sm:$0xf]  ;;  %v480_v7 = vrot.slane %v108_v37, 4  ;;  %v6388_v28 = vld [vmem:[%s8105_s0 + $0x24] sm:$0xf] }
  0x12   :  { %v130_v19 = vsel %vm86_vm1, %v120_v58, %v129_v12  ;;  %v4254_v4 = vcombine.low %v6357_v15, %v6362_v20  ;;  %v6422_v39 = vld [vmem:[%s8105_s0 + $0x2c] sm:$0xf] }
  0x13   :  { %5090 = vmatpush3.bf16.msra.mxu0 %v5811_v9  ;;  %5126 = vmatpush3.bf16.msra.mxu1 %v5812_v10  ;;  %v5835_v9 = vld [vmem:[%s8104_s1 + $0xe0] sm:$0xff]   ;;  %v132_v10 = vshrl.u32 %v6257_v1, 16 }
  0x14   :  { %5091 = vmatprep.subr.bf16.mxu0 %v6050_v0  ;;  %5127 = vmatprep.subr.bf16.mxu1 %v6050_v0 }
  0x17   :  { %5092 = vmatpush3.bf16.msra.mxu0 %v5813_v11  ;;  %5128 = vmatpush3.bf16.msra.mxu1 %v5814_v16  ;;  %v135_v11 = vshll.u32 %v6257_v1, 16  ;;  %v6288_v16 = vld [vmem:[%s8105_s0 + $0x8] sm:$0xf] }
  0x18   :  { %5093 = vmatprep.subr.bf16.mxu0 %v6050_v0  ;;  %5129 = vmatprep.subr.bf16.mxu1 %v6050_v0  ;;  %v4251_v24 = vcombine.low %v636_v14, %v6288_v16 }
  0x19   :  { %v137_v23 = vrot.slane %v135_v11, 3  ;;  %v5848_v11 = vld [vmem:[%s8104_s1 + $0x140] sm:$0xff]  }
  0x1a   :  { %v696_v41 = vshll.u32 %v4251_v24, 16 }
  0x1b   :  { %5094 = vmatpush3.bf16.msra.mxu0 %v5815_v22  ;;  %5130 = vmatpush3.bf16.msra.mxu1 %v5816_v29  ;;  %v134_v22 = vrot.slane %v132_v10, 2  ;;  %v4252_v29 = vcombine.low %v6297_v17, %v6302_v18 }
  0x1c   :  { %5095 = vmatprep.subr.bf16.mxu0 %v6050_v0  ;;  %5131 = vmatprep.subr.bf16.mxu1 %v6050_v0 }
  0x1d   :  { %v701_v42 = vshrl.u32 %v4252_v29, 16 }
  0x1f   :  { %5096 = vmatpush3.bf16.msra.mxu0 %v5817_v32  ;;  %5132 = vmatpush3.bf16.msra.mxu1 %v5818_v33  ;;  %v468_v32 = vshrl.u32 %v6160_v26, 16  ;;  %v471_v33 = vshll.u32 %v6160_v26, 16  ;;  %v6335_v26 = vld [vmem:[%s8105_s0 + $0x18] sm:$0xf] }
  0x20   :  { %5153 = vmatprep.subr.bf16.mxu0 %v6050_v0  ;;  %5189 = vmatprep.subr.bf16.mxu1 %v6050_v0  ;;  %v4253_v53 = vcombine.low %v6328_v35, %v6335_v26 }
  0x21   :  { %v473_v48 = vrot.slane %v471_v33, 4  ;;  %v5850_v33 = vld [vmem:[%s8104_s1 + $0x118] sm:$0xff]  }
  0x22   :  { %5098 = vmatmul.mubr.bf16.vlgmr.msra.gmra.mrb[0].mxu0 %v103_v40  ;;  %5134 = vmatmul.mubr.bf16.vlgmr.msra.gmra.mrb[0].mxu1 %v300_v43  ;;  %v693_v40 = vshrl.u32 %v4251_v24, 16  ;;  %v704_v43 = vshll.u32 %v4252_v29, 16  ;;  %v710_v1 = vshrl.u32 %v4253_v53, 16  ;;  %v5847_v24 = vld [vmem:[%s8104_s1 + $0x110] sm:$0xff]  }
  0x23   :  { %5154 = vmatpush3.bf16.msra.mxu0 %v5821_v38  ;;  %5101 = vmatprep.mubr.msk.bf16.mxu0 %vm6051_vm0, %v6050_v0  ;;  %v138_v38 = vor.u32 %v137_v23, %v134_v22  ;;  %v5849_v22 = vld [vmem:[%s8104_s1 + $0x148] sm:$0xff]   ;;  %v483_v23 = vrot.slane %v114_v45, 3  ;;  %v5852_v45 = vld [vmem:[%s8104_s1 + $0x150] sm:$0xff]  }
  0x24   :  { %5155 = vmatprep.subr.bf16.mxu0 %v6050_v0  ;;  %5137 = vmatprep.mubr.msk.bf16.mxu1 %vm6051_vm0, %v6050_v0  ;;  %v706_v58 = vrot.slane %v704_v43, 4  ;;  %v4256_v43 = vcombine.low %v6422_v39, %v6422_v39 }
  0x25   :  { %5190 = vmatpush3.bf16.msra.mxu1 %v5826_v44  ;;  %v5841_v44 = vld [vmem:[%s8104_s1 + $0xf8] sm:$0xff]  }
  0x26   :  { %5191 = vmatprep.subr.bf16.mxu1 %v6050_v0 }
  0x27   :  { %5156 = vmatpush3.bf16.msra.mxu0 %v5823_v47  ;;  %v470_v47 = vrot.slane %v468_v32, 3 }
  0x28   :  { %5157 = vmatprep.subr.bf16.mxu0 %v6050_v0 }
  0x29   :  { %5192 = vmatpush3.bf16.msra.mxu1 %v5827_v50  ;;  %v476_v50 = vrot.slane %v99_v21, 4  ;;  %v474_v21 = vor.u32 %v473_v48, %v470_v47  ;;  %v5853_v47 = vld [vmem:[%s8104_s1 + $0x120] sm:$0xff]  }
  0x2a   :  { %5102 = vmatmul.mubr.bf16.gmra.mrb[4].mxu0 %v112_v55  ;;  %5193 = vmatprep.subr.bf16.mxu1 %v6050_v0  ;;  %v695_v55 = vrot.slane %v693_v40, 3  ;;  %v5854_v40 = vld [vmem:[%s8104_s1 + $0x158] sm:$0xff]  }
  0x2b   :  { %5138 = vmatmul.mubr.bf16.gmra.mrb[4].mxu1 %v302_v56  ;;  %5158 = vmatpush3.bf16.msra.mxu0 %v5825_v51  ;;  %v139_v51 = vsel %vm86_vm1, %v129_v12, %v138_v38  ;;  %v698_v56 = vrot.slane %v696_v41, 4  ;;  %v719_v12 = vshrl.u32 %v4254_v4, 16 }
  0x2c   :  { %5105 = vmatprep.mubr.msk.bf16.mxu0 %vm6051_vm0, %v6050_v0  ;;  %5159 = vmatprep.subr.bf16.mxu0 %v6050_v0 }
  0x2d   :  { %5141 = vmatprep.mubr.msk.bf16.mxu1 %vm6051_vm0, %v6050_v0  ;;  %5194 = vmatpush3.bf16.msra.mxu1 %v5830_v57  ;;  %v703_v57 = vrot.slane %v701_v42, 3  ;;  %v699_v62 = vor.u32 %v698_v56, %v695_v55  ;;  %v721_v29 = vrot.slane %v719_v12, 3  ;;  %v5860_v42 = vld [vmem:[%s8105_s0 + $0x28] ss:$0 sps:$4 sm:$0xff]   ;;  %v1277_v12 = vld [vmem:[%s8105_s0 + $0x10] sm:$0xf] }
  0x2e   :  { %5195 = vmatprep.subr.bf16.mxu1 %v6050_v0  ;;  %v492_v55 = vshrl.u32 %v5860_v42, 16  ;;  %v495_v56 = vshll.u32 %v5860_v42, 16  ;;  %v6552_v42 = vld [vmem:[%s8105_s0 + $0x24] sm:$0xff]  }
  0x2f   :  { %5160 = vmatpush3.bf16.msra.mxu0 %v5829_v59  ;;  %v477_v59 = vor.u32 %v476_v50, %v475_v49  ;;  %v487_v49 = vrot.slane %v123_v60, 3  ;;  %v488_v50 = vrot.slane %v126_v61, 4  ;;  %v5856_v60 = vld [vmem:[%s8104_s1 + $0x128] sm:$0xff]  }
  0x30   :  { %5161 = vmatprep.subr.bf16.mxu0 %v6050_v0 }
  0x31   :  { %5196 = vmatpush3.bf16.msra.mxu1 %v5832_v63  ;;  %v707_v63 = vor.u32 %v706_v58, %v703_v57  ;;  %v478_v5 = vsel %vm466_vm3, %v474_v21, %v477_v59  ;;  %v737_v57 = vshrl.u32 %v4256_v43, 16  ;;  %v740_v58 = vshll.u32 %v4256_v43, 16  ;;  %v5859_v21 = vld [vmem:[%s8104_s1 + $0x168] sm:$0xff]  }
  0x32   :  { %5106 = vmatmul.mubr.bf16.gmra.mrb[8].mxu0 %v121_v2  ;;  %5197 = vmatprep.subr.bf16.mxu1 %v6050_v0  ;;  %v713_v2 = vshll.u32 %v4253_v53, 16  ;;  %v489_v54 = vor.u32 %v488_v50, %v487_v49 }
  0x33   :  { %5142 = vmatmul.mubr.bf16.gmra.mrb[8].mxu1 %v304_v6  ;;  %5162 = vmatpush3.bf16.msra.mxu0 %v5831_v3  ;;  %v479_v3 = vrot.slane %v105_v36, 3  ;;  %v5842_v6 = vld [vmem:[%s8104_s1 + $0x100] sm:$0xff]   ;;  %v5845_v36 = vld [vmem:[%s8104_s1 + $0x108] sm:$0xff]  }
  0x34   :  { %5109 = vmatprep.mubr.msk.bf16.mxu0 %vm6051_vm0, %v6050_v0  ;;  %5145 = vmatprep.mubr.msk.bf16.mxu1 %vm6051_vm0, %v6050_v0  ;;  %v715_v10 = vrot.slane %v713_v2, 4  ;;  %v6475_v2 = vld [vmem:[%s8105_s0 + $0x10] sm:$0xff]  }
  0x35   :  { %5163 = vmatprep.subr.bf16.mxu0 %v6050_v0  ;;  %5198 = vmatpush3.bf16.msra.mxu1 %v5835_v9  ;;  %v712_v9 = vrot.slane %v710_v1, 3  ;;  %v481_v14 = vor.u32 %v480_v7, %v479_v3  ;;  %v6470_v1 = vld [vmem:[%s8105_s0 + $0x8] sm:$0xff]   ;;  %v5858_v3 = vld [vmem:[%s8104_s1 + $0x130] sm:$0xff]  }
  0x36   :  { %5199 = vmatprep.subr.bf16.mxu1 %v6050_v0  ;;  %v5862_v7 = vld [vmem:[%s8104_s1 + $0x170] sm:$0xff]  }
  0x37   :  { %5164 = vmatpush3.bf16.msra.mxu0 %v5834_v8  ;;  %v708_v8 = vsel %vm466_vm3, %v699_v62, %v707_v63  ;;  %v716_v37 = vor.u32 %v715_v10, %v712_v9  ;;  %v497_v62 = vrot.slane %v495_v56, 4  ;;  %v6494_v9 = vld [vmem:[%s8105_s0 + $0x20] sm:$0xff]   ;;  %v5888_v10 = vld [vmem:[%s8105_s0 + $0x30] ss:$0 sps:$4 sm:$0x11]  }
  0x38   :  { %5165 = vmatprep.subr.bf16.mxu0 %v6050_v0 }
  0x39   :  { %5200 = vmatpush3.bf16.msra.mxu1 %v5837_v13  ;;  %v722_v13 = vshll.u32 %v4254_v4, 16  ;;  %v717_v32 = vsel %vm466_vm3, %v707_v63, %v716_v37  ;;  %v739_v63 = vrot.slane %v737_v57, 3  ;;  %v742_v4 = vrot.slane %v740_v58, 4 }
  0x3a   :  { %5110 = vmatmul.mubr.bf16.gmra.mrb[12].mxu0 %v130_v19  ;;  %5201 = vmatprep.subr.bf16.mxu1 %v6050_v0  ;;  %v6396_v19 = vld [vmem:[%s8105_s0 + $0x28] sm:$0xf] }
  0x3b   :  { %5146 = vmatmul.mubr.bf16.gmra.mrb[12].mxu1 %v306_v25  ;;  %5113 = vmatprep.mubr.msk.bf16.mxu0 %vm6051_vm0, %v6050_v0  ;;  %v484_v25 = vrot.slane %v117_v46, 4  ;;  %v724_v30 = vrot.slane %v722_v13, 4  ;;  %v1099_v13 = vshll.u32 %v6470_v1, 16 }
  0x3c   :  { %5166 = vmatpush3.bf16.msra.mxu0 %v5836_v27  ;;  %5149 = vmatprep.mubr.msk.bf16.mxu1 %vm6051_vm0, %v6050_v0  ;;  %v482_v27 = vsel %vm466_vm3, %v477_v59, %v481_v14  ;;  %v494_v59 = vrot.slane %v492_v55, 3 }
  0x3d   :  { %5167 = vmatprep.subr.bf16.mxu0 %v6050_v0  ;;  %5202 = vmatpush3.bf16.msra.mxu1 %v5839_v31  ;;  %v4255_v31 = vcombine.low %v6388_v28, %v6396_v19  ;;  %v485_v46 = vor.u32 %v484_v25, %v483_v23  ;;  %v5863_v23 = vld [vmem:[%s8104_s1 + $0x138] sm:$0xff]   ;;  %v1101_v43 = vrot.slane %v1099_v13, 1  ;;  %v5878_v13 = vld [vmem:[%s8104_s1 + $0x1d0] sm:$0xff]  }
  0x3e   :  { %5203 = vmatprep.subr.bf16.mxu1 %v6050_v0  ;;  %v6521_v25 = vld [vmem:[%s8105_s0 + $0x14] sm:$0xff]  }
  0x3f   :  { %v728_v38 = vshrl.u32 %v4255_v31, 16  ;;  %v731_v41 = vshll.u32 %v4255_v31, 16 }
  0x40   :  { %5168 = vmatpush3.bf16.msra.mxu0 %v5840_v34  ;;  %v725_v34 = vor.u32 %v724_v30, %v721_v29  ;;  %v1512_v30 = vld [vmem:[%s8105_s0 + $0xc] sm:$0xe] }
  0x41   :  { %5204 = vmatpush3.bf16.msra.mxu1 %v5841_v44  ;;  %5225 = vmatprep.subr.bf16.mxu0 %v6050_v0  ;;  %v486_v44 = vsel %vm466_vm3, %v481_v14, %v485_v46  ;;  %v733_v53 = vrot.slane %v731_v41, 4  ;;  %v6511_v14 = vld [vmem:[%s8105_s0 + $0x28] sm:$0xff]   ;;  %v1340_v41 = vshll.u32 %v6521_v25, 16 }
  0x42   :  { %5114 = vmatmul.mubr.bf16.gmra.mrb[16].mxu0 %v139_v51  ;;  %5261 = vmatprep.subr.bf16.mxu1 %v6050_v0  ;;  %v726_v48 = vsel %vm466_vm3, %v716_v37, %v725_v34  ;;  %v730_v51 = vrot.slane %v728_v38, 3  ;;  %v498_v37 = vor.u32 %v497_v62, %v494_v59  ;;  %v1132_v56 = vshrl.u32 %v6511_v14, 16 }
  0x43   :  { %5150 = vmatmul.mubr.bf16.gmra.mrb[16].mxu1 %v308_v52  ;;  %5169 = vmatprep.mubr.msk.bf16.mxu0 %vm6051_vm0, %v6050_v0  ;;  %v5857_v52 = vld [vmem:[%s8104_s1 + $0x160] sm:$0xff]   ;;  %v1344_v62 = vshrl.u32 %v6521_v25, 16 }
  0x44   :  { %5205 = vmatprep.mubr.msk.bf16.mxu1 %vm6051_vm0, %v6050_v0  ;;  %v734_v61 = vor.u32 %v733_v53, %v730_v51  ;;  %v499_v38 = vsel %vm466_vm3, %v489_v54, %v498_v37  ;;  %v1124_v51 = vshrl.u32 %v6494_v9, 16 }
  0x4a   :  { %5170 = vmatmul.mubr.bf16.vlgmr.msra.gmra.mrb[20].mxu0 %v478_v5  ;;  %v6484_v5 = vld [vmem:[%s8105_s0 + $0x18] sm:$0xff]  }
  0x4b   :  { %5226 = vmatpush3.bf16.msra.mxu0 %v5842_v6  ;;  %5206 = vmatmul.mubr.bf16.vlgmr.msra.gmra.mrb[20].mxu1 %v708_v8  ;;  %v490_v6 = vsel %vm466_vm3, %v485_v46, %v489_v54  ;;  %v1097_v8 = vshrl.u32 %v6470_v1, 16  ;;  %v1112_v31 = vshll.u32 %v6484_v5, 16  ;;  %v1120_v46 = vshll.u32 %v6494_v9, 16 }
  0x4c   :  { %5227 = vmatprep.subr.bf16.mxu0 %v6050_v0  ;;  %5173 = vmatprep.mubr.msk.bf16.mxu0 %vm6051_vm0, %v6050_v0  ;;  %v1116_v50 = vshrl.u32 %v6484_v5, 16  ;;  %v6572_v54 = vrot.slane %v1340_v41, 1  ;;  %v5866_v5 = vld [vmem:[%s8104_s1 + $0x180] sm:$0xff]   ;;  %v1539_v1 = vrot.slane %v6552_v42, 1 }
  0x4d   :  { %5209 = vmatprep.mubr.msk.bf16.mxu1 %vm6051_vm0, %v6050_v0  ;;  %5262 = vmatpush3.bf16.msra.mxu1 %v5848_v11  ;;  %v1276_v11 = vld [vmem:[%s8105_s0 + $0xc] sm:$0xf]  ;;  %v1114_v49 = vrot.slane %v1112_v31, 1  ;;  %v6561_v53 = vrot.slane %v1120_v46, 1  ;;  %v5885_v46 = vld [vmem:[%s8104_s1 + $0x1b0] sm:$0xff]  }
  0x4e   :  { %5263 = vmatprep.subr.bf16.mxu1 %v6050_v0  ;;  %v6528_v29 = vcombine.low %v1276_v11, %v1277_v12  ;;  %v5872_v11 = vld [vmem:[%s8104_s1 + $0x190] sm:$0xff]   ;;  %v5883_v31 = vld [vmem:[%s8104_s1 + $0x1a8] sm:$0xff]  }
  0x4f   :  { %5228 = vmatpush3.bf16.msra.mxu0 %v5845_v36  ;;  %v735_v36 = vsel %vm466_vm3, %v725_v34, %v734_v61  ;;  %v1136_v34 = vshll.u32 %v5888_v10, 16 }
  0x50   :  { %5229 = vmatprep.subr.bf16.mxu0 %v6050_v0  ;;  %v1333_v58 = vshrl.u32 %v6528_v29, 16 }
  0x51   :  { %5264 = vmatpush3.bf16.msra.mxu1 %v5849_v22  ;;  %v743_v22 = vor.u32 %v742_v4, %v739_v63  ;;  %v6566_v57 = vrot.slane %v1136_v34, 1 }
  0x52   :  { %5174 = vmatmul.mubr.bf16.gmra.mrb[24].mxu0 %v482_v27  ;;  %5265 = vmatprep.subr.bf16.mxu1 %v6050_v0  ;;  %v5864_v27 = vld [vmem:[%s8104_s1 + $0x178] sm:$0xff]  }
  0x53   :  { %5210 = vmatmul.mubr.bf16.gmra.mrb[24].mxu1 %v717_v32  ;;  %5230 = vmatpush3.bf16.msra.mxu0 %v5847_v24  ;;  %v1104_v24 = vshll.u32 %v6475_v2, 16  ;;  %v6539_v32 = vld [vmem:[%s8105_s0 + $0x1c] sm:$0xff]  }
  0x54   :  { %5177 = vmatprep.mubr.msk.bf16.mxu0 %vm6051_vm0, %v6050_v0  ;;  %5231 = vmatprep.subr.bf16.mxu0 %v6050_v0  ;;  %v1537_v63 = vrot.slane %v6539_v32, 1  ;;  %v1352_v4 = vshrl.u32 %v6539_v32, 16 }
  0x55   :  { %5213 = vmatprep.mubr.msk.bf16.mxu1 %vm6051_vm0, %v6050_v0  ;;  %5266 = vmatpush3.bf16.msra.mxu1 %v5852_v45  ;;  %v1108_v45 = vshrl.u32 %v6475_v2, 16  ;;  %v1102_v2 = vor.u32 %v1101_v43, %v1097_v8  ;;  %v5873_v8 = vld [vmem:[%s8104_s1 + $0x1c0] sm:$0xff]  }
  0x56   :  { %5267 = vmatprep.subr.bf16.mxu1 %v6050_v0 }
  0x57   :  { %5232 = vmatpush3.bf16.msra.mxu0 %v5850_v33  ;;  %v1128_v33 = vshll.u32 %v6511_v14, 16 }
  0x58   :  { %5233 = vmatprep.subr.bf16.mxu0 %v6050_v0 }
  0x59   :  { %5268 = vmatpush3.bf16.msra.mxu1 %v5854_v40  ;;  %v744_v40 = vsel %vm466_vm3, %v734_v61, %v743_v22  ;;  %v6563_v55 = vrot.slane %v1128_v33, 1  ;;  %v1356_v61 = vshll.u32 %v6552_v42, 16  ;;  %v5876_v22 = vld [vmem:[%s8104_s1 + $0x198] sm:$0xff]   ;;  %v5889_v33 = vld [vmem:[%s8104_s1 + $0x1f0] sm:$0xff]  }
  0x5a   :  { %5178 = vmatmul.mubr.bf16.gmra.mrb[28].mxu0 %v486_v44  ;;  %5269 = vmatprep.subr.bf16.mxu1 %v6050_v0  ;;  %v1106_v44 = vrot.slane %v1104_v24, 1  ;;  %v4283_v24 = vcombine.low %v6335_v26, %v6357_v15  ;;  %v5886_v26 = vld [vmem:[%s8104_s1 + $0x1e8] sm:$0xff]   ;;  %v1126_v15 = vor.u32 %v1124_v51, %v6561_v53  ;;  %v5900_v51 = vld [vmem:[%s8104_s1 + $0x218] sm:$0xff]  }
  0x5b   :  { %5214 = vmatmul.mubr.bf16.gmra.mrb[28].mxu1 %v726_v48  ;;  %5234 = vmatpush3.bf16.msra.mxu0 %v5853_v47  ;;  %v1335_v47 = vshll.u32 %v6528_v29, 16  ;;  %v6555_v48 = vcombine.low %v1512_v30, %v1277_v12  ;;  %v4282_v12 = vcombine.low %v6302_v18, %v6328_v35  ;;  %v5880_v18 = vld [vmem:[%s8104_s1 + $0x1d8] sm:$0xff]   ;;  %v1118_v35 = vor.u32 %v1116_v50, %v1114_v49  ;;  %v5896_v29 = vld [vmem:[%s8104_s1 + $0x208] sm:$0xff]  }
  0x5c   :  { %5181 = vmatprep.mubr.msk.bf16.mxu0 %vm6051_vm0, %v6050_v0  ;;  %5217 = vmatprep.mubr.msk.bf16.mxu1 %vm6051_vm0, %v6050_v0  ;;  %v1107_v10 = vsel %vm1095_vm4, %v1102_v2, %v1106_v44  ;;  %v1131_v9 = vsel %vm1095_vm4, %v1126_v15, %v6563_v55  ;;  %v1134_v34 = vor.u32 %v1132_v56, %v6563_v55  ;;  %v5903_v2 = vld [vmem:[%s8104_s1 + $0x228] sm:$0xff]  }
  0x5d   :  { %5235 = vmatprep.subr.bf16.mxu0 %v6050_v0  ;;  %5270 = vmatpush3.bf16.msra.mxu1 %v5857_v52  ;;  %v1348_v52 = vshll.u32 %v6539_v32, 16  ;;  %v1534_v59 = vrot.slane %v6555_v48, 1  ;;  %v1123_v30 = vsel %vm1095_vm4, %v1118_v35, %v6561_v53  ;;  %v6746_v53 = vld [vmem:[%s8105_s0 + $0x2c] sm:$0xff]  }
  0x5e   :  { %5271 = vmatprep.subr.bf16.mxu1 %v6050_v0 }
  0x5f   :  { %5236 = vmatpush3.bf16.msra.mxu0 %v5856_v60  ;;  %v1535_v60 = vrot.slane %v6521_v25, 1  ;;  %v1715_v25 = vrot.slane %v1352_v4, 1 }
  0x60   :  { %5237 = vmatprep.subr.bf16.mxu0 %v6050_v0 }
  0x61   :  { %5272 = vmatpush3.bf16.msra.mxu1 %v5859_v21  ;;  %v6578_v21 = vrot.slane %v1335_v47, 1  ;;  %v1536_v43 = vsel %vm1533_vm5, %v1534_v59, %v1535_v60  ;;  %v5898_v47 = vld [vmem:[%s8104_s1 + $0x210] sm:$0xff]   ;;  %v1538_v50 = vsel %vm1533_vm5, %v1535_v60, %v1537_v63  ;;  %v1540_v60 = vsel %vm1533_vm5, %v1537_v63, %v1539_v1 }
  0x62   :  { %5182 = vmatmul.mubr.bf16.gmra.mrb[32].mxu0 %v490_v6  ;;  %5273 = vmatprep.subr.bf16.mxu1 %v6050_v0  ;;  %v4281_v6 = vcombine.low %v6288_v16, %v6297_v17  ;;  %v5874_v16 = vld [vmem:[%s8104_s1 + $0x1c8] sm:$0xff]   ;;  %v1110_v17 = vor.u32 %v1108_v45, %v1106_v44  ;;  %v4284_v45 = vcombine.low %v6362_v20, %v6388_v28  ;;  %v5890_v20 = vld [vmem:[%s8104_s1 + $0x1b8] sm:$0xff]   ;;  %v1541_v63 = vrot.slane %v6746_v53, 1 }
  0x63   :  { %5218 = vmatmul.mubr.bf16.gmra.mrb[32].mxu1 %v735_v36  ;;  %5185 = vmatprep.mubr.msk.bf16.mxu0 %vm6051_vm0, %v6050_v0  ;;  %v5869_v36 = vld [vmem:[%s8104_s1 + $0x188] sm:$0xff]   ;;  %v5891_v28 = vld [vmem:[%s8104_s1 + $0x1f8] sm:$0xff]   ;;  %v1346_v44 = vor.u32 %v1344_v62, %v6572_v54 }
  0x64   :  { %5238 = vmatpush3.bf16.msra.mxu0 %v5858_v3  ;;  %5221 = vmatprep.mubr.msk.bf16.mxu1 %vm6051_vm0, %v6050_v0  ;;  %v6589_v3 = vrot.slane %v1348_v52, 1  ;;  %v1115_v37 = vsel %vm1095_vm4, %v1110_v17, %v1114_v49  ;;  %v1704_v17 = vshrl.u32 %v6555_v48, 16 }
  0x65   :  { %5239 = vmatprep.subr.bf16.mxu0 %v6050_v0  ;;  %5274 = vmatpush3.bf16.msra.mxu1 %v5862_v7  ;;  %v6599_v7 = vrot.slane %v1356_v61, 1 }
  0x66   :  { %5275 = vmatprep.subr.bf16.mxu1 %v6050_v0  ;;  %v1351_v49 = vsel %vm1095_vm4, %v1346_v44, %v6589_v3  ;;  %v1354_v55 = vor.u32 %v1352_v4, %v6589_v3  ;;  %v5905_v3 = vld [vmem:[%s8105_s0 + $0x34] ss:$0 sps:$4 sm:$0x11]  }
  0x68   :  { %5240 = vmatpush3.bf16.msra.mxu0 %v5863_v23  ;;  %v5879_v23 = vld [vmem:[%s8104_s1 + $0x1a0] sm:$0xff]   ;;  %v1359_v56 = vsel %vm1095_vm4, %v1354_v55, %v6599_v7 }
  0x69   :  { %5276 = vmatpush3.bf16.msra.mxu1 %v5864_v27  ;;  %5297 = vmatprep.subr.bf16.mxu0 %v6050_v0  ;;  %v5884_v27 = vld [vmem:[%s8104_s1 + $0x1e0] sm:$0xff]  }
  0x6a   :  { %5186 = vmatmul.mubr.bf16.gmra.mrb[36].mxu0 %v499_v38  ;;  %5333 = vmatprep.subr.bf16.mxu1 %v6050_v0  ;;  %v4285_v38 = vcombine.low %v6396_v19, %v6422_v39  ;;  %v1338_v19 = vor.u32 %v6578_v21, %v1333_v58  ;;  %v5894_v39 = vld [vmem:[%s8104_s1 + $0x200] sm:$0xff]   ;;  %v1360_v58 = vshrl.u32 %v6552_v42, 16 }
  0x6b   :  { %5222 = vmatmul.mubr.bf16.gmra.mrb[36].mxu1 %v744_v40  ;;  %5241 = vmatprep.mubr.msk.bf16.mxu0 %vm6051_vm0, %v6050_v0  ;;  %v1139_v40 = vsel %vm1095_vm4, %v1134_v34, %v6566_v57  ;;  %v5901_v57 = vld [vmem:[%s8104_s1 + $0x220] sm:$0xff]  }
  0x6c   :  { %5277 = vmatprep.mubr.msk.bf16.mxu1 %vm6051_vm0, %v6050_v0  ;;  %v1343_v14 = vsel %vm1095_vm4, %v1338_v19, %v6572_v54  ;;  %v1364_v54 = vshll.u32 %v6746_v53, 16  ;;  %v1362_v21 = vor.u32 %v1360_v58, %v6599_v7  ;;  %v1372_v7 = vshll.u32 %v5905_v3, 16  ;;  %v5909_v55 = vld [vmem:[%s8104_s1] sm:$0xff]  }
  0x6e   :  { %v1366_v59 = vrot.slane %v1364_v54, 1 }
  0x72   :  { %5242 = vmatmul.mubr.bf16.vlgmr.msra.gmra.mrb[40].mxu0 %v4281_v6  ;;  %v1368_v6 = vshrl.u32 %v6746_v53, 16 }
  0x73   :  { %5298 = vmatpush3.bf16.msra.mxu0 %v5866_v5  ;;  %5278 = vmatmul.mubr.bf16.vlgmr.msra.gmra.mrb[40].mxu1 %v1107_v10  ;;  %v1367_v5 = vsel %vm1095_vm4, %v1362_v21, %v1366_v59  ;;  %v5904_v10 = vld [vmem:[%s8104_s1 + $0x230] sm:$0xff]   ;;  %v5910_v21 = vld [vmem:[%s8107_s3 + $0x8] sm:$0xff]  }
  0x74   :  { %5299 = vmatprep.subr.bf16.mxu0 %v6050_v0  ;;  %5245 = vmatprep.mubr.msk.bf16.mxu0 %vm6051_vm0, %v6050_v0  ;;  %v1723_v32 = vrot.slane %v1368_v6, 1 }
  0x75   :  { %5281 = vmatprep.mubr.msk.bf16.mxu1 %vm6051_vm0, %v6050_v0  ;;  %5334 = vmatpush3.bf16.msra.mxu1 %v5873_v8  ;;  %v1542_v8 = vsel %vm1533_vm5, %v1539_v1, %v1541_v63  ;;  %v1543_v1 = vrot.slane %v5905_v3, 1 }
  0x76   :  { %5335 = vmatprep.subr.bf16.mxu1 %v6050_v0 }
  0x77   :  { %5300 = vmatpush3.bf16.msra.mxu0 %v5869_v36  ;;  %v1370_v36 = vor.u32 %v1368_v6, %v1366_v59  ;;  %v1544_v35 = vsel %vm1533_vm5, %v1541_v63, %v1543_v1 }
  0x78   :  { %5301 = vmatprep.subr.bf16.mxu0 %v6050_v0 }
  0x79   :  { %5336 = vmatpush3.bf16.msra.mxu1 %v5874_v16  ;;  %v1374_v16 = vrot.slane %v1372_v7, 1  ;;  %v5911_v7 = vld [vmem:[%s8104_s1 + $0x8] sm:$0xff]  }
  0x7a   :  { %5246 = vmatmul.mubr.bf16.gmra.mrb[44].mxu0 %v4282_v12  ;;  %5337 = vmatprep.subr.bf16.mxu1 %v6050_v0  ;;  %v5906_v12 = vld [vmem:[%s8104_s1 + $0x238] sm:$0xff]  }
  0x7b   :  { %5282 = vmatmul.mubr.bf16.gmra.mrb[44].mxu1 %v1115_v37  ;;  %5302 = vmatpush3.bf16.msra.mxu0 %v5872_v11  ;;  %v1707_v11 = vshll.u32 %v6555_v48, 16  ;;  %v1375_v37 = vsel %vm1095_vm4, %v1370_v36, %v1374_v16  ;;  %v1712_v48 = vrot.slane %v1340_v41, 2  ;;  %v1716_v41 = vrot.slane %v1348_v52, 2  ;;  %v5912_v36 = vld [vmem:[%s8107_s3 + $0x10] sm:$0xff]  }
  0x7c   :  { %5249 = vmatprep.mubr.msk.bf16.mxu0 %vm6051_vm0, %v6050_v0  ;;  %5303 = vmatprep.subr.bf16.mxu0 %v6050_v0  ;;  %v1724_v52 = vrot.slane %v1364_v54, 2 }
  0x7d   :  { %5285 = vmatprep.mubr.msk.bf16.mxu1 %vm6051_vm0, %v6050_v0  ;;  %5338 = vmatpush3.bf16.msra.mxu1 %v5878_v13  ;;  %v1711_v13 = vrot.slane %v1344_v62, 1 }
  0x7e   :  { %5339 = vmatprep.subr.bf16.mxu1 %v6050_v0 }
  0x7f   :  { %5304 = vmatpush3.bf16.msra.mxu0 %v5876_v22  ;;  %v1706_v22 = vrot.slane %v1704_v17, 1 }
  0x80   :  { %5305 = vmatprep.subr.bf16.mxu0 %v6050_v0 }
  0x81   :  { %5340 = vmatpush3.bf16.msra.mxu1 %v5880_v18  ;;  %v1709_v18 = vrot.slane %v1707_v11, 2 }
  0x82   :  { %5250 = vmatmul.mubr.bf16.gmra.mrb[48].mxu0 %v4283_v24  ;;  %5341 = vmatprep.subr.bf16.mxu1 %v6050_v0  ;;  %v1713_v24 = vor.u32 %v1712_v48, %v1711_v13 }
  0x83   :  { %5286 = vmatmul.mubr.bf16.gmra.mrb[48].mxu1 %v1123_v30  ;;  %5306 = vmatpush3.bf16.msra.mxu0 %v5879_v23  ;;  %v1710_v23 = vor.u32 %v1709_v18, %v1706_v22 }
  0x84   :  { %5253 = vmatprep.mubr.msk.bf16.mxu0 %vm6051_vm0, %v6050_v0  ;;  %5289 = vmatprep.mubr.msk.bf16.mxu1 %vm6051_vm0, %v6050_v0 }
  0x85   :  { %5307 = vmatprep.subr.bf16.mxu0 %v6050_v0  ;;  %5342 = vmatpush3.bf16.msra.mxu1 %v5884_v27  ;;  %v1714_v62 = vsel %vm1702_vm6, %v1710_v23, %v1713_v24  ;;  %v1717_v27 = vor.u32 %v1716_v41, %v1715_v25  ;;  %v5914_v23 = vld [vmem:[%s8107_s3 + $0x18] sm:$0xff]  }
  0x86   :  { %5343 = vmatprep.subr.bf16.mxu1 %v6050_v0  ;;  %v5915_v25 = vld [vmem:[%s8104_s1 + $0x18] sm:$0xff]  }
  0x87   :  { %5308 = vmatpush3.bf16.msra.mxu0 %v5883_v31  ;;  %v1718_v30 = vsel %vm1702_vm6, %v1713_v24, %v1717_v27  ;;  %v1719_v31 = vrot.slane %v1360_v58, 1 }
  0x88   :  { %5309 = vmatprep.subr.bf16.mxu0 %v6050_v0 }
  0x89   :  { %5344 = vmatpush3.bf16.msra.mxu1 %v5886_v26  ;;  %v1720_v26 = vrot.slane %v1356_v61, 2 }
  0x8a   :  { %5254 = vmatmul.mubr.bf16.gmra.mrb[52].mxu0 %v4284_v45  ;;  %5345 = vmatprep.subr.bf16.mxu1 %v6050_v0  ;;  %v5907_v45 = vld [vmem:[%s8105_s0 + $0x34] ss:$0 sps:$4 sm:$0x33]  }
  0x8b   :  { %5290 = vmatmul.mubr.bf16.gmra.mrb[52].mxu1 %v1131_v9  ;;  %5257 = vmatprep.mubr.msk.bf16.mxu0 %vm6051_vm0, %v6050_v0  ;;  %v1721_v15 = vor.u32 %v1720_v26, %v1719_v31  ;;  %v1728_v42 = vshrl.u32 %v5907_v45, 16  ;;  %v1731_v61 = vshll.u32 %v5907_v45, 16  ;;  %v5916_v26 = vld [vmem:[%s8107_s3 + $0x20] sm:$0xff]  }
  0x8c   :  { %5310 = vmatpush3.bf16.msra.mxu0 %v5885_v46  ;;  %5293 = vmatprep.mubr.msk.bf16.mxu1 %vm6051_vm0, %v6050_v0  ;;  %v1725_v46 = vor.u32 %v1724_v52, %v1723_v32 }
  0x8d   :  { %5311 = vmatprep.subr.bf16.mxu0 %v6050_v0  ;;  %5346 = vmatpush3.bf16.msra.mxu1 %v5889_v33  ;;  %v1722_v4 = vsel %vm1702_vm6, %v1717_v27, %v1721_v15  ;;  %v1730_v9 = vrot.slane %v1728_v42, 1 }
  0x8e   :  { %5347 = vmatprep.subr.bf16.mxu1 %v6050_v0  ;;  %v1726_v33 = vsel %vm1702_vm6, %v1721_v15, %v1725_v46  ;;  %v5917_v15 = vld [vmem:[%s8104_s1 + $0x20] sm:$0xff]  }
  0x90   :  { %5312 = vmatpush3.bf16.msra.mxu0 %v5890_v20  ;;  %v1733_v20 = vrot.slane %v1731_v61, 2 }
  0x91   :  { %5348 = vmatpush3.bf16.msra.mxu1 %v5891_v28  ;;  %5369 = vmatprep.subr.bf16.mxu0 %v6050_v0 }
  0x92   :  { %5258 = vmatmul.mubr.bf16.gmra.mrb[56].mxu0 %v4285_v38  ;;  %5405 = vmatprep.subr.bf16.mxu1 %v6050_v0  ;;  %v1734_v28 = vor.u32 %v1733_v20, %v1730_v9  ;;  %v6839_v38 = vld [vmem:[%s8106_s2] ss:$0 sm:$0xff]  ;;  %v5918_v9 = vld [vmem:[%s8107_s3 + $0x28] sm:$0xff]  }
  0x93   :  { %5294 = vmatmul.mubr.bf16.gmra.mrb[56].mxu1 %v1139_v40  ;;  %5313 = vmatprep.mubr.msk.bf16.mxu0 %vm6051_vm0, %v6050_v0  ;;  %v5919_v20 = vld [vmem:[%s8104_s1 + $0x28] sm:$0xff]  }
  0x94   :  { %5349 = vmatprep.mubr.msk.bf16.mxu1 %vm6051_vm0, %v6050_v0  ;;  %v1735_v34 = vsel %vm1702_vm6, %v1725_v46, %v1734_v28 }
  0x9a   :  { %5314 = vmatmul.mubr.bf16.vlgmr.msra.gmra.mrb[60].mxu0 %v1343_v14 }
  0x9b   :  { %5370 = vmatpush3.bf16.msra.mxu0 %v5894_v39  ;;  %5350 = vmatmul.mubr.bf16.vlgmr.msra.gmra.mrb[60].mxu1 %v1536_v43 }
  0x9c   :  { %5371 = vmatprep.subr.bf16.mxu0 %v6050_v0  ;;  %5317 = vmatprep.mubr.msk.bf16.mxu0 %vm6051_vm0, %v6050_v0 }
  0x9d   :  { %5353 = vmatprep.mubr.msk.bf16.mxu1 %vm6051_vm0, %v6050_v0 }
  0x9f   :  { %5372 = vmatpush3.bf16.msra.mxu0 %v5896_v29 }
  0xa0   :  { %5373 = vmatprep.subr.bf16.mxu0 %v6050_v0 }
  0xa2   :  { %5318 = vmatmul.mubr.bf16.gmra.mrb[64].mxu0 %v1351_v49 }
  0xa3   :  { %5354 = vmatmul.mubr.bf16.gmra.mrb[64].mxu1 %v1538_v50  ;;  %5374 = vmatpush3.bf16.msra.mxu0 %v5898_v47 }
  0xa4   :  { %5321 = vmatprep.mubr.msk.bf16.mxu0 %vm6051_vm0, %v6050_v0  ;;  %5375 = vmatprep.subr.bf16.mxu0 %v6050_v0 }
  0xa5   :  { %5357 = vmatprep.mubr.msk.bf16.mxu1 %vm6051_vm0, %v6050_v0 }
  0xa7   :  { %5376 = vmatpush3.bf16.msra.mxu0 %v5900_v51 }
  0xa8   :  { %5377 = vmatprep.subr.bf16.mxu0 %v6050_v0 }
  0xaa   :  { %5322 = vmatmul.mubr.bf16.gmra.mrb[68].mxu0 %v1359_v56  ;;  %v5908_v56 = vld [vmem:[%s8107_s3] sm:$0xff]  }
  0xab   :  { %5358 = vmatmul.mubr.bf16.gmra.mrb[68].mxu1 %v1540_v60  ;;  %5378 = vmatpush3.bf16.msra.mxu0 %v5901_v57 }
  0xac   :  { %5325 = vmatprep.mubr.msk.bf16.mxu0 %vm6051_vm0, %v6050_v0  ;;  %5361 = vmatprep.mubr.msk.bf16.mxu1 %vm6051_vm0, %v6050_v0 }
  0xad   :  { %5379 = vmatprep.subr.bf16.mxu0 %v6050_v0  ;;  %5406 = vmatpush3.bf16.msra.mxu1 %v5908_v56 }
  0xae   :  { %5407 = vmatprep.subr.bf16.mxu1 %v6050_v0 }
  0xaf   :  { %5380 = vmatpush3.bf16.msra.mxu0 %v5903_v2 }
  0xb0   :  { %5381 = vmatprep.subr.bf16.mxu0 %v6050_v0 }
  0xb1   :  { %5408 = vmatpush3.bf16.msra.mxu1 %v5910_v21 }
  0xb2   :  { %5326 = vmatmul.mubr.bf16.gmra.mrb[72].mxu0 %v1367_v5  ;;  %5409 = vmatprep.subr.bf16.mxu1 %v6050_v0 }
  0xb3   :  { %5362 = vmatmul.mubr.bf16.gmra.mrb[72].mxu1 %v1542_v8  ;;  %5329 = vmatprep.mubr.msk.bf16.mxu0 %vm6051_vm0, %v6050_v0 }
  0xb4   :  { %5382 = vmatpush3.bf16.msra.mxu0 %v5904_v10  ;;  %5365 = vmatprep.mubr.msk.bf16.mxu1 %vm6051_vm0, %v6050_v0 }
  0xb5   :  { %5383 = vmatprep.subr.bf16.mxu0 %v6050_v0  ;;  %5410 = vmatpush3.bf16.msra.mxu1 %v5912_v36 }
  0xb6   :  { %5411 = vmatprep.subr.bf16.mxu1 %v6050_v0 }
  0xb8   :  { %5384 = vmatpush3.bf16.msra.mxu0 %v5906_v12  ;;  %v5913_v12 = vld [vmem:[%s8104_s1 + $0x10] sm:$0xff]  }
  0xb9   :  { %5441 = vmatprep.subr.bf16.mxu0 %v6050_v0  ;;  %5412 = vmatpush3.bf16.msra.mxu1 %v5914_v23 }
  0xba   :  { %5330 = vmatmul.mubr.bf16.gmra.mrb[76].mxu0 %v1375_v37  ;;  %5413 = vmatprep.subr.bf16.mxu1 %v6050_v0 }
  0xbb   :  { %5366 = vmatmul.mubr.bf16.gmra.mrb[76].mxu1 %v1544_v35  ;;  %5385 = vmatprep.mubr.msk.bf16.mxu0 %vm6051_vm0, %v6050_v0 }
  0xbc   :  { %5421 = vmatprep.mubr.msk.bf16.mxu1 %vm6051_vm0, %v6050_v0 }
  0xbd   :  { %5414 = vmatpush3.bf16.msra.mxu1 %v5916_v26 }
  0xbe   :  { %5415 = vmatprep.subr.bf16.mxu1 %v6050_v0 }
  0xc1   :  { %5416 = vmatpush3.bf16.msra.mxu1 %v5918_v9 }
  0xc2   :  { %5386 = vmatmul.mubr.bf16.vlgmr.msra.gmra.mrb[80].mxu0 %v1714_v62  ;;  %5417 = vmatprep.subr.bf16.mxu1 %v6050_v0 }
  0xc3   :  { %5389 = vmatprep.mubr.msk.bf16.mxu0 %vm6051_vm0, %v6050_v0  ;;  %5442 = vmatpush3.bf16.msra.mxu0 %v5909_v55 }
  0xc4   :  { %5443 = vmatprep.subr.bf16.mxu0 %v6050_v0 }
  0xc7   :  { %5444 = vmatpush3.bf16.msra.mxu0 %v5911_v7 }
  0xc8   :  { %5445 = vmatprep.subr.bf16.mxu0 %v6050_v0 }
  0xca   :  { %5390 = vmatmul.mubr.bf16.gmra.mrb[84].mxu0 %v1718_v30 }
  0xcb   :  { %5393 = vmatprep.mubr.msk.bf16.mxu0 %vm6051_vm0, %v6050_v0  ;;  %5446 = vmatpush3.bf16.msra.mxu0 %v5913_v12 }
  0xcc   :  { %5447 = vmatprep.subr.bf16.mxu0 %v6050_v0 }
  0xcf   :  { %5448 = vmatpush3.bf16.msra.mxu0 %v5915_v25 }
  0xd0   :  { %5449 = vmatprep.subr.bf16.mxu0 %v6050_v0 }
  0xd2   :  { %5394 = vmatmul.mubr.bf16.gmra.mrb[88].mxu0 %v1722_v4 }
  0xd3   :  { %5397 = vmatprep.mubr.msk.bf16.mxu0 %vm6051_vm0, %v6050_v0  ;;  %5450 = vmatpush3.bf16.msra.mxu0 %v5917_v15  ;;  %v5927_v15 = vld [vmem:[%s8104_s1 + $0x80] sm:$0xff]  }
  0xd4   :  { %5451 = vmatprep.subr.bf16.mxu0 %v6050_v0 }
  0xd7   :  { %5452 = vmatpush3.bf16.msra.mxu0 %v5919_v20 }
  0xd8   :  { %5453 = vmatprep.subr.bf16.mxu0 %v6050_v0 }
  0xda   :  { %5398 = vmatmul.mubr.bf16.gmra.mrb[92].mxu0 %v1726_v33 }
  0xdb   :  { %5401 = vmatprep.mubr.msk.bf16.mxu0 %vm6051_vm0, %v6050_v0 }
  0xe2   :  { %5402 = vmatmul.mubr.bf16.gmra.mrb[96].mxu0 %v1735_v34  ;;  %v4423_v34 = vld [vmem:[%s8105_s0 + $0x38] sm:$0xc] }
  0xe3   :  { %5457 = vmatprep.mubr.msk.bf16.mxu0 %vm6051_vm0, %v6050_v0 }
  0xf5   :  { %v227_v40 = vpop.f32.mrb[0].mxu0  ;;  %v396_v14 = vpop.f32.mrb[0].mxu1 }
  0xf6   :  { %v266_v19 = vadd.f32 %v6839_v38, %v227_v40  ;;  %v5099_v39 = vpop.f32.mrb[1].mxu0  ;;  %v5135_v29 = vpop.f32.mrb[1].mxu1  ;;  %v6919_v40 = vld [vmem:[%s8105_s0 + $0x3c] sm:$0xf] }
  0xf7   :  { %v230_v43 = vpop.f32.mrb[2].mxu0  ;;  %v399_v50 = vpop.f32.mrb[2].mxu1  ;;  %v4434_v29 = vcombine.low %v4423_v34, %v6919_v40 }
  0xf8   :  { %v267_v44 = vadd.f32 %v6839_v38, %v230_v43  ;;  %v6843_v47 = vadd.f32 %v396_v14, %v266_v19  ;;  %v5100_v49 = vpop.f32.mrb[3].mxu0  ;;  %v5136_v51 = vpop.f32.mrb[3].mxu1  ;;  %v5921_v43 = vld [vmem:[%s8104_s1 + $0x30] sm:$0xff]  }
  0xf9   :  { %v5920_v51 = vld [vmem:[%s8107_s3 + $0x30] sm:$0xff]   ;;  %5454 = vmatpush3.bf16.msra.mxu0 %v5921_v43  ;;  %v2165_v21 = vshll.u32 %v4434_v29, 16 }
  0xfa   :  { %v6845_v53 = vadd.f32 %v399_v50, %v267_v44  ;;  %v6929_v44 = vld [vmem:[%s8105_s0 + $0x40] sm:$0xff]   ;;  %5418 = vmatpush3.bf16.msra.mxu1 %v5920_v51  ;;  %5455 = vmatprep.subr.bf16.mxu0 %v6050_v0 }
  0xfb   :  { %5419 = vmatprep.subr.bf16.mxu1 %v6050_v0  ;;  %v2167_v7 = vrot.slane %v2165_v21, 3  ;;  %v5932_v21 = vld [vmem:[%s8104_s1 + $0x90] sm:$0xff]  }
  0xfd   :  { %v235_v57 = vpop.f32.mrb[4].mxu0 }
  0xfe   :  { %v268_v58 = vadd.f32 %v6839_v38, %v235_v57  ;;  %v5103_v54 = vpop.f32.mrb[5].mxu0  ;;  %v404_v60 = vpop.f32.mrb[4].mxu1 }
  0xff   :  { %v238_v59 = vpop.f32.mrb[6].mxu0  ;;  %v5139_v2 = vpop.f32.mrb[5].mxu1  ;;  %v2162_v54 = vshrl.u32 %v4434_v29, 16 }
 0x100   :  { %v269_v3 = vadd.f32 %v6839_v38, %v238_v59  ;;  %v6860_v63 = vadd.f32 %v404_v60, %v268_v58  ;;  %v5104_v5 = vpop.f32.mrb[7].mxu0  ;;  %v407_v6 = vpop.f32.mrb[6].mxu1  ;;  %v2170_v59 = vshrl.u32 %v6929_v44, 16  ;;  %v2173_v2 = vshll.u32 %v6929_v44, 16 }
 0x101   :  { %v5140_v8 = vpop.f32.mrb[7].mxu1  ;;  %v2164_v5 = vrot.slane %v2162_v54, 2 }
 0x102   :  { %v6865_v10 = vadd.f32 %v407_v6, %v269_v3  ;;  %v5922_v6 = vld [vmem:[%s8107_s3 + $0x38] sm:$0xff]   ;;  %v2172_v8 = vrot.slane %v2170_v59, 2  ;;  %v2175_v36 = vrot.slane %v2173_v2, 3 }
 0x103   :  { %5420 = vmatpush3.bf16.msra.mxu1 %v5922_v6 }
 0x104   :  { %5477 = vmatprep.subr.bf16.mxu1 %v6050_v0 }
 0x105   :  { %v243_v16 = vpop.f32.mrb[8].mxu0 }
 0x106   :  { %v270_v17 = vadd.f32 %v6839_v38, %v243_v16  ;;  %v5107_v11 = vpop.f32.mrb[9].mxu0  ;;  %v412_v1 = vpop.f32.mrb[8].mxu1 }
 0x107   :  { %v246_v13 = vpop.f32.mrb[10].mxu0  ;;  %v5143_v37 = vpop.f32.mrb[9].mxu1  ;;  %v2176_v11 = vor.u32 %v2175_v36, %v2172_v8 }
 0x108   :  { %v271_v22 = vadd.f32 %v6839_v38, %v246_v13  ;;  %v6878_v18 = vadd.f32 %v412_v1, %v270_v17  ;;  %v5108_v48 = vpop.f32.mrb[11].mxu0  ;;  %v415_v35 = vpop.f32.mrb[10].mxu1  ;;  %v2168_v17 = vor.u32 %v2167_v7, %v2164_v5  ;;  %v6959_v37 = vld [vmem:[%s8105_s0 + $0x48] sm:$0xff]  }
 0x109   :  { %v5144_v24 = vpop.f32.mrb[11].mxu1 }
 0x10a   :  { %v6884_v62 = vadd.f32 %v415_v35, %v271_v22  ;;  %v2177_v35 = vsel %vm86_vm1, %v2168_v17, %v2176_v11 }
 0x10d   :  { %v251_v41 = vpop.f32.mrb[12].mxu0 }
 0x10e   :  { %v272_v27 = vadd.f32 %v6839_v38, %v251_v41  ;;  %v5111_v30 = vpop.f32.mrb[13].mxu0  ;;  %v420_v31 = vpop.f32.mrb[12].mxu1 }
 0x10f   :  { %v254_v4 = vpop.f32.mrb[14].mxu0  ;;  %v5147_v32 = vpop.f32.mrb[13].mxu1  ;;  %v2182_v30 = vshll.u32 %v6959_v37, 16 }
 0x110   :  { %v273_v52 = vadd.f32 %v6839_v38, %v254_v4  ;;  %v6899_v45 = vadd.f32 %v420_v31, %v272_v27  ;;  %v5112_v46 = vpop.f32.mrb[15].mxu0  ;;  %v423_v42 = vpop.f32.mrb[14].mxu1 }
 0x111   :  { %v5148_v61 = vpop.f32.mrb[15].mxu1 }
 0x112   :  { %v6903_v33 = vadd.f32 %v423_v42, %v273_v52  ;;  %v6982_v61 = vld [vmem:[%s8105_s0 + $0x50] sm:$0xff]  }
 0x113   :  { %v2191_v29 = vshll.u32 %v6982_v61, 16 }
 0x115   :  { %v259_v28 = vpop.f32.mrb[16].mxu0  ;;  %v2193_v51 = vrot.slane %v2191_v29, 3 }
 0x116   :  { %v274_v19 = vadd.f32 %v6839_v38, %v259_v28  ;;  %v5115_v39 = vpop.f32.mrb[17].mxu0  ;;  %v428_v14 = vpop.f32.mrb[16].mxu1 }
 0x117   :  { %v262_v49 = vpop.f32.mrb[18].mxu0  ;;  %v5151_v50 = vpop.f32.mrb[17].mxu1 }
 0x118   :  { %v275_v55 = vadd.f32 %v6839_v38, %v262_v49  ;;  %v6935_v56 = vadd.f32 %v428_v14, %v274_v19  ;;  %v5116_v57 = vpop.f32.mrb[19].mxu0  ;;  %v431_v58 = vpop.f32.mrb[18].mxu1  ;;  %v5923_v38 = vld [vmem:[%s8104_s1 + $0x38] sm:$0xff]   ;;  %v2188_v14 = vshrl.u32 %v6982_v61, 16  ;;  %v5930_v50 = vld [vmem:[%s8104_s1 + $0x88] sm:$0xff]  }
 0x119   :  { %v5152_v60 = vpop.f32.mrb[19].mxu1  ;;  %5456 = vmatpush3.bf16.msra.mxu0 %v5923_v38  ;;  %v7010_v38 = vld [vmem:[%s8105_s0 + $0x58] sm:$0xff]  }
 0x11a   :  { %v6940_v3 = vadd.f32 %v431_v58, %v275_v55  ;;  %5513 = vmatprep.subr.bf16.mxu0 %v6050_v0  ;;  %v2197_v17 = vshrl.u32 %v7010_v38, 16 }
 0x11c   :  { %5458 = vmatmul.mubr.bf16.vlgmr.msra.gmra.mrb[100].mxu0 %v2177_v35 }
 0x11d   :  { %v587_v16 = vpop.f32.mrb[20].mxu0  ;;  %5461 = vmatprep.mubr.msk.bf16.mxu0 %vm6051_vm0, %v6050_v0  ;;  %5514 = vmatpush3.bf16.msra.mxu0 %v5927_v15 }
 0x11e   :  { %v626_v1 = vadd.f32 %v587_v16, %v6843_v47  ;;  %v5171_v12 = vpop.f32.mrb[21].mxu0  ;;  %v832_v13 = vpop.f32.mrb[20].mxu1  ;;  %v2179_v47 = vshrl.u32 %v6959_v37, 16  ;;  %5515 = vmatprep.subr.bf16.mxu0 %v6050_v0 }
 0x11f   :  { %v590_v22 = vpop.f32.mrb[22].mxu0  ;;  %v5207_v48 = vpop.f32.mrb[21].mxu1 }
 0x120   :  { %v627_v23 = vadd.f32 %v590_v22, %v6845_v53  ;;  %v6963_v24 = vadd.f32 %v832_v13, %v626_v1  ;;  %v5172_v25 = vpop.f32.mrb[23].mxu0  ;;  %v835_v41 = vpop.f32.mrb[22].mxu1  ;;  %v2181_v26 = vrot.slane %v2179_v47, 2  ;;  %v2184_v53 = vrot.slane %v2182_v30, 3  ;;  %v5935_v13 = vld [vmem:[%s8104_s1 + $0x98] sm:$0xff]  }
 0x121   :  { %v5208_v27 = vpop.f32.mrb[23].mxu1  ;;  %5516 = vmatpush3.bf16.msra.mxu0 %v5930_v50  ;;  %v2200_v1 = vshll.u32 %v7010_v38, 16  ;;  %v4448_v50 = vld [vmem:[%s8105_s0 + $0x38] sm:$0x8] }
 0x122   :  { %v6969_v31 = vadd.f32 %v835_v41, %v627_v23  ;;  %v2185_v32 = vor.u32 %v2184_v53, %v2181_v26  ;;  %5517 = vmatprep.subr.bf16.mxu0 %v6050_v0  ;;  %v5937_v27 = vld [vmem:[%s8104_s1 + $0xa0] sm:$0xff]  }
 0x123   :  { %v2202_v22 = vrot.slane %v2200_v1, 3  ;;  %v7038_v26 = vld [vmem:[%s8105_s0 + $0x60] ss:$0 sps:$4 sm:$0x77]  }
 0x124   :  { %v2186_v28 = vsel %vm86_vm1, %v2176_v11, %v2185_v32 }
 0x125   :  { %v595_v4 = vpop.f32.mrb[24].mxu0  ;;  %5462 = vmatmul.mubr.bf16.gmra.mrb[104].mxu0 %v2186_v28 }
 0x126   :  { %v628_v52 = vadd.f32 %v595_v4, %v6860_v63  ;;  %v5175_v46 = vpop.f32.mrb[25].mxu0  ;;  %v840_v42 = vpop.f32.mrb[24].mxu1  ;;  %5465 = vmatprep.mubr.msk.bf16.mxu0 %vm6051_vm0, %v6050_v0  ;;  %5518 = vmatpush3.bf16.msra.mxu0 %v5932_v21 }
 0x127   :  { %v598_v9 = vpop.f32.mrb[26].mxu0  ;;  %v5211_v20 = vpop.f32.mrb[25].mxu1  ;;  %5519 = vmatprep.subr.bf16.mxu0 %v6050_v0 }
 0x128   :  { %v629_v34 = vadd.f32 %v598_v9, %v6865_v10  ;;  %v6987_v19 = vadd.f32 %v840_v42, %v628_v52  ;;  %v5176_v39 = vpop.f32.mrb[27].mxu0  ;;  %v843_v63 = vpop.f32.mrb[26].mxu1  ;;  %v2190_v10 = vrot.slane %v2188_v14, 2  ;;  %v2206_v42 = vshrl.u32 %v7038_v26, 16 }
 0x129   :  { %v5212_v43 = vpop.f32.mrb[27].mxu1  ;;  %v2209_v20 = vshll.u32 %v7038_v26, 16 }
 0x12a   :  { %v6993_v49 = vadd.f32 %v843_v63, %v629_v34  ;;  %v2194_v57 = vor.u32 %v2193_v51, %v2190_v10  ;;  %5520 = vmatpush3.bf16.msra.mxu0 %v5935_v13  ;;  %v5940_v34 = vld [vmem:[%s8104_s1 + $0xa8] sm:$0xff]   ;;  %v2371_v13 = vrot.slane %v6929_v44, 3 }
 0x12b   :  { %5521 = vmatprep.subr.bf16.mxu0 %v6050_v0  ;;  %v2211_v39 = vrot.slane %v2209_v20, 3  ;;  %v5948_v20 = vld [vmem:[%s8104_s1 + $0x100] sm:$0xff]  }
 0x12c   :  { %v2195_v7 = vsel %vm86_vm1, %v2185_v32, %v2194_v57 }
 0x12d   :  { %v603_v55 = vpop.f32.mrb[28].mxu0  ;;  %5466 = vmatmul.mubr.bf16.gmra.mrb[108].mxu0 %v2195_v7 }
 0x12e   :  { %v630_v58 = vadd.f32 %v603_v55, %v6878_v18  ;;  %v5179_v54 = vpop.f32.mrb[29].mxu0  ;;  %v848_v60 = vpop.f32.mrb[28].mxu1  ;;  %5469 = vmatprep.mubr.msk.bf16.mxu0 %vm6051_vm0, %v6050_v0  ;;  %5522 = vmatpush3.bf16.msra.mxu0 %v5937_v27 }
 0x12f   :  { %v606_v5 = vpop.f32.mrb[30].mxu0  ;;  %v5215_v6 = vpop.f32.mrb[29].mxu1  ;;  %5523 = vmatprep.subr.bf16.mxu0 %v6050_v0 }
 0x130   :  { %v631_v8 = vadd.f32 %v606_v5, %v6884_v62  ;;  %v7014_v36 = vadd.f32 %v848_v60, %v630_v58  ;;  %v5180_v18 = vpop.f32.mrb[31].mxu0  ;;  %v851_v16 = vpop.f32.mrb[30].mxu1  ;;  %v2199_v62 = vrot.slane %v2197_v17, 2  ;;  %v4465_v58 = vcombine.low %v4448_v50, %v6919_v40 }
 0x131   :  { %v5216_v11 = vpop.f32.mrb[31].mxu1 }
 0x132   :  { %v7019_v12 = vadd.f32 %v851_v16, %v631_v8  ;;  %v2203_v35 = vor.u32 %v2202_v22, %v2199_v62  ;;  %5524 = vmatpush3.bf16.msra.mxu0 %v5940_v34  ;;  %v2538_v18 = vshrl.u32 %v4465_v58, 16  ;;  %v2541_v16 = vshll.u32 %v4465_v58, 16 }
 0x133   :  { %5525 = vmatprep.subr.bf16.mxu0 %v6050_v0  ;;  %v2370_v40 = vrot.slane %v4465_v58, 3 }
 0x134   :  { %v2204_v4 = vsel %vm86_vm1, %v2194_v57, %v2203_v35  ;;  %v5943_v57 = vld [vmem:[%s8104_s1 + $0xb0] sm:$0xff]   ;;  %v2543_v22 = vrot.slane %v2541_v16, 4 }
 0x135   :  { %v611_v48 = vpop.f32.mrb[32].mxu0  ;;  %5470 = vmatmul.mubr.bf16.gmra.mrb[112].mxu0 %v2204_v4 }
 0x136   :  { %v632_v23 = vadd.f32 %v611_v48, %v6899_v45  ;;  %v5183_v25 = vpop.f32.mrb[33].mxu0  ;;  %v856_v41 = vpop.f32.mrb[32].mxu1  ;;  %5473 = vmatprep.mubr.msk.bf16.mxu0 %vm6051_vm0, %v6050_v0  ;;  %5526 = vmatpush3.bf16.msra.mxu0 %v5943_v57  ;;  %v2545_v48 = vrot.slane %v2170_v59, 3 }
 0x137   :  { %v614_v53 = vpop.f32.mrb[34].mxu0  ;;  %v5219_v15 = vpop.f32.mrb[33].mxu1  ;;  %5527 = vmatprep.subr.bf16.mxu0 %v6050_v0 }
 0x138   :  { %v633_v32 = vadd.f32 %v614_v53, %v6903_v33  ;;  %v7042_v52 = vadd.f32 %v856_v41, %v632_v23  ;;  %v5184_v45 = vpop.f32.mrb[35].mxu0  ;;  %v859_v46 = vpop.f32.mrb[34].mxu1  ;;  %v2208_v33 = vrot.slane %v2206_v42, 2  ;;  %v2546_v23 = vrot.slane %v2173_v2, 4 }
 0x139   :  { %v5220_v9 = vpop.f32.mrb[35].mxu1 }
 0x13a   :  { %v7047_v28 = vadd.f32 %v859_v46, %v633_v32  ;;  %v2212_v43 = vor.u32 %v2211_v39, %v2208_v33  ;;  %v2547_v27 = vor.u32 %v2546_v23, %v2545_v48 }
 0x13c   :  { %v2213_v21 = vsel %vm86_vm1, %v2203_v35, %v2212_v43  ;;  %v7079_v35 = vsel %vm297_vm2, %v2370_v40, %v2371_v13 }
 0x13d   :  { %v619_v63 = vpop.f32.mrb[36].mxu0  ;;  %5474 = vmatmul.mubr.bf16.gmra.mrb[116].mxu0 %v2213_v21 }
 0x13e   :  { %v634_v10 = vadd.f32 %v619_v63, %v6935_v56  ;;  %v5187_v51 = vpop.f32.mrb[37].mxu0  ;;  %v864_v55 = vpop.f32.mrb[36].mxu1  ;;  %v5945_v56 = vld [vmem:[%s8104_s1 + $0xb8] sm:$0xff]   ;;  %5529 = vmatprep.mubr.msk.bf16.mxu0 %vm6051_vm0, %v6050_v0  ;;  %v2373_v63 = vrot.slane %v6959_v37, 3  ;;  %v5950_v37 = vld [vmem:[%s8104_s1 + $0x108] sm:$0xff]  }
 0x13f   :  { %v622_v54 = vpop.f32.mrb[38].mxu0  ;;  %v5223_v60 = vpop.f32.mrb[37].mxu1  ;;  %5528 = vmatpush3.bf16.msra.mxu0 %v5945_v56 }
 0x140   :  { %v635_v5 = vadd.f32 %v622_v54, %v6940_v3  ;;  %v7065_v6 = vadd.f32 %v864_v55, %v634_v10  ;;  %v5188_v7 = vpop.f32.mrb[39].mxu0  ;;  %v867_v8 = vpop.f32.mrb[38].mxu1  ;;  %v2540_v3 = vrot.slane %v2538_v18, 3  ;;  %5585 = vmatprep.subr.bf16.mxu0 %v6050_v0 }
 0x141   :  { %v5224_v11 = vpop.f32.mrb[39].mxu1  ;;  %v2553_v7 = vrot.slane %v2188_v14, 3 }
 0x142   :  { %v7072_v62 = vadd.f32 %v867_v8, %v635_v5  ;;  %v2544_v25 = vor.u32 %v2543_v22, %v2540_v3  ;;  %v5952_v5 = vld [vmem:[%s8104_s1 + $0x110] sm:$0xff]   ;;  %v2554_v8 = vrot.slane %v2191_v29, 4 }
 0x144   :  { %v2548_v59 = vsel %vm466_vm3, %v2544_v25, %v2547_v27  ;;  %v2555_v18 = vor.u32 %v2554_v8, %v2553_v7  ;;  %v5954_v25 = vld [vmem:[%s8104_s1 + $0x118] sm:$0xff]  }
 0x145   :  { %v990_v41 = vpop.f32.mrb[40].mxu0  ;;  %5530 = vmatmul.mubr.bf16.vlgmr.msra.gmra.mrb[120].mxu0 %v2548_v59 }
 0x146   :  { %v1029_v53 = vadd.f32 %v990_v41, %v6963_v24  ;;  %v5243_v15 = vpop.f32.mrb[41].mxu0  ;;  %v1227_v4 = vpop.f32.mrb[40].mxu1  ;;  %5533 = vmatprep.mubr.msk.bf16.mxu0 %vm6051_vm0, %v6050_v0  ;;  %v2549_v24 = vrot.slane %v2179_v47, 3  ;;  %5586 = vmatpush3.bf16.msra.mxu0 %v5948_v20  ;;  %v7105_v47 = vsel %vm297_vm2, %v2371_v13, %v2373_v63  ;;  %v2377_v41 = vrot.slane %v7010_v38, 3 }
 0x147   :  { %v993_v32 = vpop.f32.mrb[42].mxu0  ;;  %v5279_v45 = vpop.f32.mrb[41].mxu1  ;;  %5587 = vmatprep.subr.bf16.mxu0 %v6050_v0  ;;  %v2558_v15 = vrot.slane %v2200_v1, 4 }
 0x148   :  { %v1030_v46 = vadd.f32 %v993_v32, %v6969_v31  ;;  %v7087_v42 = vadd.f32 %v1227_v4, %v1029_v53  ;;  %v5244_v44 = vpop.f32.mrb[43].mxu0  ;;  %v1230_v2 = vpop.f32.mrb[42].mxu1  ;;  %v2550_v31 = vrot.slane %v2182_v30, 4  ;;  %v2557_v53 = vrot.slane %v2197_v17, 3  ;;  %v5960_v17 = vld [vmem:[%s8105_s0 + $0x60] ss:$0 sps:$4 sm:$0xff]  }
 0x149   :  { %v5280_v9 = vpop.f32.mrb[43].mxu1 }
 0x14a   :  { %v7092_v34 = vadd.f32 %v1230_v2, %v1030_v46  ;;  %v2551_v33 = vor.u32 %v2550_v31, %v2549_v24  ;;  %5588 = vmatpush3.bf16.msra.mxu0 %v5950_v37  ;;  %v2559_v32 = vor.u32 %v2558_v15, %v2557_v53  ;;  %v5961_v37 = vld [vmem:[%s8104_s1 + $0x130] sm:$0xff]   ;;  %v5968_v15 = vld [vmem:[%s8104_s1 + $0x180] sm:$0xff]  }
 0x14b   :  { %5589 = vmatprep.subr.bf16.mxu0 %v6050_v0 }
 0x14c   :  { %v2552_v51 = vsel %vm466_vm3, %v2547_v27, %v2551_v33  ;;  %v2556_v3 = vsel %vm466_vm3, %v2551_v33, %v2555_v18  ;;  %v2560_v2 = vsel %vm466_vm3, %v2555_v18, %v2559_v32  ;;  %v2562_v33 = vshrl.u32 %v5960_v17, 16 }
 0x14d   :  { %v998_v39 = vpop.f32.mrb[44].mxu0  ;;  %5534 = vmatmul.mubr.bf16.gmra.mrb[124].mxu0 %v2552_v51 }
 0x14e   :  { %v1031_v43 = vadd.f32 %v998_v39, %v6987_v19  ;;  %v5247_v50 = vpop.f32.mrb[45].mxu0  ;;  %v1235_v10 = vpop.f32.mrb[44].mxu1  ;;  %5537 = vmatprep.mubr.msk.bf16.mxu0 %vm6051_vm0, %v6050_v0  ;;  %5590 = vmatpush3.bf16.msra.mxu0 %v5952_v5  ;;  %v2565_v39 = vshll.u32 %v5960_v17, 16 }
 0x14f   :  { %v1001_v55 = vpop.f32.mrb[46].mxu0  ;;  %v5283_v57 = vpop.f32.mrb[45].mxu1  ;;  %5591 = vmatprep.subr.bf16.mxu0 %v6050_v0 }
 0x150   :  { %v1032_v30 = vadd.f32 %v1001_v55, %v6993_v49  ;;  %v7108_v58 = vadd.f32 %v1235_v10, %v1031_v43  ;;  %v5248_v54 = vpop.f32.mrb[47].mxu0  ;;  %v1238_v60 = vpop.f32.mrb[46].mxu1  ;;  %v2375_v49 = vrot.slane %v6982_v61, 3  ;;  %v2379_v43 = vrot.slane %v7038_v26, 3 }
 0x151   :  { %v5284_v19 = vpop.f32.mrb[47].mxu1  ;;  %v2567_v10 = vrot.slane %v2565_v39, 4 }
 0x152   :  { %v7113_v21 = vadd.f32 %v1238_v60, %v1032_v30  ;;  %v7127_v56 = vsel %vm297_vm2, %v2373_v63, %v2375_v49  ;;  %5592 = vmatpush3.bf16.msra.mxu0 %v5954_v25  ;;  %v7152_v4 = vsel %vm297_vm2, %v2375_v49, %v2377_v41  ;;  %v7172_v51 = vsel %vm297_vm2, %v2377_v41, %v2379_v43 }
 0x153   :  { %5593 = vmatprep.subr.bf16.mxu0 %v6050_v0 }
 0x155   :  { %v1006_v16 = vpop.f32.mrb[48].mxu0  ;;  %5538 = vmatmul.mubr.bf16.gmra.mrb[128].mxu0 %v2556_v3 }
 0x156   :  { %v1033_v11 = vadd.f32 %v1006_v16, %v7014_v36  ;;  %v5251_v40 = vpop.f32.mrb[49].mxu0  ;;  %v1243_v13 = vpop.f32.mrb[48].mxu1  ;;  %5541 = vmatprep.mubr.msk.bf16.mxu0 %vm6051_vm0, %v6050_v0 }
 0x157   :  { %v1009_v22 = vpop.f32.mrb[50].mxu0  ;;  %v5287_v48 = vpop.f32.mrb[49].mxu1  ;;  %v7199_v40 = vld [vmem:[%s8105_s0 + $0x44] sm:$0xf] }
 0x158   :  { %v1034_v61 = vadd.f32 %v1009_v22, %v7019_v12  ;;  %v7133_v14 = vadd.f32 %v1243_v13, %v1033_v11  ;;  %v5252_v29 = vpop.f32.mrb[51].mxu0  ;;  %v1246_v23 = vpop.f32.mrb[50].mxu1  ;;  %v5956_v12 = vld [vmem:[%s8104_s1 + $0x120] sm:$0xff]  }
 0x159   :  { %v5288_v36 = vpop.f32.mrb[51].mxu1  ;;  %5594 = vmatpush3.bf16.msra.mxu0 %v5956_v12 }
 0x15a   :  { %v7139_v27 = vadd.f32 %v1246_v23, %v1034_v61  ;;  %5595 = vmatprep.subr.bf16.mxu0 %v6050_v0 }
 0x15d   :  { %v1014_v45 = vpop.f32.mrb[52].mxu0  ;;  %5542 = vmatmul.mubr.bf16.gmra.mrb[132].mxu0 %v2560_v2 }
 0x15e   :  { %v1035_v59 = vadd.f32 %v1014_v45, %v7042_v52  ;;  %v5255_v46 = vpop.f32.mrb[53].mxu0  ;;  %v1251_v44 = vpop.f32.mrb[52].mxu1  ;;  %v5958_v52 = vld [vmem:[%s8104_s1 + $0x128] sm:$0xff]   ;;  %5545 = vmatprep.mubr.msk.bf16.mxu0 %vm6051_vm0, %v6050_v0 }
 0x15f   :  { %v1017_v38 = vpop.f32.mrb[54].mxu0  ;;  %v5291_v1 = vpop.f32.mrb[53].mxu1  ;;  %5596 = vmatpush3.bf16.msra.mxu0 %v5958_v52  ;;  %v5972_v52 = vld [vmem:[%s8104_s1 + $0x188] sm:$0xff]  }
 0x160   :  { %v1036_v9 = vadd.f32 %v1017_v38, %v7047_v28  ;;  %v7161_v20 = vadd.f32 %v1251_v44, %v1035_v59  ;;  %v5256_v24 = vpop.f32.mrb[55].mxu0  ;;  %v1254_v31 = vpop.f32.mrb[54].mxu1  ;;  %v2564_v28 = vrot.slane %v2562_v33, 3  ;;  %5597 = vmatprep.subr.bf16.mxu0 %v6050_v0 }
 0x161   :  { %v5292_v63 = vpop.f32.mrb[55].mxu1 }
 0x162   :  { %v7167_v50 = vadd.f32 %v1254_v31, %v1036_v9  ;;  %v2568_v55 = vor.u32 %v2567_v10, %v2564_v28  ;;  %v7251_v63 = vld [vmem:[%s8105_s0 + $0x54] sm:$0xf] }
 0x163   :  { %5598 = vmatpush3.bf16.msra.mxu0 %v5961_v37 }
 0x164   :  { %v2569_v26 = vsel %vm466_vm3, %v2559_v32, %v2568_v55  ;;  %5599 = vmatprep.subr.bf16.mxu0 %v6050_v0 }
 0x165   :  { %v1022_v57 = vpop.f32.mrb[56].mxu0  ;;  %5546 = vmatmul.mubr.bf16.gmra.mrb[136].mxu0 %v2569_v26 }
 0x166   :  { %v1037_v30 = vadd.f32 %v1022_v57, %v7065_v6  ;;  %v5259_v54 = vpop.f32.mrb[57].mxu0  ;;  %v1259_v60 = vpop.f32.mrb[56].mxu1  ;;  %v5963_v6 = vld [vmem:[%s8104_s1 + $0x138] sm:$0xff]   ;;  %5601 = vmatprep.mubr.msk.bf16.mxu0 %vm6051_vm0, %v6050_v0 }
 0x167   :  { %v1025_v19 = vpop.f32.mrb[58].mxu0  ;;  %v5295_v5 = vpop.f32.mrb[57].mxu1  ;;  %5600 = vmatpush3.bf16.msra.mxu0 %v5963_v6 }
 0x168   :  { %v1038_v49 = vadd.f32 %v1025_v19, %v7072_v62  ;;  %v7181_v7 = vadd.f32 %v1259_v60, %v1037_v30  ;;  %v5260_v8 = vpop.f32.mrb[59].mxu0  ;;  %v1262_v18 = vpop.f32.mrb[58].mxu1  ;;  %v7194_v62 = vld [vmem:[%s8105_s0 + $0x40] sm:$0xf]  ;;  %5657 = vmatprep.subr.bf16.mxu0 %v6050_v0  ;;  %v5978_v5 = vld [vmem:[%s8104_s1 + $0x198] sm:$0xff]  }
 0x169   :  { %v5296_v16 = vpop.f32.mrb[59].mxu1  ;;  %v4557_v3 = vcombine.low %v7194_v62, %v7199_v40  ;;  %v7274_v8 = vld [vmem:[%s8105_s0 + $0x58] sm:$0xf] }
 0x16a   :  { %v7187_v11 = vadd.f32 %v1262_v18, %v1038_v49  ;;  %v7279_v18 = vld [vmem:[%s8105_s0 + $0x5c] sm:$0xf] }
 0x16b   :  { %v4560_v16 = vcombine.low %v7274_v8, %v7279_v18 }
 0x16d   :  { %v1463_v13 = vpop.f32.mrb[60].mxu0  ;;  %5602 = vmatmul.mubr.bf16.vlgmr.msra.gmra.mrb[140].mxu0 %v4557_v3 }
 0x16e   :  { %v1502_v22 = vadd.f32 %v1463_v13, %v7087_v42  ;;  %v5315_v48 = vpop.f32.mrb[61].mxu0  ;;  %v1632_v61 = vpop.f32.mrb[60].mxu1  ;;  %5605 = vmatprep.mubr.msk.bf16.mxu0 %vm6051_vm0, %v6050_v0  ;;  %5658 = vmatpush3.bf16.msra.mxu0 %v5968_v15  ;;  %v7218_v42 = vld [vmem:[%s8105_s0 + $0x48] sm:$0xf]  ;;  %v7304_v15 = vld [vmem:[%s8105_s0 + $0x64] sm:$0xf] }
 0x16f   :  { %v1466_v29 = vpop.f32.mrb[62].mxu0  ;;  %v5351_v23 = vpop.f32.mrb[61].mxu1  ;;  %5659 = vmatprep.subr.bf16.mxu0 %v6050_v0 }
 0x170   :  { %v1503_v25 = vadd.f32 %v1466_v29, %v7092_v34  ;;  %v7206_v36 = vadd.f32 %v1632_v61, %v1502_v22  ;;  %v5316_v41 = vpop.f32.mrb[63].mxu0  ;;  %v1635_v12 = vpop.f32.mrb[62].mxu1  ;;  %v7224_v34 = vld [vmem:[%s8105_s0 + $0x4c] sm:$0xf] }
 0x171   :  { %v5352_v53 = vpop.f32.mrb[63].mxu1  ;;  %v4558_v59 = vcombine.low %v7218_v42, %v7224_v34 }
 0x172   :  { %v7211_v32 = vadd.f32 %v1635_v12, %v1503_v25  ;;  %5660 = vmatpush3.bf16.msra.mxu0 %v5972_v52  ;;  %v5984_v12 = vld [vmem:[%s8104_s1 + $0x1a8] sm:$0xff]  }
 0x173   :  { %5661 = vmatprep.subr.bf16.mxu0 %v6050_v0 }
 0x175   :  { %v1471_v45 = vpop.f32.mrb[64].mxu0  ;;  %5606 = vmatmul.mubr.bf16.gmra.mrb[144].mxu0 %v4558_v59 }
 0x176   :  { %v1504_v46 = vadd.f32 %v1471_v45, %v7108_v58  ;;  %v5319_v44 = vpop.f32.mrb[65].mxu0  ;;  %v1640_v2 = vpop.f32.mrb[64].mxu1  ;;  %v5974_v58 = vld [vmem:[%s8104_s1 + $0x190] sm:$0xff]   ;;  %5609 = vmatprep.mubr.msk.bf16.mxu0 %vm6051_vm0, %v6050_v0 }
 0x177   :  { %v1474_v17 = vpop.f32.mrb[66].mxu0  ;;  %v5355_v38 = vpop.f32.mrb[65].mxu1  ;;  %5662 = vmatpush3.bf16.msra.mxu0 %v5974_v58  ;;  %v7314_v44 = vld [vmem:[%s8105_s0 + $0x48] sm:$0xf] }
 0x178   :  { %v1505_v1 = vadd.f32 %v1474_v17, %v7113_v21  ;;  %v7230_v9 = vadd.f32 %v1640_v2, %v1504_v46  ;;  %v5320_v24 = vpop.f32.mrb[67].mxu0  ;;  %v1643_v31 = vpop.f32.mrb[66].mxu1  ;;  %v7246_v21 = vld [vmem:[%s8105_s0 + $0x50] sm:$0xf]  ;;  %5663 = vmatprep.subr.bf16.mxu0 %v6050_v0  ;;  %v4611_v46 = vld [vmem:[%s8105_s0 + $0x44] sm:$0xf] }
 0x179   :  { %v5356_v33 = vpop.f32.mrb[67].mxu1  ;;  %v4559_v28 = vcombine.low %v7246_v21, %v7251_v63  ;;  %v4638_v24 = vcombine.low %v4611_v46, %v7314_v44 }
 0x17a   :  { %v7235_v39 = vadd.f32 %v1643_v31, %v1505_v1  ;;  %v5988_v1 = vld [vmem:[%s8104_s1 + $0x1b0] sm:$0xff]  }
 0x17b   :  { %5664 = vmatpush3.bf16.msra.mxu0 %v5978_v5 }
 0x17c   :  { %5665 = vmatprep.subr.bf16.mxu0 %v6050_v0 }
 0x17d   :  { %v1479_v43 = vpop.f32.mrb[68].mxu0  ;;  %5610 = vmatmul.mubr.bf16.gmra.mrb[148].mxu0 %v4559_v28 }
 0x17e   :  { %v1506_v10 = vadd.f32 %v1479_v43, %v7133_v14  ;;  %v5323_v55 = vpop.f32.mrb[69].mxu0  ;;  %v1648_v57 = vpop.f32.mrb[68].mxu1  ;;  %5613 = vmatprep.mubr.msk.bf16.mxu0 %vm6051_vm0, %v6050_v0 }
 0x17f   :  { %v1482_v30 = vpop.f32.mrb[70].mxu0  ;;  %v5359_v54 = vpop.f32.mrb[69].mxu1  ;;  %v3400_v55 = vshll.u32 %v4638_v24, 16 }
 0x180   :  { %v1507_v60 = vadd.f32 %v1482_v30, %v7139_v27  ;;  %v7258_v26 = vadd.f32 %v1648_v57, %v1506_v10  ;;  %v5324_v37 = vpop.f32.mrb[71].mxu0  ;;  %v1651_v19 = vpop.f32.mrb[70].mxu1  ;;  %v5980_v27 = vld [vmem:[%s8104_s1 + $0x1a0] sm:$0xff]   ;;  %v7330_v10 = vld [vmem:[%s8105_s0 + $0x4c] sm:$0xff]   ;;  %v3398_v30 = vshrl.u32 %v4638_v24, 16 }
 0x181   :  { %v5360_v49 = vpop.f32.mrb[71].mxu1  ;;  %5666 = vmatpush3.bf16.msra.mxu0 %v5980_v27  ;;  %v3402_v54 = vrot.slane %v3400_v55, 1  ;;  %v6029_v37 = vld [vmem:[%s8105_s0 + $0x8] sm:$0xf]  ;;  %v5926_v24 = vld [vmem:[%s8104_s1 + $0x40] sm:$0xff]  }
 0x182   :  { %v7263_v14 = vadd.f32 %v1651_v19, %v1507_v60  ;;  %5667 = vmatprep.subr.bf16.mxu0 %v6050_v0  ;;  %v3405_v60 = vshll.u32 %v7330_v10, 16  ;;  %v1872_v19 = vunpack.c.l.bf16 %v6029_v37  ;;  %v7388_v37 = vld [vmem:[%s8105_s0 + $0x5c] sm:$0xff]  }
 0x183   :  { %v3403_v5 = vor.u32 %v3402_v54, %v3398_v30 }
 0x184   :  { %v3407_v49 = vrot.slane %v3405_v60, 1 }
 0x185   :  { %v1487_v6 = vpop.f32.mrb[72].mxu0  ;;  %5614 = vmatmul.mubr.bf16.gmra.mrb[152].mxu0 %v4560_v16 }
 0x186   :  { %v1508_v13 = vadd.f32 %v1487_v6, %v7161_v20  ;;  %v5327_v3 = vpop.f32.mrb[73].mxu0  ;;  %v1656_v22 = vpop.f32.mrb[72].mxu1  ;;  %5668 = vmatpush3.bf16.msra.mxu0 %v5984_v12  ;;  %5617 = vmatprep.mubr.msk.bf16.mxu0 %vm6051_vm0, %v6050_v0 }
 0x187   :  { %v1490_v48 = vpop.f32.mrb[74].mxu0  ;;  %v5363_v61 = vpop.f32.mrb[73].mxu1  ;;  %5669 = vmatprep.subr.bf16.mxu0 %v6050_v0 }
 0x188   :  { %v1509_v29 = vadd.f32 %v1490_v48, %v7167_v50  ;;  %v7286_v23 = vadd.f32 %v1656_v22, %v1508_v13  ;;  %v5328_v25 = vpop.f32.mrb[75].mxu0  ;;  %v1659_v41 = vpop.f32.mrb[74].mxu1  ;;  %v7299_v50 = vld [vmem:[%s8105_s0 + $0x60] sm:$0xf]  ;;  %v6030_v13 = vld [vmem:[%s8105_s0 + $0xc] sm:$0xf]  ;;  %v3408_v22 = vsel %vm1095_vm4, %v3403_v5, %v3407_v49 }
 0x189   :  { %v5364_v53 = vpop.f32.mrb[75].mxu1  ;;  %v4561_v59 = vcombine.low %v7299_v50, %v7304_v15  ;;  %v1873_v3 = vunpack.c.l.bf16 %v6030_v13  ;;  %v6033_v13 = vld [vmem:[%s8105_s0 + $0x18] sm:$0xf] }
 0x18a   :  { %v7291_v20 = vadd.f32 %v1659_v41, %v1509_v29  ;;  %5670 = vmatpush3.bf16.msra.mxu0 %v5988_v1  ;;  %v7353_v41 = vld [vmem:[%s8105_s0 + $0x54] sm:$0xff]   ;;  %v3409_v53 = vshrl.u32 %v7330_v10, 16 }
 0x18b   :  { %5671 = vmatprep.subr.bf16.mxu0 %v6050_v0  ;;  %v3417_v5 = vshrl.u32 %v7353_v41, 16 }
 0x18d   :  { %v1495_v45 = vpop.f32.mrb[76].mxu0  ;;  %5618 = vmatmul.mubr.bf16.gmra.mrb[156].mxu0 %v4561_v59 }
 0x18e   :  { %v1510_v2 = vadd.f32 %v1495_v45, %v7181_v7  ;;  %v5331_v17 = vpop.f32.mrb[77].mxu0  ;;  %v1664_v38 = vpop.f32.mrb[76].mxu1  ;;  %v5990_v7 = vld [vmem:[%s8104_s1 + $0x1b8] sm:$0xff]   ;;  %5673 = vmatprep.mubr.msk.bf16.mxu0 %vm6051_vm0, %v6050_v0  ;;  %v3413_v45 = vshll.u32 %v7353_v41, 16 }
 0x18f   :  { %v1498_v31 = vpop.f32.mrb[78].mxu0  ;;  %v5367_v52 = vpop.f32.mrb[77].mxu1  ;;  %5672 = vmatpush3.bf16.msra.mxu0 %v5990_v7  ;;  %v3411_v17 = vor.u32 %v3409_v53, %v3407_v49  ;;  %v6002_v49 = vld [vmem:[%s8104_s1 + $0x210] sm:$0xff]  }
 0x190   :  { %v1511_v33 = vadd.f32 %v1498_v31, %v7187_v11  ;;  %v7322_v58 = vadd.f32 %v1664_v38, %v1510_v2  ;;  %v5332_v43 = vpop.f32.mrb[79].mxu0  ;;  %v1667_v28 = vpop.f32.mrb[78].mxu1  ;;  %5729 = vmatprep.subr.bf16.mxu0 %v6050_v0  ;;  %v3415_v38 = vrot.slane %v3413_v45, 1 }
 0x191   :  { %v5368_v57 = vpop.f32.mrb[79].mxu1  ;;  %v6032_v43 = vld [vmem:[%s8105_s0 + $0x14] sm:$0xf] }
 0x192   :  { %v7333_v11 = vadd.f32 %v1667_v28, %v1511_v33  ;;  %v1875_v28 = vunpack.c.l.bf16 %v6032_v43  ;;  %v3416_v55 = vsel %vm1095_vm4, %v3411_v17, %v3415_v38 }
 0x195   :  { %v1823_v27 = vpop.f32.mrb[80].mxu0  ;;  %5674 = vmatmul.mubr.bf16.vlgmr.msra.gmra.mrb[160].mxu0 %v3408_v22  ;;  %v3419_v22 = vor.u32 %v3417_v5, %v3415_v38 }
 0x196   :  { %v1862_v6 = vadd.f32 %v1823_v27, %v7206_v36  ;;  %v5387_v16 = vpop.f32.mrb[81].mxu0  ;;  %v5996_v36 = vld [vmem:[%s8104_s1 + $0x200] sm:$0xff]   ;;  %5677 = vmatprep.mubr.msk.bf16.mxu0 %vm6051_vm0, %v6050_v0  ;;  %v3421_v27 = vshll.u32 %v7388_v37, 16 }
 0x197   :  { %v1826_v48 = vpop.f32.mrb[82].mxu0  ;;  %5730 = vmatpush3.bf16.msra.mxu0 %v5996_v36 }
 0x198   :  { %v1882_v61 = vadd.f32 %v1872_v19, %v1862_v6  ;;  %v1863_v29 = vadd.f32 %v1826_v48, %v7211_v32  ;;  %v5388_v25 = vpop.f32.mrb[83].mxu0  ;;  %v6031_v32 = vld [vmem:[%s8105_s0 + $0x10] sm:$0xf]  ;;  %5731 = vmatprep.subr.bf16.mxu0 %v6050_v0  ;;  %v5928_v19 = vld [vmem:[%s8104_s1 + $0x48] sm:$0xff]  }
 0x199   :  { %v1874_v59 = vunpack.c.l.bf16 %v6031_v32 }
 0x19a   :  { %v1883_v12 = vadd.f32 %v1873_v3, %v1863_v29  ;;  %v1892_v46 = vmax.f32 %v1882_v61, 0.0  ;;  %v1876_v3 = vunpack.c.l.bf16 %v6033_v13  ;;  %v5931_v61 = vld [vmem:[%s8104_s1 + $0x50] sm:$0xff]   ;;  %v3423_v29 = vrot.slane %v3421_v27, 1 }
 0x19c   :  { %v1893_v2 = vmax.f32 %v1883_v12, 0.0  ;;  %v6034_v12 = vld [vmem:[%s8105_s0 + $0x1c] sm:$0xf] }
 0x19d   :  { %v1831_v1 = vpop.f32.mrb[84].mxu0  ;;  %5678 = vmatmul.mubr.bf16.gmra.mrb[164].mxu0 %v3416_v55  ;;  %v1877_v32 = vunpack.c.l.bf16 %v6034_v12  ;;  %v6035_v55 = vld [vmem:[%s8105_s0 + $0x20] sm:$0xf] }
 0x19e   :  { %v1902_v31 = vpack.c.bf16 %v1893_v2, %v1892_v46  ;;  %v1864_v52 = vadd.f32 %v1831_v1, %v7230_v9  ;;  %v5391_v33 = vpop.f32.mrb[85].mxu0  ;;  %v6000_v9 = vld [vmem:[%s8104_s1 + $0x208] sm:$0xff]   ;;  %5681 = vmatprep.mubr.msk.bf16.mxu0 %vm6051_vm0, %v6050_v0  ;;  %v3424_v2 = vsel %vm1095_vm4, %v3419_v22, %v3423_v29 }
 0x19f   :  { %v1834_v7 = vpop.f32.mrb[86].mxu0  ;;  %5732 = vmatpush3.bf16.msra.mxu0 %v6000_v9  ;;  %v6008_v33 = vld [vmem:[%s8104_s1 + $0x220] sm:$0xff]  }
 0x1a0   :  { %4766 = vst [vmem:[%s8108_s5] sm:$0xff] %v1902_v31   ;;  %v1884_v57 = vadd.f32 %v1874_v59, %v1864_v52  ;;  %v1865_v30 = vadd.f32 %v1834_v7, %v7235_v39  ;;  %v5392_v54 = vpop.f32.mrb[87].mxu0  ;;  %5422 = vmatmul.mubr.bf16.vlgmr.msra.gmra.mrb[80].mxu1 %v1902_v31  ;;  %5733 = vmatprep.subr.bf16.mxu0 %v6050_v0  ;;  %v3425_v52 = vshrl.u32 %v7388_v37, 16  ;;  %v5936_v9 = vld [vmem:[%s8104_s1 + $0x60] sm:$0xff]  }
 0x1a1   :  { %5478 = vmatpush3.bf16.msra.mxu1 %v5926_v24  ;;  %5425 = vmatprep.mubr.msk.bf16.mxu1 %vm6051_vm0, %v6050_v0  ;;  %v7436_v24 = vld [vmem:[%s8105_s0 + $0x64] sm:$0xff]  }
 0x1a2   :  { %v1885_v39 = vadd.f32 %v1875_v28, %v1865_v30  ;;  %5479 = vmatprep.subr.bf16.mxu1 %v6050_v0  ;;  %v1894_v6 = vmax.f32 %v1884_v57, 0.0  ;;  %v3429_v43 = vshll.u32 %v7436_v24, 16  ;;  %v1878_v57 = vunpack.c.l.bf16 %v6035_v55 }
 0x1a3   :  { %5734 = vmatpush3.bf16.msra.mxu0 %v6002_v49  ;;  %v3427_v30 = vor.u32 %v3425_v52, %v3423_v29  ;;  %v3433_v12 = vshrl.u32 %v7436_v24, 16 }
 0x1a4   :  { %v1895_v16 = vmax.f32 %v1885_v39, 0.0  ;;  %5735 = vmatprep.subr.bf16.mxu0 %v6050_v0 }
 0x1a5   :  { %v1839_v48 = vpop.f32.mrb[88].mxu0  ;;  %5480 = vmatpush3.bf16.msra.mxu1 %v5928_v19  ;;  %5682 = vmatmul.mubr.bf16.gmra.mrb[168].mxu0 %v3424_v2  ;;  %v3431_v19 = vrot.slane %v3429_v43, 1 }
 0x1a6   :  { %v1866_v25 = vadd.f32 %v1839_v48, %v7258_v26  ;;  %v5395_v36 = vpop.f32.mrb[89].mxu0  ;;  %v1903_v59 = vpack.c.bf16 %v1895_v16, %v1894_v6  ;;  %5481 = vmatprep.subr.bf16.mxu1 %v6050_v0  ;;  %v6006_v26 = vld [vmem:[%s8104_s1 + $0x218] sm:$0xff]   ;;  %5685 = vmatprep.mubr.msk.bf16.mxu0 %vm6051_vm0, %v6050_v0  ;;  %v6036_v6 = vld [vmem:[%s8105_s0 + $0x24] sm:$0xf] }
 0x1a7   :  { %v1842_v46 = vpop.f32.mrb[90].mxu0  ;;  %5736 = vmatpush3.bf16.msra.mxu0 %v6006_v26  ;;  %v1879_v16 = vunpack.c.l.bf16 %v6036_v6  ;;  %v3432_v22 = vsel %vm1095_vm4, %v3427_v30, %v3431_v19  ;;  %v6016_v30 = vld [vmem:[%s8104_s1 + $0x230] sm:$0xff]   ;;  %v6018_v6 = vld [vmem:[%s8104_s1 + $0x238] sm:$0xff]  }
 0x1a8   :  { %v1886_v17 = vadd.f32 %v1876_v3, %v1866_v25  ;;  %v1867_v38 = vadd.f32 %v1842_v46, %v7263_v14  ;;  %v5396_v1 = vpop.f32.mrb[91].mxu0  ;;  %4812 = vst [vmem:[%s8108_s5 + $0x8] sm:$0xff] %v1903_v59   ;;  %5426 = vmatmul.mubr.bf16.gmra.mrb[84].mxu1 %v1903_v59  ;;  %v5934_v14 = vld [vmem:[%s8104_s1 + $0x58] sm:$0xff]   ;;  %5737 = vmatprep.subr.bf16.mxu0 %v6050_v0  ;;  %v7474_v25 = vld [vmem:[%s8105_s0 + $0x6c] ss:$0 sps:$4 sm:$0x11]  }
 0x1a9   :  { %5482 = vmatpush3.bf16.msra.mxu1 %v5931_v61  ;;  %5429 = vmatprep.mubr.msk.bf16.mxu1 %vm6051_vm0, %v6050_v0  ;;  %v6037_v59 = vld [vmem:[%s8105_s0 + $0x28] sm:$0xf] }
 0x1aa   :  { %v1887_v31 = vadd.f32 %v1877_v32, %v1867_v38  ;;  %5483 = vmatprep.subr.bf16.mxu1 %v6050_v0  ;;  %v1896_v28 = vmax.f32 %v1886_v17, 0.0  ;;  %v3437_v32 = vshll.u32 %v7474_v25, 16  ;;  %v1880_v46 = vunpack.c.l.bf16 %v6037_v59 }
 0x1ab   :  { %5738 = vmatpush3.bf16.msra.mxu0 %v6008_v33  ;;  %v3435_v38 = vor.u32 %v3433_v12, %v3431_v19 }
 0x1ac   :  { %v1897_v7 = vmax.f32 %v1887_v31, 0.0  ;;  %5739 = vmatprep.subr.bf16.mxu0 %v6050_v0  ;;  %v3439_v1 = vrot.slane %v3437_v32, 1  ;;  %v4652_v31 = vld [vmem:[%s8105_s0 + $0x44] sm:$0xe] }
 0x1ad   :  { %v1847_v54 = vpop.f32.mrb[92].mxu0  ;;  %5484 = vmatpush3.bf16.msra.mxu1 %v5934_v14  ;;  %5686 = vmatmul.mubr.bf16.gmra.mrb[172].mxu0 %v3432_v22  ;;  %v5941_v14 = vld [vmem:[%s8104_s1 + $0x70] sm:$0xff]   ;;  %v3598_v22 = vrot.slane %v7330_v10, 1  ;;  %v3600_v10 = vrot.slane %v7353_v41, 1  ;;  %v5949_v41 = vld [vmem:[%s8104_s1 + $0xc8] sm:$0xff]  }
 0x1ae   :  { %v1868_v39 = vadd.f32 %v1847_v54, %v7286_v23  ;;  %v5399_v49 = vpop.f32.mrb[93].mxu0  ;;  %v1904_v13 = vpack.c.bf16 %v1897_v7, %v1896_v28  ;;  %5485 = vmatprep.subr.bf16.mxu1 %v6050_v0  ;;  %v6012_v23 = vld [vmem:[%s8104_s1 + $0x228] sm:$0xff]   ;;  %5689 = vmatprep.mubr.msk.bf16.mxu0 %vm6051_vm0, %v6050_v0  ;;  %v4669_v54 = vcombine.low %v4652_v31, %v7314_v44  ;;  %v5944_v44 = vld [vmem:[%s8104_s1 + $0x78] sm:$0xff]   ;;  %v3781_v31 = vrot.slane %v3421_v27, 2 }
 0x1af   :  { %v1850_v3 = vpop.f32.mrb[94].mxu0  ;;  %5740 = vmatpush3.bf16.msra.mxu0 %v6012_v23  ;;  %v6038_v7 = vld [vmem:[%s8105_s0 + $0x2c] sm:$0xf]  ;;  %v3440_v19 = vsel %vm1095_vm4, %v3435_v38, %v3439_v1  ;;  %v7547_v38 = vsel %vm1533_vm5, %v3598_v22, %v3600_v10  ;;  %v3604_v27 = vrot.slane %v7436_v24, 1 }
 0x1b0   :  { %v1888_v48 = vadd.f32 %v1878_v57, %v1868_v39  ;;  %v1869_v61 = vadd.f32 %v1850_v3, %v7291_v20  ;;  %v5400_v29 = vpop.f32.mrb[95].mxu0  ;;  %4813 = vst [vmem:[%s8108_s5 + $0x10] sm:$0xff] %v1904_v13   ;;  %5430 = vmatmul.mubr.bf16.gmra.mrb[88].mxu1 %v1904_v13  ;;  %v5939_v20 = vld [vmem:[%s8104_s1 + $0x68] sm:$0xff]   ;;  %5741 = vmatprep.subr.bf16.mxu0 %v6050_v0  ;;  %v1881_v55 = vunpack.c.l.bf16 %v6038_v7  ;;  %v3768_v13 = vshll.u32 %v4669_v54, 16 }
 0x1b1   :  { %5486 = vmatpush3.bf16.msra.mxu1 %v5936_v9  ;;  %5433 = vmatprep.mubr.msk.bf16.mxu1 %vm6051_vm0, %v6050_v0  ;;  %v3597_v3 = vrot.slane %v4669_v54, 1 }
 0x1b2   :  { %v1889_v36 = vadd.f32 %v1879_v16, %v1869_v61  ;;  %5487 = vmatprep.subr.bf16.mxu1 %v6050_v0  ;;  %v1898_v2 = vmax.f32 %v1888_v48, 0.0  ;;  %v3765_v16 = vshrl.u32 %v4669_v54, 16  ;;  %v3770_v29 = vrot.slane %v3768_v13, 2  ;;  %v5959_v13 = vld [vmem:[%s8104_s1 + $0xf0] sm:$0xff]  }
 0x1b3   :  { %5742 = vmatpush3.bf16.msra.mxu0 %v6016_v30  ;;  %v7528_v23 = vsel %vm1533_vm5, %v3597_v3, %v3598_v22  ;;  %v5955_v30 = vld [vmem:[%s8104_s1 + $0xe0] sm:$0xff]  }
 0x1b4   :  { %v1899_v17 = vmax.f32 %v1889_v36, 0.0  ;;  %v3767_v61 = vrot.slane %v3765_v16, 1  ;;  %5743 = vmatprep.subr.bf16.mxu0 %v6050_v0 }
 0x1b5   :  { %v1855_v26 = vpop.f32.mrb[96].mxu0  ;;  %5488 = vmatpush3.bf16.msra.mxu1 %v5939_v20  ;;  %5690 = vmatmul.mubr.bf16.gmra.mrb[176].mxu0 %v3440_v19  ;;  %v4500_v19 = vld [vmem:[%s8105_s0 + $0x3c] sm:$0x8] }
 0x1b6   :  { %v1870_v33 = vadd.f32 %v1855_v26, %v7322_v58  ;;  %v5403_v28 = vpop.f32.mrb[97].mxu0  ;;  %v1905_v57 = vpack.c.bf16 %v1899_v17, %v1898_v2  ;;  %5489 = vmatprep.subr.bf16.mxu1 %v6050_v0  ;;  %5745 = vmatprep.mubr.msk.bf16.mxu0 %vm6051_vm0, %v6050_v0  ;;  %v3771_v32 = vor.u32 %v3770_v29, %v3767_v61  ;;  %v3777_v17 = vrot.slane %v3413_v45, 2  ;;  %v5947_v26 = vld [vmem:[%s8104_s1 + $0xc0] sm:$0xff]  }
 0x1b7   :  { %v1858_v9 = vpop.f32.mrb[98].mxu0  ;;  %5744 = vmatpush3.bf16.msra.mxu0 %v6018_v6  ;;  %v3602_v45 = vrot.slane %v7388_v37, 1  ;;  %v5951_v28 = vld [vmem:[%s8104_s1 + $0xd0] sm:$0xff]   ;;  %v5953_v37 = vld [vmem:[%s8104_s1 + $0xd8] sm:$0xff]   ;;  %v4527_v6 = vcombine.low %v4500_v19, %v7194_v62  ;;  %v4529_v29 = vcombine.low %v7224_v34, %v7246_v21  ;;  %v4530_v34 = vcombine.low %v7251_v63, %v7274_v8 }
 0x1b8   :  { %v1890_v39 = vadd.f32 %v1880_v46, %v1870_v33  ;;  %v1871_v58 = vadd.f32 %v1858_v9, %v7333_v11  ;;  %v5404_v49 = vpop.f32.mrb[99].mxu0  ;;  %4814 = vst [vmem:[%s8108_s5 + $0x18] sm:$0xff] %v1905_v57   ;;  %5434 = vmatmul.mubr.bf16.gmra.mrb[92].mxu1 %v1905_v57  ;;  %v3772_v11 = vrot.slane %v3409_v53, 1  ;;  %v3773_v53 = vrot.slane %v3405_v60, 2  ;;  %v5957_v9 = vld [vmem:[%s8104_s1 + $0xe8] sm:$0xff]   ;;  %v5962_v62 = vld [vmem:[%s8104_s1 + $0xf8] sm:$0xff]  }
 0x1b9   :  { %5437 = vmatprep.mubr.msk.bf16.mxu1 %vm6051_vm0, %v6050_v0  ;;  %5490 = vmatpush3.bf16.msra.mxu1 %v5941_v14  ;;  %v3776_v60 = vrot.slane %v3417_v5, 1  ;;  %v3780_v5 = vrot.slane %v3425_v52, 1  ;;  %v3784_v52 = vrot.slane %v3433_v12, 1  ;;  %v6020_v12 = vld [vmem:[%s8105_s0 + $0x6c] ss:$0 sps:$4 sm:$0x33]  }
 0x1ba   :  { %v1891_v48 = vadd.f32 %v1881_v55, %v1871_v58  ;;  %5491 = vmatprep.subr.bf16.mxu1 %v6050_v0  ;;  %v1900_v20 = vmax.f32 %v1890_v39, 0.0  ;;  %v3774_v59 = vor.u32 %v3773_v53, %v3772_v11  ;;  %v3785_v55 = vrot.slane %v3429_v43, 2  ;;  %v5973_v8 = vld [vmem:[%s8104_s1 + $0x150] sm:$0xff]  }
 0x1bb   :  { %v3778_v1 = vor.u32 %v3777_v17, %v3776_v60  ;;  %v3782_v33 = vor.u32 %v3781_v31, %v3780_v5  ;;  %v3789_v43 = vshrl.u32 %v6020_v12, 16  ;;  %v3792_v54 = vshll.u32 %v6020_v12, 16 }
 0x1bc   :  { %v1901_v36 = vmax.f32 %v1891_v48, 0.0  ;;  %v3775_v2 = vsel %vm1702_vm6, %v3771_v32, %v3774_v59  ;;  %v3786_v57 = vor.u32 %v3785_v55, %v3784_v52  ;;  %v3606_v39 = vrot.slane %v7474_v25, 1  ;;  %v5979_v52 = vld [vmem:[%s8104_s1 + $0x160] sm:$0xff]  }
 0x1bd   :  { %5492 = vmatpush3.bf16.msra.mxu1 %v5944_v44  ;;  %5746 = vmatmul.mubr.bf16.vlgmr.msra.gmra.mrb[180].mxu0 %v3775_v2  ;;  %v3779_v14 = vsel %vm1702_vm6, %v3774_v59, %v3778_v1  ;;  %v3783_v7 = vsel %vm1702_vm6, %v3778_v1, %v3782_v33  ;;  %v3794_v58 = vrot.slane %v3792_v54, 2  ;;  %v4528_v25 = vcombine.low %v7199_v40, %v7218_v42  ;;  %v5983_v54 = vld [vmem:[%s8104_s1 + $0x168] sm:$0xff]  }
 0x1be   :  { %v1906_v46 = vpack.c.bf16 %v1901_v36, %v1900_v20  ;;  %5549 = vmatprep.subr.bf16.mxu1 %v6050_v0  ;;  %5749 = vmatprep.mubr.msk.bf16.mxu0 %vm6051_vm0, %v6050_v0  ;;  %v3787_v24 = vsel %vm1702_vm6, %v3782_v33, %v3786_v57  ;;  %v7614_v49 = vsel %vm1533_vm5, %v3604_v27, %v3606_v39  ;;  %v2762_v11 = vshrl.u32 %v4527_v6, 16 }
 0x1bf   :  { %v2765_v3 = vshll.u32 %v4527_v6, 16  ;;  %v2770_v22 = vshrl.u32 %v4528_v25, 16  ;;  %v2773_v48 = vshll.u32 %v4528_v25, 16  ;;  %v2779_v36 = vshrl.u32 %v4529_v29, 16 }
 0x1c0   :  { %4815 = vst [vmem:[%s8108_s5 + $0x20] sm:$0xff] %v1906_v46   ;;  %5438 = vmatmul.mubr.bf16.gmra.mrb[96].mxu1 %v1906_v46  ;;  %v2764_v40 = vrot.slane %v2762_v11, 3  ;;  %v2782_v32 = vshll.u32 %v4529_v29, 16  ;;  %v5967_v46 = vld [vmem:[%s8104_s1 + $0x140] sm:$0xff]   ;;  %v2788_v60 = vshrl.u32 %v4530_v34, 16  ;;  %v2791_v17 = vshll.u32 %v4530_v34, 16 }
 0x1c1   :  { %5493 = vmatprep.mubr.msk.bf16.mxu1 %vm6051_vm0, %v6050_v0  ;;  %v2767_v42 = vrot.slane %v2765_v3, 4  ;;  %v2772_v61 = vrot.slane %v2770_v22, 3  ;;  %v2781_v2 = vrot.slane %v2779_v36, 3  ;;  %v5992_v3 = vld [vmem:[%s8105_s0 + $0x48] sm:$0xff]  }
 0x1c2   :  { %v3174_v34 = vshrl.u32 %v5992_v3, 16 }
 0x1c3   :  { %v2768_v53 = vor.u32 %v2767_v42, %v2764_v40 }
 0x1c5   :  { %5750 = vmatmul.mubr.bf16.gmra.mrb[184].mxu0 %v3779_v14  ;;  %v2790_v14 = vrot.slane %v2788_v60, 3 }
 0x1c6   :  { %5753 = vmatprep.mubr.msk.bf16.mxu0 %vm6051_vm0, %v6050_v0 }
 0x1c8   :  { %5494 = vmatmul.mubr.bf16.vlgmr.msra.gmra.mrb[100].mxu1 %v7079_v35  ;;  %v7568_v35 = vsel %vm1533_vm5, %v3600_v10, %v3602_v45  ;;  %v2784_v10 = vrot.slane %v2782_v32, 4 }
 0x1c9   :  { %5550 = vmatpush3.bf16.msra.mxu1 %v5947_v26  ;;  %5497 = vmatprep.mubr.msk.bf16.mxu1 %vm6051_vm0, %v6050_v0 }
 0x1ca   :  { %5551 = vmatprep.subr.bf16.mxu1 %v6050_v0  ;;  %v2785_v21 = vor.u32 %v2784_v10, %v2781_v2  ;;  %v5995_v10 = vld [vmem:[%s8104_s1 + $0x1c0] sm:$0xff]  }
 0x1cd   :  { %5552 = vmatpush3.bf16.msra.mxu1 %v5949_v41  ;;  %5754 = vmatmul.mubr.bf16.gmra.mrb[188].mxu0 %v3783_v7  ;;  %v2793_v41 = vrot.slane %v2791_v17, 4 }
 0x1ce   :  { %5553 = vmatprep.subr.bf16.mxu1 %v6050_v0  ;;  %5757 = vmatprep.mubr.msk.bf16.mxu0 %vm6051_vm0, %v6050_v0 }
 0x1cf   :  { %v2794_v33 = vor.u32 %v2793_v41, %v2790_v14  ;;  %v6003_v14 = vld [vmem:[%s8105_s0 + $0x58] sm:$0xff]  }
 0x1d0   :  { %5498 = vmatmul.mubr.bf16.gmra.mrb[104].mxu1 %v7105_v47  ;;  %v7590_v47 = vsel %vm1533_vm5, %v3602_v45, %v3604_v27  ;;  %v4531_v45 = vcombine.low %v7279_v18, %v7299_v50 }
 0x1d1   :  { %5554 = vmatpush3.bf16.msra.mxu1 %v5951_v28  ;;  %5501 = vmatprep.mubr.msk.bf16.mxu1 %vm6051_vm0, %v6050_v0  ;;  %v5977_v28 = vld [vmem:[%s8104_s1 + $0x158] sm:$0xff]   ;;  %v2795_v27 = vsel %vm466_vm3, %v2785_v21, %v2794_v33 }
 0x1d2   :  { %5555 = vmatprep.subr.bf16.mxu1 %v6050_v0  ;;  %v2797_v7 = vshrl.u32 %v4531_v45, 16 }
 0x1d4   :  { %v2799_v55 = vrot.slane %v2797_v7, 3 }
 0x1d5   :  { %5556 = vmatpush3.bf16.msra.mxu1 %v5953_v37  ;;  %5758 = vmatmul.mubr.bf16.gmra.mrb[192].mxu0 %v3787_v24  ;;  %v2800_v37 = vshll.u32 %v4531_v45, 16 }
 0x1d6   :  { %5557 = vmatprep.subr.bf16.mxu1 %v6050_v0  ;;  %5761 = vmatprep.mubr.msk.bf16.mxu0 %vm6051_vm0, %v6050_v0 }
 0x1d8   :  { %5502 = vmatmul.mubr.bf16.gmra.mrb[108].mxu1 %v7127_v56  ;;  %v3791_v56 = vrot.slane %v3789_v43, 1 }
 0x1d9   :  { %5558 = vmatpush3.bf16.msra.mxu1 %v5955_v30  ;;  %5505 = vmatprep.mubr.msk.bf16.mxu1 %vm6051_vm0, %v6050_v0  ;;  %v4532_v30 = vcombine.low %v7304_v15, %v7304_v15 }
 0x1da   :  { %5559 = vmatprep.subr.bf16.mxu1 %v6050_v0  ;;  %v3795_v16 = vor.u32 %v3794_v58, %v3791_v56  ;;  %v5985_v56 = vld [vmem:[%s8104_s1 + $0x170] sm:$0xff]  }
 0x1db   :  { %v2809_v19 = vshll.u32 %v4532_v30, 16 }
 0x1dc   :  { %v3796_v44 = vsel %vm1702_vm6, %v3786_v57, %v3795_v16  ;;  %v2802_v57 = vrot.slane %v2800_v37, 4  ;;  %v5991_v16 = vld [vmem:[%s8105_s0 + $0x40] sm:$0xff]  }
 0x1dd   :  { %5560 = vmatpush3.bf16.msra.mxu1 %v5957_v9  ;;  %5762 = vmatmul.mubr.bf16.gmra.mrb[196].mxu0 %v3796_v44  ;;  %v2806_v9 = vshrl.u32 %v4532_v30, 16  ;;  %v2811_v6 = vrot.slane %v2809_v19, 4  ;;  %v3165_v22 = vshll.u32 %v5991_v16, 16  ;;  %v3163_v42 = vshrl.u32 %v5991_v16, 16  ;;  %v6011_v16 = vld [vmem:[%s8104_s1 + $0x1e8] sm:$0xff]  }
 0x1de   :  { %5561 = vmatprep.subr.bf16.mxu1 %v6050_v0  ;;  %v2803_v43 = vor.u32 %v2802_v57, %v2799_v55  ;;  %v6005_v55 = vld [vmem:[%s8104_s1 + $0x1d8] sm:$0xff]   ;;  %v6009_v57 = vld [vmem:[%s8105_s0 + $0x60] sm:$0xff]  }
 0x1df   :  { %v2808_v58 = vrot.slane %v2806_v9, 3  ;;  %v3194_v9 = vshll.u32 %v6009_v57, 16 }
 0x1e0   :  { %5506 = vmatmul.mubr.bf16.gmra.mrb[112].mxu1 %v7152_v4  ;;  %v2775_v4 = vrot.slane %v2773_v48, 4  ;;  %v2804_v39 = vsel %vm466_vm3, %v2794_v33, %v2803_v43 }
 0x1e1   :  { %5509 = vmatprep.mubr.msk.bf16.mxu1 %vm6051_vm0, %v6050_v0  ;;  %5562 = vmatpush3.bf16.msra.mxu1 %v5959_v13  ;;  %v2812_v11 = vor.u32 %v2811_v6, %v2808_v58  ;;  %v3196_v6 = vrot.slane %v3194_v9, 1 }
 0x1e2   :  { %5563 = vmatprep.subr.bf16.mxu1 %v6050_v0  ;;  %v2776_v20 = vor.u32 %v2775_v4, %v2772_v61  ;;  %v3167_v61 = vrot.slane %v3165_v22, 1  ;;  %v3170_v4 = vshll.u32 %v5992_v3, 16  ;;  %v3198_v3 = vshrl.u32 %v6009_v57, 16 }
 0x1e3   :  { %v2813_v40 = vsel %vm466_vm3, %v2803_v43, %v2812_v11  ;;  %v6007_v43 = vld [vmem:[%s8104_s1 + $0x1e0] sm:$0xff]  }
 0x1e4   :  { %v2777_v59 = vsel %vm466_vm3, %v2768_v53, %v2776_v20  ;;  %v2786_v63 = vsel %vm466_vm3, %v2776_v20, %v2785_v21  ;;  %v3168_v36 = vor.u32 %v3167_v61, %v3163_v42  ;;  %v3172_v32 = vrot.slane %v3170_v4, 1 }
 0x1e5   :  { %5564 = vmatpush3.bf16.msra.mxu1 %v5962_v62  ;;  %v5989_v62 = vld [vmem:[%s8104_s1 + $0x178] sm:$0xff]   ;;  %v3200_v4 = vor.u32 %v3198_v3, %v3196_v6 }
 0x1e6   :  { %5621 = vmatprep.subr.bf16.mxu1 %v6050_v0  ;;  %v3173_v2 = vsel %vm1095_vm4, %v3168_v36, %v3172_v32 }
 0x1e8   :  { %5510 = vmatmul.mubr.bf16.gmra.mrb[116].mxu1 %v7172_v51  ;;  %v5969_v51 = vld [vmem:[%s8104_s1 + $0x148] sm:$0xff]  }
 0x1e9   :  { %5565 = vmatprep.mubr.msk.bf16.mxu1 %vm6051_vm0, %v6050_v0 }
 0x1ef   :  { %v7649_v1 = vpop.f32.mrb[100].mxu0 }
 0x1f0   :  { %5566 = vmatmul.mubr.bf16.vlgmr.msra.gmra.mrb[120].mxu1 %v2777_v59  ;;  %v5459_v26 = vpop.f32.mrb[101].mxu0  ;;  %v5998_v59 = vld [vmem:[%s8105_s0 + $0x50] sm:$0xff]  }
 0x1f1   :  { %5622 = vmatpush3.bf16.msra.mxu1 %v5967_v46  ;;  %5569 = vmatprep.mubr.msk.bf16.mxu1 %vm6051_vm0, %v6050_v0  ;;  %v7657_v5 = vpop.f32.mrb[102].mxu0  ;;  %v5997_v26 = vld [vmem:[%s8104_s1 + $0x1c8] sm:$0xff]   ;;  %v3182_v33 = vshrl.u32 %v5998_v59, 16 }
 0x1f2   :  { %5623 = vmatprep.subr.bf16.mxu1 %v6050_v0  ;;  %v5460_v31 = vpop.f32.mrb[103].mxu0 }
 0x1f3   :  { %v6001_v31 = vld [vmem:[%s8104_s1 + $0x1d0] sm:$0xff]  }
 0x1f5   :  { %5624 = vmatpush3.bf16.msra.mxu1 %v5969_v51  ;;  %v3178_v51 = vshll.u32 %v5998_v59, 16 }
 0x1f6   :  { %5625 = vmatprep.subr.bf16.mxu1 %v6050_v0 }
 0x1f8   :  { %5570 = vmatmul.mubr.bf16.gmra.mrb[124].mxu1 %v2786_v63  ;;  %v7666_v18 = vpop.f32.mrb[104].mxu0  ;;  %v3176_v63 = vor.u32 %v3174_v34, %v3172_v32 }
 0x1f9   :  { %5626 = vmatpush3.bf16.msra.mxu1 %v5973_v8  ;;  %5573 = vmatprep.mubr.msk.bf16.mxu1 %vm6051_vm0, %v6050_v0  ;;  %v5463_v50 = vpop.f32.mrb[105].mxu0  ;;  %v3180_v8 = vrot.slane %v3178_v51, 1 }
 0x1fa   :  { %5627 = vmatprep.subr.bf16.mxu1 %v6050_v0  ;;  %v7674_v12 = vpop.f32.mrb[106].mxu0 }
 0x1fb   :  { %v5464_v24 = vpop.f32.mrb[107].mxu0  ;;  %v3181_v45 = vsel %vm1095_vm4, %v3176_v63, %v3180_v8 }
 0x1fd   :  { %5628 = vmatpush3.bf16.msra.mxu1 %v5977_v28  ;;  %v3186_v28 = vshll.u32 %v6003_v14, 16 }
 0x1fe   :  { %5629 = vmatprep.subr.bf16.mxu1 %v6050_v0 }
 0x200   :  { %5574 = vmatmul.mubr.bf16.gmra.mrb[128].mxu1 %v2795_v27  ;;  %v7683_v15 = vpop.f32.mrb[108].mxu0  ;;  %v3184_v27 = vor.u32 %v3182_v33, %v3180_v8 }
 0x201   :  { %5630 = vmatpush3.bf16.msra.mxu1 %v5979_v52  ;;  %5577 = vmatprep.mubr.msk.bf16.mxu1 %vm6051_vm0, %v6050_v0  ;;  %v5467_v13 = vpop.f32.mrb[109].mxu0  ;;  %v3188_v52 = vrot.slane %v3186_v28, 1 }
 0x202   :  { %5631 = vmatprep.subr.bf16.mxu1 %v6050_v0  ;;  %v7693_v25 = vpop.f32.mrb[110].mxu0  ;;  %v6014_v13 = vld [vmem:[%s8105_s0 + $0x68] ss:$0 sps:$4 sm:$0x11]  }
 0x203   :  { %v5468_v44 = vpop.f32.mrb[111].mxu0  ;;  %v3189_v24 = vsel %vm1095_vm4, %v3184_v27, %v3188_v52  ;;  %v3202_v22 = vshll.u32 %v6014_v13, 16 }
 0x205   :  { %5632 = vmatpush3.bf16.msra.mxu1 %v5983_v54  ;;  %v3190_v54 = vshrl.u32 %v6003_v14, 16 }
 0x206   :  { %5633 = vmatprep.subr.bf16.mxu1 %v6050_v0 }
 0x207   :  { %v3192_v58 = vor.u32 %v3190_v54, %v3188_v52 }
 0x208   :  { %5578 = vmatmul.mubr.bf16.gmra.mrb[132].mxu1 %v2804_v39  ;;  %v7704_v48 = vpop.f32.mrb[112].mxu0 }
 0x209   :  { %5581 = vmatprep.mubr.msk.bf16.mxu1 %vm6051_vm0, %v6050_v0  ;;  %5634 = vmatpush3.bf16.msra.mxu1 %v5985_v56  ;;  %v5471_v29 = vpop.f32.mrb[113].mxu0  ;;  %v3197_v11 = vsel %vm1095_vm4, %v3192_v58, %v3196_v6  ;;  %v7837_v58 = vld [vmem:[%s8109_s4] ss:$0 sm:$0xff] }
 0x20a   :  { %5635 = vmatprep.subr.bf16.mxu1 %v6050_v0  ;;  %v7708_v53 = vpop.f32.mrb[114].mxu0  ;;  %v3204_v29 = vrot.slane %v3202_v22, 1 }
 0x20b   :  { %v5472_v20 = vpop.f32.mrb[115].mxu0 }
 0x20c   :  { %v6017_v20 = vld [vmem:[%s8104_s1 + $0x1f8] sm:$0xff]   ;;  %v3205_v32 = vsel %vm1095_vm4, %v3200_v4, %v3204_v29  ;;  %v6021_v4 = vld [vmem:[%s8107_s3] sm:$0xff]  }
 0x20d   :  { %5636 = vmatpush3.bf16.msra.mxu1 %v5989_v62  ;;  %v6013_v62 = vld [vmem:[%s8104_s1 + $0x1f0] sm:$0xff]  }
 0x20e   :  { %5693 = vmatprep.subr.bf16.mxu1 %v6050_v0 }
 0x210   :  { %5582 = vmatmul.mubr.bf16.gmra.mrb[136].mxu1 %v2813_v40  ;;  %v7715_v46 = vpop.f32.mrb[116].mxu0 }
 0x211   :  { %5637 = vmatprep.mubr.msk.bf16.mxu1 %vm6051_vm0, %v6050_v0  ;;  %v5475_v21 = vpop.f32.mrb[117].mxu0 }
 0x212   :  { %v7721_v60 = vpop.f32.mrb[118].mxu0 }
 0x213   :  { %v5476_v17 = vpop.f32.mrb[119].mxu0 }
 0x218   :  { %5638 = vmatmul.mubr.bf16.vlgmr.msra.gmra.mrb[140].mxu1 %v3173_v2  ;;  %v7732_v41 = vpop.f32.mrb[120].mxu0 }
 0x219   :  { %5694 = vmatpush3.bf16.msra.mxu1 %v5995_v10  ;;  %5641 = vmatprep.mubr.msk.bf16.mxu1 %vm6051_vm0, %v6050_v0  ;;  %v5531_v7 = vpop.f32.mrb[121].mxu0 }
 0x21a   :  { %5695 = vmatprep.subr.bf16.mxu1 %v6050_v0  ;;  %v7739_v37 = vpop.f32.mrb[122].mxu0 }
 0x21b   :  { %v5532_v50 = vpop.f32.mrb[123].mxu0 }
 0x21d   :  { %5696 = vmatpush3.bf16.msra.mxu1 %v5997_v26 }
 0x21e   :  { %5697 = vmatprep.subr.bf16.mxu1 %v6050_v0 }
 0x220   :  { %5642 = vmatmul.mubr.bf16.gmra.mrb[144].mxu1 %v3181_v45  ;;  %v7750_v30 = vpop.f32.mrb[124].mxu0 }
 0x221   :  { %5698 = vmatpush3.bf16.msra.mxu1 %v6001_v31  ;;  %5645 = vmatprep.mubr.msk.bf16.mxu1 %vm6051_vm0, %v6050_v0  ;;  %v5535_v19 = vpop.f32.mrb[125].mxu0 }
 0x222   :  { %5699 = vmatprep.subr.bf16.mxu1 %v6050_v0  ;;  %v7757_v39 = vpop.f32.mrb[126].mxu0 }
 0x223   :  { %v5536_v56 = vpop.f32.mrb[127].mxu0 }
 0x225   :  { %5700 = vmatpush3.bf16.msra.mxu1 %v6005_v55 }
 0x226   :  { %5701 = vmatprep.subr.bf16.mxu1 %v6050_v0 }
 0x228   :  { %5646 = vmatmul.mubr.bf16.gmra.mrb[148].mxu1 %v3189_v24  ;;  %v7768_v44 = vpop.f32.mrb[128].mxu0 }
 0x229   :  { %5702 = vmatpush3.bf16.msra.mxu1 %v6007_v43  ;;  %5649 = vmatprep.mubr.msk.bf16.mxu1 %vm6051_vm0, %v6050_v0  ;;  %v5539_v40 = vpop.f32.mrb[129].mxu0 }
 0x22a   :  { %5703 = vmatprep.subr.bf16.mxu1 %v6050_v0  ;;  %v7775_v42 = vpop.f32.mrb[130].mxu0 }
 0x22b   :  { %v5540_v61 = vpop.f32.mrb[131].mxu0 }
 0x22d   :  { %5704 = vmatpush3.bf16.msra.mxu1 %v6011_v16 }
 0x22e   :  { %5705 = vmatprep.subr.bf16.mxu1 %v6050_v0 }
 0x230   :  { %5650 = vmatmul.mubr.bf16.gmra.mrb[152].mxu1 %v3197_v11  ;;  %v7783_v36 = vpop.f32.mrb[132].mxu0 }
 0x231   :  { %5653 = vmatprep.mubr.msk.bf16.mxu1 %vm6051_vm0, %v6050_v0  ;;  %5706 = vmatpush3.bf16.msra.mxu1 %v6013_v62  ;;  %v5543_v59 = vpop.f32.mrb[133].mxu0 }
 0x232   :  { %5707 = vmatprep.subr.bf16.mxu1 %v6050_v0  ;;  %v7786_v2 = vpop.f32.mrb[134].mxu0 }
 0x233   :  { %v5544_v10 = vpop.f32.mrb[135].mxu0 }
 0x235   :  { %5708 = vmatpush3.bf16.msra.mxu1 %v6017_v20 }
 0x236   :  { %5765 = vmatprep.subr.bf16.mxu1 %v6050_v0 }
 0x238   :  { %5654 = vmatmul.mubr.bf16.gmra.mrb[156].mxu1 %v3205_v32  ;;  %v7791_v34 = vpop.f32.mrb[136].mxu0 }
 0x239   :  { %5709 = vmatprep.mubr.msk.bf16.mxu1 %vm6051_vm0, %v6050_v0  ;;  %v5547_v51 = vpop.f32.mrb[137].mxu0 }
 0x23a   :  { %v7793_v21 = vpop.f32.mrb[138].mxu0 }
 0x23b   :  { %v5548_v17 = vpop.f32.mrb[139].mxu0 }
 0x240   :  { %5710 = vmatmul.mubr.bf16.vlgmr.msra.gmra.mrb[160].mxu1 %v7528_v23  ;;  %v7798_v26 = vpop.f32.mrb[140].mxu0 }
 0x241   :  { %5713 = vmatprep.mubr.msk.bf16.mxu1 %vm6051_vm0, %v6050_v0  ;;  %v5603_v63 = vpop.f32.mrb[141].mxu0  ;;  %5766 = vmatpush3.bf16.msra.mxu1 %v6021_v4 }
 0x242   :  { %v7800_v8 = vpop.f32.mrb[142].mxu0  ;;  %5767 = vmatprep.subr.bf16.mxu1 %v6050_v0 }
 0x243   :  { %v5604_v14 = vpop.f32.mrb[143].mxu0 }
 0x248   :  { %5714 = vmatmul.mubr.bf16.gmra.mrb[164].mxu1 %v7547_v38  ;;  %v7805_v45 = vpop.f32.mrb[144].mxu0 }
 0x249   :  { %5717 = vmatprep.mubr.msk.bf16.mxu1 %vm6051_vm0, %v6050_v0  ;;  %v5607_v31 = vpop.f32.mrb[145].mxu0 }
 0x24a   :  { %v7807_v33 = vpop.f32.mrb[146].mxu0 }
 0x24b   :  { %v5608_v23 = vpop.f32.mrb[147].mxu0 }
 0x24c   :  { %v6022_v23 = vld [vmem:[%s8107_s3 + $0x8] sm:$0xff]  }
 0x24d   :  { %5768 = vmatpush3.bf16.msra.mxu1 %v6022_v23 }
 0x24e   :  { %5769 = vmatprep.subr.bf16.mxu1 %v6050_v0 }
 0x250   :  { %5718 = vmatmul.mubr.bf16.gmra.mrb[168].mxu1 %v7568_v35  ;;  %v7812_v28 = vpop.f32.mrb[148].mxu0 }
 0x251   :  { %5721 = vmatprep.mubr.msk.bf16.mxu1 %vm6051_vm0, %v6050_v0  ;;  %v5611_v7 = vpop.f32.mrb[149].mxu0 }
 0x252   :  { %v7814_v50 = vpop.f32.mrb[150].mxu0 }
 0x253   :  { %v5612_v38 = vpop.f32.mrb[151].mxu0 }
 0x258   :  { %5722 = vmatmul.mubr.bf16.gmra.mrb[172].mxu1 %v7590_v47  ;;  %v7819_v27 = vpop.f32.mrb[152].mxu0 }
 0x259   :  { %5725 = vmatprep.mubr.msk.bf16.mxu1 %vm6051_vm0, %v6050_v0  ;;  %v5615_v52 = vpop.f32.mrb[153].mxu0 }
 0x25a   :  { %v7821_v55 = vpop.f32.mrb[154].mxu0 }
 0x25b   :  { %v5616_v35 = vpop.f32.mrb[155].mxu0 }
 0x260   :  { %5726 = vmatmul.mubr.bf16.gmra.mrb[176].mxu1 %v7614_v49  ;;  %v7826_v57 = vpop.f32.mrb[156].mxu0 }
 0x261   :  { %5781 = vmatprep.mubr.msk.bf16.mxu1 %vm6051_vm0, %v6050_v0  ;;  %v5619_v24 = vpop.f32.mrb[157].mxu0 }
 0x262   :  { %v7828_v43 = vpop.f32.mrb[158].mxu0 }
 0x263   :  { %v5620_v47 = vpop.f32.mrb[159].mxu0 }
 0x268   :  { %v7830_v54 = vpop.f32.mrb[160].mxu0 }
 0x269   :  { %v5675_v9 = vpop.f32.mrb[161].mxu0 }
 0x26a   :  { %v7832_v19 = vpop.f32.mrb[162].mxu0 }
 0x26b   :  { %v5676_v56 = vpop.f32.mrb[163].mxu0 }
 0x26c   :  { %v6023_v56 = vld [vmem:[%s8107_s3 + $0x10] sm:$0xff]  }
 0x26d   :  { %5770 = vmatpush3.bf16.msra.mxu1 %v6023_v56 }
 0x26e   :  { %5771 = vmatprep.subr.bf16.mxu1 %v6050_v0 }
 0x270   :  { %v7840_v11 = vpop.f32.mrb[164].mxu0 }
 0x271   :  { %v5679_v22 = vpop.f32.mrb[165].mxu0 }
 0x272   :  { %v7846_v40 = vpop.f32.mrb[166].mxu0 }
 0x273   :  { %v2056_v49 = vpop.f32.mrb[80].mxu1  ;;  %v5680_v61 = vpop.f32.mrb[167].mxu0 }
 0x274   :  { %v2057_v6 = vadd.f32 %v7837_v58, %v2056_v49  ;;  %v5423_v16 = vpop.f32.mrb[81].mxu1 }
 0x275   :  { %v2059_v13 = vpop.f32.mrb[82].mxu1 }
 0x276   :  { %2095 = vst [vmem:[%s8110_s6] sm:$0xff] %v2057_v6  ;;  %v2060_v62 = vadd.f32 %v7837_v58, %v2059_v13  ;;  %v5424_v3 = vpop.f32.mrb[83].mxu1  ;;  %v6024_v13 = vld [vmem:[%s8107_s3 + $0x18] sm:$0xff]  }
 0x277   :  { %5772 = vmatpush3.bf16.msra.mxu1 %v6024_v13  ;;  %v6039_v13 = vld [vmem:[%s8106_s2] ss:$0 sm:$0xff] }
 0x278   :  { %2096 = vst [vmem:[%s8110_s6 + $0x8] sm:$0xff] %v2060_v62  ;;  %v7856_v10 = vpop.f32.mrb[168].mxu0  ;;  %5773 = vmatprep.subr.bf16.mxu1 %v6050_v0 }
 0x279   :  { %v5683_v63 = vpop.f32.mrb[169].mxu0 }
 0x27a   :  { %v7862_v14 = vpop.f32.mrb[170].mxu0  ;;  %v6026_v63 = vld [vmem:[%s8107_s3 + $0x28] sm:$0xff]  }
 0x27b   :  { %v2064_v29 = vpop.f32.mrb[84].mxu1  ;;  %v5684_v31 = vpop.f32.mrb[171].mxu0 }
 0x27c   :  { %v2065_v20 = vadd.f32 %v7837_v58, %v2064_v29  ;;  %v5427_v32 = vpop.f32.mrb[85].mxu1 }
 0x27d   :  { %v2067_v59 = vpop.f32.mrb[86].mxu1 }
 0x27e   :  { %2097 = vst [vmem:[%s8110_s6 + $0x10] sm:$0xff] %v2065_v20  ;;  %v2068_v51 = vadd.f32 %v7837_v58, %v2067_v59  ;;  %v5428_v17 = vpop.f32.mrb[87].mxu1 }
 0x280   :  { %2098 = vst [vmem:[%s8110_s6 + $0x18] sm:$0xff] %v2068_v51  ;;  %v7872_v24 = vpop.f32.mrb[172].mxu0  ;;  %v6025_v51 = vld [vmem:[%s8107_s3 + $0x20] sm:$0xff]  }
 0x281   :  { %v5687_v49 = vpop.f32.mrb[173].mxu0  ;;  %5774 = vmatpush3.bf16.msra.mxu1 %v6025_v51 }
 0x282   :  { %v7881_v6 = vpop.f32.mrb[174].mxu0  ;;  %5775 = vmatprep.subr.bf16.mxu1 %v6050_v0  ;;  %v6027_v49 = vld [vmem:[%s8107_s3 + $0x30] sm:$0xff]  }
 0x283   :  { %v2072_v7 = vpop.f32.mrb[88].mxu1  ;;  %v5688_v16 = vpop.f32.mrb[175].mxu0 }
 0x284   :  { %v2073_v38 = vadd.f32 %v7837_v58, %v2072_v7  ;;  %v5431_v52 = vpop.f32.mrb[89].mxu1 }
 0x285   :  { %v2075_v35 = vpop.f32.mrb[90].mxu1  ;;  %5776 = vmatpush3.bf16.msra.mxu1 %v6026_v63 }
 0x286   :  { %2099 = vst [vmem:[%s8110_s6 + $0x20] sm:$0xff] %v2073_v38  ;;  %v2076_v47 = vadd.f32 %v7837_v58, %v2075_v35  ;;  %v5432_v9 = vpop.f32.mrb[91].mxu1  ;;  %5777 = vmatprep.subr.bf16.mxu1 %v6050_v0 }
 0x288   :  { %2100 = vst [vmem:[%s8110_s6 + $0x28] sm:$0xff] %v2076_v47  ;;  %v7891_v4 = vpop.f32.mrb[176].mxu0 }
 0x289   :  { %v5691_v32 = vpop.f32.mrb[177].mxu0  ;;  %5778 = vmatpush3.bf16.msra.mxu1 %v6027_v49 }
 0x28a   :  { %v7898_v59 = vpop.f32.mrb[178].mxu0  ;;  %5779 = vmatprep.subr.bf16.mxu1 %v6050_v0 }
 0x28b   :  { %v2080_v62 = vpop.f32.mrb[92].mxu1  ;;  %v5692_v17 = vpop.f32.mrb[179].mxu0 }
 0x28c   :  { %v2081_v3 = vadd.f32 %v7837_v58, %v2080_v62  ;;  %v5435_v22 = vpop.f32.mrb[93].mxu1  ;;  %v2340_v62 = vadd.f32 %v6039_v13, %v7649_v1 }
 0x28d   :  { %v2083_v61 = vpop.f32.mrb[94].mxu1  ;;  %v6028_v22 = vld [vmem:[%s8107_s3 + $0x38] sm:$0xff]  }
 0x28e   :  { %2101 = vst [vmem:[%s8110_s6 + $0x30] sm:$0xff] %v2081_v3  ;;  %v2084_v29 = vadd.f32 %v7837_v58, %v2083_v61  ;;  %v5436_v20 = vpop.f32.mrb[95].mxu1  ;;  %v2341_v61 = vadd.f32 %v6039_v13, %v7657_v5  ;;  %5780 = vmatpush3.bf16.msra.mxu1 %v6028_v22  ;;  %v2343_v5 = vadd.f32 %v6039_v13, %v7674_v12 }
 0x28f   :  { %v2345_v12 = vadd.f32 %v6039_v13, %v7693_v25  ;;  %v2347_v25 = vadd.f32 %v6039_v13, %v7708_v53  ;;  %v2349_v53 = vadd.f32 %v6039_v13, %v7721_v60 }
 0x290   :  { %2102 = vst [vmem:[%s8110_s6 + $0x38] sm:$0xff] %v2084_v29  ;;  %v7911_v52 = vpop.f32.mrb[180].mxu0 }
 0x291   :  { %v5747_v9 = vpop.f32.mrb[181].mxu0 }
 0x292   :  { %v7918_v56 = vpop.f32.mrb[182].mxu0 }
 0x293   :  { %v2088_v31 = vpop.f32.mrb[96].mxu1  ;;  %v5748_v16 = vpop.f32.mrb[183].mxu0 }
 0x294   :  { %v2089_v23 = vadd.f32 %v7837_v58, %v2088_v31  ;;  %v5439_v7 = vpop.f32.mrb[97].mxu1 }
 0x295   :  { %v2091_v38 = vpop.f32.mrb[98].mxu1 }
 0x296   :  { %2103 = vst [vmem:[%s8110_s6 + $0x40] sm:$0xff] %v2089_v23  ;;  %v2092_v35 = vadd.f32 %v7837_v58, %v2091_v38  ;;  %v5440_v47 = vpop.f32.mrb[99].mxu1 }
 0x298   :  { %2104 = vst [vmem:[%s8110_s6 + $0x48] sm:$0xff] %v2092_v35  ;;  %v7935_v51 = vpop.f32.mrb[184].mxu0  ;;  %v2342_v35 = vadd.f32 %v6039_v13, %v7666_v18  ;;  %v2344_v18 = vadd.f32 %v6039_v13, %v7683_v15  ;;  %v2346_v15 = vadd.f32 %v6039_v13, %v7704_v48  ;;  %v2348_v48 = vadd.f32 %v6039_v13, %v7715_v46 }
 0x299   :  { %v5751_v1 = vpop.f32.mrb[185].mxu0 }
 0x29a   :  { %v7938_v23 = vpop.f32.mrb[186].mxu0 }
 0x29b   :  { %v2468_v3 = vpop.f32.mrb[100].mxu1  ;;  %v5752_v38 = vpop.f32.mrb[187].mxu0 }
 0x29c   :  { %v2507_v29 = vadd.f32 %v2468_v3, %v2340_v62  ;;  %v5495_v20 = vpop.f32.mrb[101].mxu1 }
 0x29d   :  { %v2471_v32 = vpop.f32.mrb[102].mxu1 }
 0x29e   :  { %v2696_v17 = vadd.f32 %v7732_v41, %v2507_v29  ;;  %v2508_v63 = vadd.f32 %v2471_v32, %v2341_v61  ;;  %v5496_v31 = vpop.f32.mrb[103].mxu1 }
 0x2a0   :  { %v2697_v7 = vadd.f32 %v7739_v37, %v2508_v63  ;;  %v7943_v62 = vpop.f32.mrb[188].mxu0 }
 0x2a1   :  { %v5755_v61 = vpop.f32.mrb[189].mxu0 }
 0x2a2   :  { %v7946_v29 = vpop.f32.mrb[190].mxu0 }
 0x2a3   :  { %v2476_v47 = vpop.f32.mrb[104].mxu1  ;;  %v5756_v20 = vpop.f32.mrb[191].mxu0 }
 0x2a4   :  { %v2509_v9 = vadd.f32 %v2476_v47, %v2342_v35  ;;  %v5499_v49 = vpop.f32.mrb[105].mxu1 }
 0x2a5   :  { %v2479_v16 = vpop.f32.mrb[106].mxu1 }
 0x2a6   :  { %v2698_v41 = vadd.f32 %v7750_v30, %v2509_v9  ;;  %v2510_v3 = vadd.f32 %v2479_v16, %v2343_v5  ;;  %v5500_v22 = vpop.f32.mrb[107].mxu1 }
 0x2a8   :  { %v2699_v37 = vadd.f32 %v7757_v39, %v2510_v3  ;;  %v7951_v38 = vpop.f32.mrb[192].mxu0 }
 0x2a9   :  { %v5759_v5 = vpop.f32.mrb[193].mxu0 }
 0x2aa   :  { %v7954_v9 = vpop.f32.mrb[194].mxu0 }
 0x2ab   :  { %v2484_v32 = vpop.f32.mrb[108].mxu1  ;;  %v5760_v49 = vpop.f32.mrb[195].mxu0 }
 0x2ac   :  { %v2511_v63 = vadd.f32 %v2484_v32, %v2344_v18  ;;  %v5503_v31 = vpop.f32.mrb[109].mxu1 }
 0x2ad   :  { %v2487_v1 = vpop.f32.mrb[110].mxu1 }
 0x2ae   :  { %v2700_v30 = vadd.f32 %v7768_v44, %v2511_v63  ;;  %v2512_v35 = vadd.f32 %v2487_v1, %v2345_v12  ;;  %v5504_v47 = vpop.f32.mrb[111].mxu1 }
 0x2b0   :  { %v2701_v39 = vadd.f32 %v7775_v42, %v2512_v35  ;;  %v7959_v20 = vpop.f32.mrb[196].mxu0 }
 0x2b1   :  { %v5763_v12 = vpop.f32.mrb[197].mxu0 }
 0x2b2   :  { %v7962_v63 = vpop.f32.mrb[198].mxu0 }
 0x2b3   :  { %v2492_v16 = vpop.f32.mrb[112].mxu1  ;;  %v5764_v31 = vpop.f32.mrb[199].mxu0 }
 0x2b4   :  { %v2513_v3 = vadd.f32 %v2492_v16, %v2346_v15  ;;  %v5507_v22 = vpop.f32.mrb[113].mxu1 }
 0x2b5   :  { %v2495_v61 = vpop.f32.mrb[114].mxu1 }
 0x2b6   :  { %v2702_v44 = vadd.f32 %v7783_v36, %v2513_v3  ;;  %v2514_v18 = vadd.f32 %v2495_v61, %v2347_v25  ;;  %v5508_v32 = vpop.f32.mrb[115].mxu1 }
 0x2b8   :  { %v2703_v42 = vadd.f32 %v7786_v2, %v2514_v18 }
 0x2bb   :  { %v2500_v1 = vpop.f32.mrb[116].mxu1 }
 0x2bc   :  { %v2515_v35 = vadd.f32 %v2500_v1, %v2348_v48  ;;  %v5511_v47 = vpop.f32.mrb[117].mxu1 }
 0x2bd   :  { %v2503_v5 = vpop.f32.mrb[118].mxu1 }
 0x2be   :  { %v2704_v49 = vadd.f32 %v7791_v34, %v2515_v35  ;;  %v2516_v15 = vadd.f32 %v2503_v5, %v2349_v53  ;;  %v5512_v36 = vpop.f32.mrb[119].mxu1 }
 0x2c0   :  { %v2705_v16 = vadd.f32 %v7793_v21, %v2516_v15 }
 0x2c3   :  { %v2901_v25 = vpop.f32.mrb[120].mxu1 }
 0x2c4   :  { %v2940_v3 = vadd.f32 %v2901_v25, %v2696_v17  ;;  %v5567_v22 = vpop.f32.mrb[121].mxu1 }
 0x2c5   :  { %v2904_v61 = vpop.f32.mrb[122].mxu1 }
 0x2c6   :  { %v3097_v2 = vadd.f32 %v7798_v26, %v2940_v3  ;;  %v2941_v18 = vadd.f32 %v2904_v61, %v2697_v7  ;;  %v5568_v46 = vpop.f32.mrb[123].mxu1 }
 0x2c8   :  { %v3098_v32 = vadd.f32 %v7800_v8, %v2941_v18 }
 0x2cb   :  { %v2909_v60 = vpop.f32.mrb[124].mxu1 }
 0x2cc   :  { %v2942_v13 = vadd.f32 %v2909_v60, %v2698_v41  ;;  %v5571_v12 = vpop.f32.mrb[125].mxu1 }
 0x2cd   :  { %v2912_v31 = vpop.f32.mrb[126].mxu1 }
 0x2ce   :  { %v3099_v34 = vadd.f32 %v7805_v45, %v2942_v13  ;;  %v2943_v48 = vadd.f32 %v2912_v31, %v2699_v37  ;;  %v5572_v1 = vpop.f32.mrb[127].mxu1 }
 0x2d0   :  { %v3100_v21 = vadd.f32 %v7807_v33, %v2943_v48 }
 0x2d3   :  { %v2917_v53 = vpop.f32.mrb[128].mxu1 }
 0x2d4   :  { %v2944_v17 = vadd.f32 %v2917_v53, %v2700_v30  ;;  %v5575_v35 = vpop.f32.mrb[129].mxu1 }
 0x2d5   :  { %v2920_v47 = vpop.f32.mrb[130].mxu1 }
 0x2d6   :  { %v3101_v26 = vadd.f32 %v7812_v28, %v2944_v17  ;;  %v2945_v7 = vadd.f32 %v2920_v47, %v2701_v39  ;;  %v5576_v5 = vpop.f32.mrb[131].mxu1 }
 0x2d8   :  { %v3102_v8 = vadd.f32 %v7814_v50, %v2945_v7 }
 0x2db   :  { %v2925_v15 = vpop.f32.mrb[132].mxu1 }
 0x2dc   :  { %v2946_v41 = vadd.f32 %v2925_v15, %v2702_v44  ;;  %v5579_v36 = vpop.f32.mrb[133].mxu1 }
 0x2dd   :  { %v2928_v25 = vpop.f32.mrb[134].mxu1 }
 0x2de   :  { %v3103_v45 = vadd.f32 %v7819_v27, %v2946_v41  ;;  %v2947_v37 = vadd.f32 %v2928_v25, %v2703_v42  ;;  %v5580_v3 = vpop.f32.mrb[135].mxu1 }
 0x2e0   :  { %v3104_v33 = vadd.f32 %v7821_v55, %v2947_v37 }
 0x2e3   :  { %v2933_v22 = vpop.f32.mrb[136].mxu1 }
 0x2e4   :  { %v2948_v30 = vadd.f32 %v2933_v22, %v2704_v49  ;;  %v5583_v61 = vpop.f32.mrb[137].mxu1 }
 0x2e5   :  { %v2936_v18 = vpop.f32.mrb[138].mxu1 }
 0x2e6   :  { %v3105_v28 = vadd.f32 %v7826_v57, %v2948_v30  ;;  %v2949_v39 = vadd.f32 %v2936_v18, %v2705_v16  ;;  %v5584_v46 = vpop.f32.mrb[139].mxu1 }
 0x2e8   :  { %v3106_v50 = vadd.f32 %v7828_v43, %v2949_v39 }
 0x2eb   :  { %v3293_v60 = vpop.f32.mrb[140].mxu1 }
 0x2ec   :  { %v3332_v44 = vadd.f32 %v3293_v60, %v3097_v2  ;;  %v5639_v13 = vpop.f32.mrb[141].mxu1 }
 0x2ed   :  { %v3296_v12 = vpop.f32.mrb[142].mxu1 }
 0x2ee   :  { %v3567_v27 = vadd.f32 %v7830_v54, %v3332_v44  ;;  %v3333_v42 = vadd.f32 %v3296_v12, %v3098_v32  ;;  %v5640_v31 = vpop.f32.mrb[143].mxu1 }
 0x2ef   :  { %v6042_v31 = vld [vmem:[%s8105_s0 + $0x48] sm:$0xf] }
 0x2f0   :  { %v3568_v55 = vadd.f32 %v7832_v19, %v3333_v42 }
 0x2f3   :  { %v3301_v48 = vpop.f32.mrb[144].mxu1 }
 0x2f4   :  { %v3334_v49 = vadd.f32 %v3301_v48, %v3099_v34  ;;  %v5643_v1 = vpop.f32.mrb[145].mxu1 }
 0x2f5   :  { %v3304_v53 = vpop.f32.mrb[146].mxu1 }
 0x2f6   :  { %v3569_v57 = vadd.f32 %v7840_v11, %v3334_v49  ;;  %v3335_v16 = vadd.f32 %v3304_v53, %v3100_v21  ;;  %v5644_v17 = vpop.f32.mrb[147].mxu1 }
 0x2f8   :  { %v3570_v43 = vadd.f32 %v7846_v40, %v3335_v16 }
 0x2fb   :  { %v3309_v35 = vpop.f32.mrb[148].mxu1 }
 0x2fc   :  { %v3336_v2 = vadd.f32 %v3309_v35, %v3101_v26  ;;  %v5647_v47 = vpop.f32.mrb[149].mxu1 }
 0x2fd   :  { %v3312_v7 = vpop.f32.mrb[150].mxu1 }
 0x2fe   :  { %v3571_v54 = vadd.f32 %v7856_v10, %v3336_v2  ;;  %v3337_v32 = vadd.f32 %v3312_v7, %v3102_v8  ;;  %v5648_v5 = vpop.f32.mrb[151].mxu1 }
 0x300   :  { %v3572_v19 = vadd.f32 %v7862_v14, %v3337_v32  ;;  %v6044_v32 = vld [vmem:[%s8105_s0 + $0x50] sm:$0xf] }
 0x301   :  { %v3937_v5 = vunpack.c.l.bf16 %v6044_v32 }
 0x303   :  { %v3317_v15 = vpop.f32.mrb[152].mxu1 }
 0x304   :  { %v3338_v34 = vadd.f32 %v3317_v15, %v3103_v45  ;;  %v5651_v41 = vpop.f32.mrb[153].mxu1 }
 0x305   :  { %v3320_v36 = vpop.f32.mrb[154].mxu1 }
 0x306   :  { %v7986_v11 = vadd.f32 %v7872_v24, %v3338_v34  ;;  %v3339_v21 = vadd.f32 %v3320_v36, %v3104_v33  ;;  %v5652_v25 = vpop.f32.mrb[155].mxu1  ;;  %v6040_v33 = vld [vmem:[%s8105_s0 + $0x40] sm:$0xf] }
 0x308   :  { %v7989_v40 = vadd.f32 %v7881_v6, %v3339_v21  ;;  %v3933_v6 = vunpack.c.l.bf16 %v6040_v33 }
 0x30b   :  { %v3325_v26 = vpop.f32.mrb[156].mxu1 }
 0x30c   :  { %v3340_v37 = vadd.f32 %v3325_v26, %v3105_v28  ;;  %v5655_v3 = vpop.f32.mrb[157].mxu1 }
 0x30d   :  { %v3328_v10 = vpop.f32.mrb[158].mxu1 }
 0x30e   :  { %v7992_v8 = vadd.f32 %v7891_v4, %v3340_v37  ;;  %v3341_v14 = vadd.f32 %v3328_v10, %v3106_v50  ;;  %v5656_v22 = vpop.f32.mrb[159].mxu1  ;;  %v6041_v4 = vld [vmem:[%s8105_s0 + $0x44] sm:$0xf] }
 0x30f   :  { %v3934_v46 = vunpack.c.l.bf16 %v6041_v4  ;;  %v6046_v22 = vld [vmem:[%s8105_s0 + $0x58] sm:$0xf] }
 0x310   :  { %v7995_v45 = vadd.f32 %v7898_v59, %v3341_v14 }
 0x313   :  { %v3695_v30 = vpop.f32.mrb[160].mxu1 }
 0x314   :  { %v3734_v24 = vadd.f32 %v3695_v30, %v3567_v27  ;;  %v5711_v61 = vpop.f32.mrb[161].mxu1  ;;  %v3939_v30 = vunpack.c.l.bf16 %v6046_v22 }
 0x315   :  { %v3698_v18 = vpop.f32.mrb[162].mxu1  ;;  %v6047_v61 = vld [vmem:[%s8105_s0 + $0x5c] sm:$0xf] }
 0x316   :  { %v3923_v28 = vadd.f32 %v7911_v52, %v3734_v24  ;;  %v3735_v39 = vadd.f32 %v3698_v18, %v3568_v55  ;;  %v5712_v50 = vpop.f32.mrb[163].mxu1  ;;  %v3935_v52 = vunpack.c.l.bf16 %v6042_v31  ;;  %v3940_v18 = vunpack.c.l.bf16 %v6047_v61 }
 0x318   :  { %v3943_v59 = vadd.f32 %v3933_v6, %v3923_v28  ;;  %v3924_v60 = vadd.f32 %v7918_v56, %v3735_v39  ;;  %v6043_v56 = vld [vmem:[%s8105_s0 + $0x4c] sm:$0xf] }
 0x319   :  { %v3936_v16 = vunpack.c.l.bf16 %v6043_v56 }
 0x31a   :  { %v3944_v44 = vadd.f32 %v3934_v46, %v3924_v60  ;;  %v3953_v12 = vmax.f32 %v3943_v59, 0.0  ;;  %v6048_v60 = vld [vmem:[%s8105_s0 + $0x60] sm:$0xf] }
 0x31b   :  { %v3703_v13 = vpop.f32.mrb[164].mxu1 }
 0x31c   :  { %v3954_v27 = vmax.f32 %v3944_v44, 0.0  ;;  %v3736_v42 = vadd.f32 %v3703_v13, %v3569_v57  ;;  %v5715_v55 = vpop.f32.mrb[165].mxu1  ;;  %v3941_v44 = vunpack.c.l.bf16 %v6048_v60 }
 0x31d   :  { %v3706_v48 = vpop.f32.mrb[166].mxu1 }
 0x31e   :  { %v3963_v49 = vpack.c.bf16 %v3954_v27, %v3953_v12  ;;  %v3925_v1 = vadd.f32 %v7935_v51, %v3736_v42  ;;  %v3737_v53 = vadd.f32 %v3706_v48, %v3570_v43  ;;  %v5716_v17 = vpop.f32.mrb[167].mxu1  ;;  %v6049_v42 = vld [vmem:[%s8105_s0 + $0x64] sm:$0xf] }
 0x31f   :  { %v3942_v31 = vunpack.c.l.bf16 %v6049_v42 }
 0x320   :  { %4816 = vst [vmem:[%s8108_s5 + $0x28] sm:$0xff] %v3963_v49   ;;  %v3945_v57 = vadd.f32 %v3935_v52, %v3925_v1  ;;  %v3926_v35 = vadd.f32 %v7938_v23, %v3737_v53  ;;  %5782 = vmatmul.mubr.bf16.vlgmr.msra.gmra.mrb[180].mxu1 %v3963_v49  ;;  %v6045_v23 = vld [vmem:[%s8105_s0 + $0x54] sm:$0xf] }
 0x321   :  { %5785 = vmatprep.mubr.msk.bf16.mxu1 %vm6051_vm0, %v6050_v0  ;;  %v3938_v21 = vunpack.c.l.bf16 %v6045_v23 }
 0x322   :  { %v3946_v2 = vadd.f32 %v3936_v16, %v3926_v35  ;;  %v3955_v43 = vmax.f32 %v3945_v57, 0.0 }
 0x323   :  { %v3711_v51 = vpop.f32.mrb[168].mxu1 }
 0x324   :  { %v3956_v47 = vmax.f32 %v3946_v2, 0.0  ;;  %v3738_v7 = vadd.f32 %v3711_v51, %v3571_v54  ;;  %v5719_v15 = vpop.f32.mrb[169].mxu1 }
 0x325   :  { %v3714_v34 = vpop.f32.mrb[170].mxu1 }
 0x326   :  { %v3927_v41 = vadd.f32 %v7943_v62, %v3738_v7  ;;  %v3739_v36 = vadd.f32 %v3714_v34, %v3572_v19  ;;  %v5720_v25 = vpop.f32.mrb[171].mxu1  ;;  %v3964_v26 = vpack.c.bf16 %v3956_v47, %v3955_v43 }
 0x328   :  { %v3947_v37 = vadd.f32 %v3937_v5, %v3927_v41  ;;  %v3928_v54 = vadd.f32 %v7946_v29, %v3739_v36  ;;  %4817 = vst [vmem:[%s8108_s5 + $0x30] sm:$0xff] %v3964_v26   ;;  %5786 = vmatmul.mubr.bf16.gmra.mrb[184].mxu1 %v3964_v26 }
 0x329   :  { %5789 = vmatprep.mubr.msk.bf16.mxu1 %vm6051_vm0, %v6050_v0 }
 0x32a   :  { %v3948_v62 = vadd.f32 %v3938_v21, %v3928_v54  ;;  %v3957_v3 = vmax.f32 %v3947_v37, 0.0 }
 0x32b   :  { %v3719_v19 = vpop.f32.mrb[172].mxu1 }
 0x32c   :  { %v3958_v10 = vmax.f32 %v3948_v62, 0.0  ;;  %v3740_v14 = vadd.f32 %v3719_v19, %v7986_v11  ;;  %v5723_v29 = vpop.f32.mrb[173].mxu1 }
 0x32d   :  { %v3722_v24 = vpop.f32.mrb[174].mxu1 }
 0x32e   :  { %v3929_v33 = vadd.f32 %v7951_v38, %v3740_v14  ;;  %v3741_v6 = vadd.f32 %v3722_v24, %v7989_v40  ;;  %v5724_v28 = vpop.f32.mrb[175].mxu1  ;;  %v3965_v39 = vpack.c.bf16 %v3958_v10, %v3957_v3 }
 0x330   :  { %v3949_v4 = vadd.f32 %v3939_v30, %v3929_v33  ;;  %v3930_v11 = vadd.f32 %v7954_v9, %v3741_v6  ;;  %4818 = vst [vmem:[%s8108_s5 + $0x38] sm:$0xff] %v3965_v39   ;;  %5790 = vmatmul.mubr.bf16.gmra.mrb[188].mxu1 %v3965_v39 }
 0x331   :  { %5793 = vmatprep.mubr.msk.bf16.mxu1 %vm6051_vm0, %v6050_v0 }
 0x332   :  { %v3950_v38 = vadd.f32 %v3940_v18, %v3930_v11  ;;  %v3959_v46 = vmax.f32 %v3949_v4, 0.0 }
 0x333   :  { %v3727_v40 = vpop.f32.mrb[176].mxu1 }
 0x334   :  { %v3960_v50 = vmax.f32 %v3950_v38, 0.0  ;;  %v3742_v59 = vadd.f32 %v3727_v40, %v7992_v8  ;;  %v5727_v9 = vpop.f32.mrb[177].mxu1 }
 0x335   :  { %v3730_v13 = vpop.f32.mrb[178].mxu1 }
 0x336   :  { %v3931_v12 = vadd.f32 %v7959_v20, %v3742_v59  ;;  %v3743_v27 = vadd.f32 %v3730_v13, %v7995_v45  ;;  %v5728_v52 = vpop.f32.mrb[179].mxu1  ;;  %v3966_v55 = vpack.c.bf16 %v3960_v50, %v3959_v46 }
 0x338   :  { %v3951_v48 = vadd.f32 %v3941_v44, %v3931_v12  ;;  %v3932_v8 = vadd.f32 %v7962_v63, %v3743_v27  ;;  %4819 = vst [vmem:[%s8108_s5 + $0x40] sm:$0xff] %v3966_v55   ;;  %5794 = vmatmul.mubr.bf16.gmra.mrb[192].mxu1 %v3966_v55 }
 0x339   :  { %5797 = vmatprep.mubr.msk.bf16.mxu1 %vm6051_vm0, %v6050_v0 }
 0x33a   :  { %v3952_v20 = vadd.f32 %v3942_v31, %v3932_v8  ;;  %v3961_v45 = vmax.f32 %v3951_v48, 0.0 }
 0x33c   :  { %v3962_v49 = vmax.f32 %v3952_v20, 0.0 }
 0x33e   :  { %v3967_v1 = vpack.c.bf16 %v3962_v49, %v3961_v45 }
 0x340   :  { %4820 = vst [vmem:[%s8108_s5 + $0x48] sm:$0xff] %v3967_v1   ;;  %5798 = vmatmul.mubr.bf16.gmra.mrb[196].mxu1 %v3967_v1 }
 0x3f3   :  { %v4112_v53 = vpop.f32.mrb[180].mxu1 }
 0x3f4   :  { %v4113_v63 = vadd.f32 %v7837_v58, %v4112_v53  ;;  %v5783_v56 = vpop.f32.mrb[181].mxu1 }
 0x3f5   :  { %v4115_v16 = vpop.f32.mrb[182].mxu1 }
 0x3f6   :  { %4732 = vst [vmem:[%s8110_s6 + $0x50] sm:$0xff] %v4113_v63  ;;  %v4116_v0 = vadd.f32 %v7837_v58, %v4115_v16  ;;  %v5784_v17 = vpop.f32.mrb[183].mxu1 }
 0x3f8   :  { %4733 = vst [vmem:[%s8110_s6 + $0x58] sm:$0xff] %v4116_v0 }
 0x3fb   :  { %v4120_v57 = vpop.f32.mrb[184].mxu1 }
 0x3fc   :  { %v4121_v35 = vadd.f32 %v7837_v58, %v4120_v57  ;;  %v5787_v2 = vpop.f32.mrb[185].mxu1 }
 0x3fd   :  { %v4123_v51 = vpop.f32.mrb[186].mxu1 }
 0x3fe   :  { %4734 = vst [vmem:[%s8110_s6 + $0x60] sm:$0xff] %v4121_v35  ;;  %v4124_v43 = vadd.f32 %v7837_v58, %v4123_v51  ;;  %v5788_v47 = vpop.f32.mrb[187].mxu1 }
 0x400   :  { %4735 = vst [vmem:[%s8110_s6 + $0x68] sm:$0xff] %v4124_v43 }
 0x403   :  { %v4128_v7 = vpop.f32.mrb[188].mxu1 }
 0x404   :  { %v4129_v32 = vadd.f32 %v7837_v58, %v4128_v7  ;;  %v5791_v5 = vpop.f32.mrb[189].mxu1 }
 0x405   :  { %v4131_v15 = vpop.f32.mrb[190].mxu1 }
 0x406   :  { %4736 = vst [vmem:[%s8110_s6 + $0x70] sm:$0xff] %v4129_v32  ;;  %v4132_v34 = vadd.f32 %v7837_v58, %v4131_v15  ;;  %v5792_v41 = vpop.f32.mrb[191].mxu1 }
 0x408   :  { %4737 = vst [vmem:[%s8110_s6 + $0x78] sm:$0xff] %v4132_v34 }
 0x40b   :  { %v4136_v36 = vpop.f32.mrb[192].mxu1 }
 0x40c   :  { %v4137_v23 = vadd.f32 %v7837_v58, %v4136_v36  ;;  %v5795_v21 = vpop.f32.mrb[193].mxu1 }
 0x40d   :  { %v4139_v25 = vpop.f32.mrb[194].mxu1 }
 0x40e   :  { %4738 = vst [vmem:[%s8110_s6 + $0x80] sm:$0xff] %v4137_v23  ;;  %v4140_v26 = vadd.f32 %v7837_v58, %v4139_v25  ;;  %v5796_v37 = vpop.f32.mrb[195].mxu1 }
 0x410   :  { %4739 = vst [vmem:[%s8110_s6 + $0x88] sm:$0xff] %v4140_v26 }
 0x413   :  { %v4144_v54 = vpop.f32.mrb[196].mxu1 }
 0x414   :  { %v4145_v62 = vadd.f32 %v7837_v58, %v4144_v54  ;;  %v5799_v19 = vpop.f32.mrb[197].mxu1 }
 0x415   :  { %v4147_v3 = vpop.f32.mrb[198].mxu1 }
 0x416   :  { %4740 = vst [vmem:[%s8110_s6 + $0x90] sm:$0xff] %v4145_v62  ;;  %v4148_v10 = vadd.f32 %v7837_v58, %v4147_v3  ;;  %v5800_v14 = vpop.f32.mrb[199].mxu1 }
 0x418   :  { %4741 = vst [vmem:[%s8110_s6 + $0x98] sm:$0xff] %v4148_v10 }

</bundles_post_ra>
